<compile_context>
chip_gen: v6e
topology: v6e:2x2x1
jax: 0.10.0
libtpu: 0.0.40
codegen_flags: <defaults>
</compile_context>

<pallas_src>
import functools

import jax
import jax.numpy as jnp
from jax.experimental import pallas as pl
from jax.experimental.pallas import tpu as pltpu

BN_EPS = 1e-5


def _conv3x3(src_ref, w_ref, H, W):
    """3x3 stride-1 conv reading from a zero-padded (H+2, W+2, Cin) VMEM ref.

    w_ref: (3, 3*Cin, Cout) bf16 -- the 3 kx taps of each kernel row are merged
    into the contraction dimension, so each kernel row is one MXU matmul with
    K = 3*Cin.  Returns an (H*W, Cout) f32 accumulator.
    """
    acc = None
    for ky in range(3):
        patch = jnp.concatenate(
            [src_ref[ky:ky + H, kx:kx + W, :] for kx in range(3)], axis=-1)
        patch = patch.reshape(H * W, patch.shape[-1])            # (H*W, 3*Cin)
        part = jnp.dot(patch, w_ref[ky], preferred_element_type=jnp.float32)
        acc = part if acc is None else acc + part
    return acc


def basic_block_kernel(x_ref, w1_ref, b1_ref, w2_ref, b2_ref, out_ref,
                       xpad_s, h1pad_s, *, H, W, C):
    HP, WP = H + 2, W + 2

    # Zero ONLY the 1-pixel halo of the persistent scratches.  The interior is
    # fully rewritten below every grid step, but the halo must be re-zeroed
    # each step because scratch persists across (possibly core-split) steps.
    zrow = jnp.zeros((1, WP, C), xpad_s.dtype)
    zcol = jnp.zeros((HP, 1, C), xpad_s.dtype)
    for pad_s in (xpad_s, h1pad_s):
        pad_s[0:1, :, :] = zrow
        pad_s[HP - 1:HP, :, :] = zrow
        pad_s[:, 0:1, :] = zcol
        pad_s[:, WP - 1:WP, :] = zcol

    # Current image (bf16) into the padded conv1 input scratch.
    xpad_s[1:1 + H, 1:1 + W, :] = x_ref[0]

    # conv1 (BN1 scale pre-folded into w1) -> +bias -> ReLU   (epilogue in f32)
    h1 = _conv3x3(xpad_s, w1_ref, H, W) + b1_ref[...]
    h1 = jnp.maximum(h1, 0.0)

    # Re-pad the intermediate (bf16) for conv2.
    h1pad_s[1:1 + H, 1:1 + W, :] = h1.astype(h1pad_s.dtype).reshape(H, W, C)

    # conv2 (BN2 scale pre-folded into w2) -> +bias -> +identity -> ReLU
    h2 = _conv3x3(h1pad_s, w2_ref, H, W) + b2_ref[...]
    residual = x_ref[0].astype(jnp.float32).reshape(H * W, C)
    out = jnp.maximum(h2 + residual, 0.0)
    out_ref[...] = out.reshape(1, H, W, C).astype(out_ref.dtype)


def basic_block_pallas(x_nchw, params):
    x = jnp.transpose(x_nchw, (0, 2, 3, 1))                   # NCHW -> NHWC
    N, H, W, C = x.shape
    P = params["w1"].shape[-1]
    assert params["w1"].shape[2] == C and P == C, \
        "identity residual path needs inplanes == planes (stride=1, no downsample)"

    def fold(gamma, beta, mean, var):
        s = gamma / jnp.sqrt(var + BN_EPS)
        return s, beta - mean * s

    s1, b1 = fold(params["gamma1"], params["beta1"], params["mean1"], params["var1"])
    s2, b2 = fold(params["gamma2"], params["beta2"], params["mean2"], params["var2"])

    # Fold BN scale into the conv weights, merge the 3 kx taps of each kernel
    # row into K (HWIO (3,3,Cin,Cout) -> (3, 3*Cin, Cout)), cast MXU operands
    # to bf16 (accumulation stays f32 inside the kernel).
    w1m = (params["w1"] * s1).reshape(3, 3 * C, P).astype(jnp.bfloat16)
    w2m = (params["w2"] * s2).reshape(3, 3 * P, P).astype(jnp.bfloat16)
    b1 = b1.reshape(1, P).astype(jnp.float32)
    b2 = b2.reshape(1, P).astype(jnp.float32)
    x_bf = x.astype(jnp.bfloat16)                               # halve HBM read

    kernel = functools.partial(basic_block_kernel, H=H, W=W, C=P)
    out_nhwc = pl.pallas_call(
        kernel,
        out_shape=jax.ShapeDtypeStruct((N, H, W, P), jnp.float32),
        grid_spec=pltpu.PrefetchScalarGridSpec(
            num_scalar_prefetch=0,
            grid=(N,),                                          # one image / step
            in_specs=[
                pl.BlockSpec((1, H, W, C), lambda n: (n, 0, 0, 0)),
                pl.BlockSpec((3, 3 * C, P), lambda n: (0, 0, 0)),
                pl.BlockSpec((1, P), lambda n: (0, 0)),
                pl.BlockSpec((3, 3 * P, P), lambda n: (0, 0, 0)),
                pl.BlockSpec((1, P), lambda n: (0, 0)),
            ],
            out_specs=pl.BlockSpec((1, H, W, P), lambda n: (n, 0, 0, 0)),
            scratch_shapes=[
                pltpu.VMEM((H + 2, W + 2, C), jnp.bfloat16),    # padded conv1 input
                pltpu.VMEM((H + 2, W + 2, P), jnp.bfloat16),    # padded conv2 input
            ],
        ),
        compiler_params=pltpu.CompilerParams(
            dimension_semantics=("parallel",),                  # megacore on v7x
            vmem_limit_bytes=32 * 1024 * 1024,
        ),
    )(x_bf, w1m, b1, w2m, b2)
    return jnp.transpose(out_nhwc, (0, 3, 1, 2))                # NHWC -> NCHW


def basic_block_ref(x_nchw, params):
    """Pure-JAX f32 reference (eval-mode BN), mirrors the PyTorch forward."""
    x = jnp.transpose(x_nchw, (0, 2, 3, 1)).astype(jnp.float32)

    def conv(h, w):
        return jax.lax.conv_general_dilated(
            h, w, window_strides=(1, 1), padding=((1, 1), (1, 1)),
            dimension_numbers=("NHWC", "HWIO", "NHWC"))

    def bn(h, g, b, m, v):
        return (h - m) / jnp.sqrt(v + BN_EPS) * g + b

    h = conv(x, params["w1"])
    h = jnp.maximum(bn(h, params["gamma1"], params["beta1"],
                       params["mean1"], params["var1"]), 0.0)
    h = conv(h, params["w2"])
    h = bn(h, params["gamma2"], params["beta2"], params["mean2"], params["var2"])
    out = jnp.maximum(h + x, 0.0)
    return jnp.transpose(out, (0, 3, 1, 2))


def make_params(key, inplanes, planes):
    ks = jax.random.split(key, 12)
    f32 = jnp.float32
    return {
        "w1":     jax.random.normal(ks[0], (3, 3, inplanes, planes), f32) * 0.1,
        "gamma1": 1.0 + 0.1 * jax.random.normal(ks[1], (planes,), f32),
        "beta1":  0.1 * jax.random.normal(ks[2], (planes,), f32),
        "mean1":  0.1 * jax.random.normal(ks[3], (planes,), f32),
        "var1":   jax.nn.softplus(jax.random.normal(ks[4], (planes,), f32)) + 0.5,
        "w2":     jax.random.normal(ks[5], (3, 3, planes, planes), f32) * 0.1,
        "gamma2": 1.0 + 0.1 * jax.random.normal(ks[6], (planes,), f32),
        "beta2":  0.1 * jax.random.normal(ks[7], (planes,), f32),
        "mean2":  0.1 * jax.random.normal(ks[8], (planes,), f32),
        "var2":   jax.nn.softplus(jax.random.normal(ks[9], (planes,), f32)) + 0.5,
    }


if __name__ == "__main__":
    key = jax.random.PRNGKey(0)
    k_x, k_p = jax.random.split(key)

    N, C, H, W = 2, 8, 16, 16              # NCHW, as PyTorch would see it
    x = jax.random.normal(k_x, (N, C, H, W), jnp.float32)
    params = make_params(k_p, inplanes=C, planes=C)

    out = jax.block_until_ready(basic_block_pallas(x, params))
    ref = jax.block_until_ready(basic_block_ref(x, params))

    assert out.shape == (N, C, H, W) and out.dtype == jnp.float32
    # Tolerance accounts for bf16 MXU operands across two chained 3x3 convs
    # (reference is pure f32).
    assert jnp.allclose(out, ref, atol=2e-2, rtol=2e-2), \
        f"mismatch: max abs diff {jnp.max(jnp.abs(out - ref))}"
    print("KERNEL_OK")
</pallas_src>

<mosaic_0001>
module attributes {stable_mosaic.version = 11 : i64} {
  func.func @basic_block_kernel(%arg0: i32, %arg1: memref<1x16x16x8xbf16, #tpu.memory_space<vmem>>, %arg2: memref<3x24x8xbf16, #tpu.memory_space<vmem>>, %arg3: memref<1x8xf32, #tpu.memory_space<vmem>>, %arg4: memref<3x24x8xbf16, #tpu.memory_space<vmem>>, %arg5: memref<1x8xf32, #tpu.memory_space<vmem>>, %arg6: memref<1x16x16x8xf32, #tpu.memory_space<vmem>>, %arg7: memref<18x18x8xbf16, #tpu.memory_space<vmem>>, %arg8: memref<18x18x8xbf16, #tpu.memory_space<vmem>>) attributes {dimension_semantics = [#tpu.dimension_semantics<parallel>], iteration_bounds = array<i64: 2>, scalar_prefetch = 0 : i64, scratch_operands = 2 : i64, tpu.core_type = #tpu.core_type<tc>, window_params = [{transform_indices = @transform_0, window_bounds = array<i64: 1, 16, 16, 8>}, {pipeline_mode = #tpu.pipeline_mode<synchronous>, transform_indices = @transform_1, window_bounds = array<i64: 3, 24, 8>}, {pipeline_mode = #tpu.pipeline_mode<synchronous>, transform_indices = @transform_2, window_bounds = array<i64: 1, 8>}, {pipeline_mode = #tpu.pipeline_mode<synchronous>, transform_indices = @transform_3, window_bounds = array<i64: 3, 24, 8>}, {pipeline_mode = #tpu.pipeline_mode<synchronous>, transform_indices = @transform_4, window_bounds = array<i64: 1, 8>}, {transform_indices = @transform_5, window_bounds = array<i64: 1, 16, 16, 8>}]} {
    %cst = arith.constant 0.000000e+00 : bf16
    %0 = vector.broadcast %cst : bf16 to vector<1x18x8xbf16>
    %cst_0 = arith.constant 0.000000e+00 : bf16
    %1 = vector.broadcast %cst_0 : bf16 to vector<18x1x8xbf16>
    %c0 = arith.constant 0 : index
    %c0_1 = arith.constant 0 : index
    %c0_2 = arith.constant 0 : index
    %2 = vector.load %arg7[%c0, %c0_1, %c0_2] : memref<18x18x8xbf16, #tpu.memory_space<vmem>>, vector<1x18x8xbf16>
    tpu.vector_store %arg7[%c0, %c0_1, %c0_2], %0 {strides = array<i32>} : memref<18x18x8xbf16, #tpu.memory_space<vmem>>, vector<1x18x8xbf16>,
    %c17 = arith.constant 17 : index
    %c0_3 = arith.constant 0 : index
    %c0_4 = arith.constant 0 : index
    %3 = vector.load %arg7[%c17, %c0_3, %c0_4] : memref<18x18x8xbf16, #tpu.memory_space<vmem>>, vector<1x18x8xbf16>
    tpu.vector_store %arg7[%c17, %c0_3, %c0_4], %0 {strides = array<i32>} : memref<18x18x8xbf16, #tpu.memory_space<vmem>>, vector<1x18x8xbf16>,
    %c0_5 = arith.constant 0 : index
    %c0_6 = arith.constant 0 : index
    %c0_7 = arith.constant 0 : index
    %4 = vector.load %arg7[%c0_5, %c0_6, %c0_7] : memref<18x18x8xbf16, #tpu.memory_space<vmem>>, vector<18x1x8xbf16>
    tpu.vector_store %arg7[%c0_5, %c0_6, %c0_7], %1 {strides = array<i32>} : memref<18x18x8xbf16, #tpu.memory_space<vmem>>, vector<18x1x8xbf16>,
    %c0_8 = arith.constant 0 : index
    %c17_9 = arith.constant 17 : index
    %c0_10 = arith.constant 0 : index
    %5 = vector.load %arg7[%c0_8, %c17_9, %c0_10] : memref<18x18x8xbf16, #tpu.memory_space<vmem>>, vector<18x1x8xbf16>
    tpu.vector_store %arg7[%c0_8, %c17_9, %c0_10], %1 {strides = array<i32>} : memref<18x18x8xbf16, #tpu.memory_space<vmem>>, vector<18x1x8xbf16>,
    %c0_11 = arith.constant 0 : index
    %c0_12 = arith.constant 0 : index
    %c0_13 = arith.constant 0 : index
    %6 = vector.load %arg8[%c0_11, %c0_12, %c0_13] : memref<18x18x8xbf16, #tpu.memory_space<vmem>>, vector<1x18x8xbf16>
    tpu.vector_store %arg8[%c0_11, %c0_12, %c0_13], %0 {strides = array<i32>} : memref<18x18x8xbf16, #tpu.memory_space<vmem>>, vector<1x18x8xbf16>,
    %c17_14 = arith.constant 17 : index
    %c0_15 = arith.constant 0 : index
    %c0_16 = arith.constant 0 : index
    %7 = vector.load %arg8[%c17_14, %c0_15, %c0_16] : memref<18x18x8xbf16, #tpu.memory_space<vmem>>, vector<1x18x8xbf16>
    tpu.vector_store %arg8[%c17_14, %c0_15, %c0_16], %0 {strides = array<i32>} : memref<18x18x8xbf16, #tpu.memory_space<vmem>>, vector<1x18x8xbf16>,
    %c0_17 = arith.constant 0 : index
    %c0_18 = arith.constant 0 : index
    %c0_19 = arith.constant 0 : index
    %8 = vector.load %arg8[%c0_17, %c0_18, %c0_19] : memref<18x18x8xbf16, #tpu.memory_space<vmem>>, vector<18x1x8xbf16>
    tpu.vector_store %arg8[%c0_17, %c0_18, %c0_19], %1 {strides = array<i32>} : memref<18x18x8xbf16, #tpu.memory_space<vmem>>, vector<18x1x8xbf16>,
    %c0_20 = arith.constant 0 : index
    %c17_21 = arith.constant 17 : index
    %c0_22 = arith.constant 0 : index
    %9 = vector.load %arg8[%c0_20, %c17_21, %c0_22] : memref<18x18x8xbf16, #tpu.memory_space<vmem>>, vector<18x1x8xbf16>
    tpu.vector_store %arg8[%c0_20, %c17_21, %c0_22], %1 {strides = array<i32>} : memref<18x18x8xbf16, #tpu.memory_space<vmem>>, vector<18x1x8xbf16>,
    %c0_23 = arith.constant 0 : index
    %c0_24 = arith.constant 0 : index
    %c0_25 = arith.constant 0 : index
    %c0_26 = arith.constant 0 : index
    %10 = vector.load %arg1[%c0_23, %c0_24, %c0_25, %c0_26] : memref<1x16x16x8xbf16, #tpu.memory_space<vmem>>, vector<1x16x16x8xbf16>
    %11 = vector.shape_cast %10 : vector<1x16x16x8xbf16> to vector<16x16x8xbf16>
    %c1 = arith.constant 1 : index
    %c1_27 = arith.constant 1 : index
    %c0_28 = arith.constant 0 : index
    %12 = vector.load %arg7[%c1, %c1_27, %c0_28] : memref<18x18x8xbf16, #tpu.memory_space<vmem>>, vector<16x16x8xbf16>
    tpu.vector_store %arg7[%c1, %c1_27, %c0_28], %11 {strides = array<i32>} : memref<18x18x8xbf16, #tpu.memory_space<vmem>>, vector<16x16x8xbf16>,
    %c0_29 = arith.constant 0 : index
    %c0_30 = arith.constant 0 : index
    %c0_31 = arith.constant 0 : index
    %13 = vector.load %arg7[%c0_29, %c0_30, %c0_31] : memref<18x18x8xbf16, #tpu.memory_space<vmem>>, vector<16x16x8xbf16>
    %c0_32 = arith.constant 0 : index
    %c1_33 = arith.constant 1 : index
    %c0_34 = arith.constant 0 : index
    %14 = vector.load %arg7[%c0_32, %c1_33, %c0_34] : memref<18x18x8xbf16, #tpu.memory_space<vmem>>, vector<16x16x8xbf16>
    %c0_35 = arith.constant 0 : index
    %c2 = arith.constant 2 : index
    %c0_36 = arith.constant 0 : index
    %15 = vector.load %arg7[%c0_35, %c2, %c0_36] : memref<18x18x8xbf16, #tpu.memory_space<vmem>>, vector<16x16x8xbf16>
    %16 = tpu.concatenate %13, %14, %15 in 2 : vector<16x16x8xbf16>, vector<16x16x8xbf16>, vector<16x16x8xbf16> -> vector<16x16x24xbf16>
    %17 = vector.shape_cast %16 : vector<16x16x24xbf16> to vector<256x24xbf16>
    %c0_37 = arith.constant 0 : index
    %c0_38 = arith.constant 0 : index
    %c0_39 = arith.constant 0 : index
    %18 = vector.load %arg2[%c0_37, %c0_38, %c0_39] : memref<3x24x8xbf16, #tpu.memory_space<vmem>>, vector<1x24x8xbf16>
    %19 = vector.shape_cast %18 : vector<1x24x8xbf16> to vector<24x8xbf16>
    %cst_40 = arith.constant dense<0.000000e+00> : vector<256x8xf32>
    %20 = tpu.matmul %17, %19, %cst_40 {dimension_numbers = #tpu.dot_dimension_numbers<[1], [0], [0], [1], [0, 0, 1, 1], [], []>} : vector<256x24xbf16>, vector<24x8xbf16>, vector<256x8xf32> -> vector<256x8xf32>
    %c1_41 = arith.constant 1 : index
    %c0_42 = arith.constant 0 : index
    %c0_43 = arith.constant 0 : index
    %21 = vector.load %arg7[%c1_41, %c0_42, %c0_43] : memref<18x18x8xbf16, #tpu.memory_space<vmem>>, vector<16x16x8xbf16>
    %c1_44 = arith.constant 1 : index
    %c1_45 = arith.constant 1 : index
    %c0_46 = arith.constant 0 : index
    %22 = vector.load %arg7[%c1_44, %c1_45, %c0_46] : memref<18x18x8xbf16, #tpu.memory_space<vmem>>, vector<16x16x8xbf16>
    %c1_47 = arith.constant 1 : index
    %c2_48 = arith.constant 2 : index
    %c0_49 = arith.constant 0 : index
    %23 = vector.load %arg7[%c1_47, %c2_48, %c0_49] : memref<18x18x8xbf16, #tpu.memory_space<vmem>>, vector<16x16x8xbf16>
    %24 = tpu.concatenate %21, %22, %23 in 2 : vector<16x16x8xbf16>, vector<16x16x8xbf16>, vector<16x16x8xbf16> -> vector<16x16x24xbf16>
    %25 = vector.shape_cast %24 : vector<16x16x24xbf16> to vector<256x24xbf16>
    %c1_50 = arith.constant 1 : index
    %c0_51 = arith.constant 0 : index
    %c0_52 = arith.constant 0 : index
    %26 = vector.load %arg2[%c1_50, %c0_51, %c0_52] : memref<3x24x8xbf16, #tpu.memory_space<vmem>>, vector<1x24x8xbf16>
    %27 = vector.shape_cast %26 : vector<1x24x8xbf16> to vector<24x8xbf16>
    %cst_53 = arith.constant dense<0.000000e+00> : vector<256x8xf32>
    %28 = tpu.matmul %25, %27, %cst_53 {dimension_numbers = #tpu.dot_dimension_numbers<[1], [0], [0], [1], [0, 0, 1, 1], [], []>} : vector<256x24xbf16>, vector<24x8xbf16>, vector<256x8xf32> -> vector<256x8xf32>
    %29 = arith.addf %20, %28 : vector<256x8xf32>
    %c2_54 = arith.constant 2 : index
    %c0_55 = arith.constant 0 : index
    %c0_56 = arith.constant 0 : index
    %30 = vector.load %arg7[%c2_54, %c0_55, %c0_56] : memref<18x18x8xbf16, #tpu.memory_space<vmem>>, vector<16x16x8xbf16>
    %c2_57 = arith.constant 2 : index
    %c1_58 = arith.constant 1 : index
    %c0_59 = arith.constant 0 : index
    %31 = vector.load %arg7[%c2_57, %c1_58, %c0_59] : memref<18x18x8xbf16, #tpu.memory_space<vmem>>, vector<16x16x8xbf16>
    %c2_60 = arith.constant 2 : index
    %c2_61 = arith.constant 2 : index
    %c0_62 = arith.constant 0 : index
    %32 = vector.load %arg7[%c2_60, %c2_61, %c0_62] : memref<18x18x8xbf16, #tpu.memory_space<vmem>>, vector<16x16x8xbf16>
    %33 = tpu.concatenate %30, %31, %32 in 2 : vector<16x16x8xbf16>, vector<16x16x8xbf16>, vector<16x16x8xbf16> -> vector<16x16x24xbf16>
    %34 = vector.shape_cast %33 : vector<16x16x24xbf16> to vector<256x24xbf16>
    %c2_63 = arith.constant 2 : index
    %c0_64 = arith.constant 0 : index
    %c0_65 = arith.constant 0 : index
    %35 = vector.load %arg2[%c2_63, %c0_64, %c0_65] : memref<3x24x8xbf16, #tpu.memory_space<vmem>>, vector<1x24x8xbf16>
    %36 = vector.shape_cast %35 : vector<1x24x8xbf16> to vector<24x8xbf16>
    %cst_66 = arith.constant dense<0.000000e+00> : vector<256x8xf32>
    %37 = tpu.matmul %34, %36, %cst_66 {dimension_numbers = #tpu.dot_dimension_numbers<[1], [0], [0], [1], [0, 0, 1, 1], [], []>} : vector<256x24xbf16>, vector<24x8xbf16>, vector<256x8xf32> -> vector<256x8xf32>
    %38 = arith.addf %29, %37 : vector<256x8xf32>
    %c0_67 = arith.constant 0 : index
    %c0_68 = arith.constant 0 : index
    %39 = vector.load %arg3[%c0_67, %c0_68] : memref<1x8xf32, #tpu.memory_space<vmem>>, vector<1x8xf32>
    %40 = vector.broadcast %39 : vector<1x8xf32> to vector<256x8xf32>
    %41 = arith.addf %38, %40 : vector<256x8xf32>
    %cst_69 = arith.constant 0.000000e+00 : f32
    %42 = vector.broadcast %cst_69 : f32 to vector<256x8xf32>
    %43 = arith.maximumf %41, %42 : vector<256x8xf32>
    %44 = arith.truncf %43 : vector<256x8xf32> to vector<256x8xbf16>
    %45 = vector.shape_cast %44 : vector<256x8xbf16> to vector<16x16x8xbf16>
    %c1_70 = arith.constant 1 : index
    %c1_71 = arith.constant 1 : index
    %c0_72 = arith.constant 0 : index
    %46 = vector.load %arg8[%c1_70, %c1_71, %c0_72] : memref<18x18x8xbf16, #tpu.memory_space<vmem>>, vector<16x16x8xbf16>
    tpu.vector_store %arg8[%c1_70, %c1_71, %c0_72], %45 {strides = array<i32>} : memref<18x18x8xbf16, #tpu.memory_space<vmem>>, vector<16x16x8xbf16>,
    %c0_73 = arith.constant 0 : index
    %c0_74 = arith.constant 0 : index
    %c0_75 = arith.constant 0 : index
    %47 = vector.load %arg8[%c0_73, %c0_74, %c0_75] : memref<18x18x8xbf16, #tpu.memory_space<vmem>>, vector<16x16x8xbf16>
    %c0_76 = arith.constant 0 : index
    %c1_77 = arith.constant 1 : index
    %c0_78 = arith.constant 0 : index
    %48 = vector.load %arg8[%c0_76, %c1_77, %c0_78] : memref<18x18x8xbf16, #tpu.memory_space<vmem>>, vector<16x16x8xbf16>
    %c0_79 = arith.constant 0 : index
    %c2_80 = arith.constant 2 : index
    %c0_81 = arith.constant 0 : index
    %49 = vector.load %arg8[%c0_79, %c2_80, %c0_81] : memref<18x18x8xbf16, #tpu.memory_space<vmem>>, vector<16x16x8xbf16>
    %50 = tpu.concatenate %47, %48, %49 in 2 : vector<16x16x8xbf16>, vector<16x16x8xbf16>, vector<16x16x8xbf16> -> vector<16x16x24xbf16>
    %51 = vector.shape_cast %50 : vector<16x16x24xbf16> to vector<256x24xbf16>
    %c0_82 = arith.constant 0 : index
    %c0_83 = arith.constant 0 : index
    %c0_84 = arith.constant 0 : index
    %52 = vector.load %arg4[%c0_82, %c0_83, %c0_84] : memref<3x24x8xbf16, #tpu.memory_space<vmem>>, vector<1x24x8xbf16>
    %53 = vector.shape_cast %52 : vector<1x24x8xbf16> to vector<24x8xbf16>
    %cst_85 = arith.constant dense<0.000000e+00> : vector<256x8xf32>
    %54 = tpu.matmul %51, %53, %cst_85 {dimension_numbers = #tpu.dot_dimension_numbers<[1], [0], [0], [1], [0, 0, 1, 1], [], []>} : vector<256x24xbf16>, vector<24x8xbf16>, vector<256x8xf32> -> vector<256x8xf32>
    %c1_86 = arith.constant 1 : index
    %c0_87 = arith.constant 0 : index
    %c0_88 = arith.constant 0 : index
    %55 = vector.load %arg8[%c1_86, %c0_87, %c0_88] : memref<18x18x8xbf16, #tpu.memory_space<vmem>>, vector<16x16x8xbf16>
    %c1_89 = arith.constant 1 : index
    %c1_90 = arith.constant 1 : index
    %c0_91 = arith.constant 0 : index
    %56 = vector.load %arg8[%c1_89, %c1_90, %c0_91] : memref<18x18x8xbf16, #tpu.memory_space<vmem>>, vector<16x16x8xbf16>
    %c1_92 = arith.constant 1 : index
    %c2_93 = arith.constant 2 : index
    %c0_94 = arith.constant 0 : index
    %57 = vector.load %arg8[%c1_92, %c2_93, %c0_94] : memref<18x18x8xbf16, #tpu.memory_space<vmem>>, vector<16x16x8xbf16>
    %58 = tpu.concatenate %55, %56, %57 in 2 : vector<16x16x8xbf16>, vector<16x16x8xbf16>, vector<16x16x8xbf16> -> vector<16x16x24xbf16>
    %59 = vector.shape_cast %58 : vector<16x16x24xbf16> to vector<256x24xbf16>
    %c1_95 = arith.constant 1 : index
    %c0_96 = arith.constant 0 : index
    %c0_97 = arith.constant 0 : index
    %60 = vector.load %arg4[%c1_95, %c0_96, %c0_97] : memref<3x24x8xbf16, #tpu.memory_space<vmem>>, vector<1x24x8xbf16>
    %61 = vector.shape_cast %60 : vector<1x24x8xbf16> to vector<24x8xbf16>
    %cst_98 = arith.constant dense<0.000000e+00> : vector<256x8xf32>
    %62 = tpu.matmul %59, %61, %cst_98 {dimension_numbers = #tpu.dot_dimension_numbers<[1], [0], [0], [1], [0, 0, 1, 1], [], []>} : vector<256x24xbf16>, vector<24x8xbf16>, vector<256x8xf32> -> vector<256x8xf32>
    %63 = arith.addf %54, %62 : vector<256x8xf32>
    %c2_99 = arith.constant 2 : index
    %c0_100 = arith.constant 0 : index
    %c0_101 = arith.constant 0 : index
    %64 = vector.load %arg8[%c2_99, %c0_100, %c0_101] : memref<18x18x8xbf16, #tpu.memory_space<vmem>>, vector<16x16x8xbf16>
    %c2_102 = arith.constant 2 : index
    %c1_103 = arith.constant 1 : index
    %c0_104 = arith.constant 0 : index
    %65 = vector.load %arg8[%c2_102, %c1_103, %c0_104] : memref<18x18x8xbf16, #tpu.memory_space<vmem>>, vector<16x16x8xbf16>
    %c2_105 = arith.constant 2 : index
    %c2_106 = arith.constant 2 : index
    %c0_107 = arith.constant 0 : index
    %66 = vector.load %arg8[%c2_105, %c2_106, %c0_107] : memref<18x18x8xbf16, #tpu.memory_space<vmem>>, vector<16x16x8xbf16>
    %67 = tpu.concatenate %64, %65, %66 in 2 : vector<16x16x8xbf16>, vector<16x16x8xbf16>, vector<16x16x8xbf16> -> vector<16x16x24xbf16>
    %68 = vector.shape_cast %67 : vector<16x16x24xbf16> to vector<256x24xbf16>
    %c2_108 = arith.constant 2 : index
    %c0_109 = arith.constant 0 : index
    %c0_110 = arith.constant 0 : index
    %69 = vector.load %arg4[%c2_108, %c0_109, %c0_110] : memref<3x24x8xbf16, #tpu.memory_space<vmem>>, vector<1x24x8xbf16>
    %70 = vector.shape_cast %69 : vector<1x24x8xbf16> to vector<24x8xbf16>
    %cst_111 = arith.constant dense<0.000000e+00> : vector<256x8xf32>
    %71 = tpu.matmul %68, %70, %cst_111 {dimension_numbers = #tpu.dot_dimension_numbers<[1], [0], [0], [1], [0, 0, 1, 1], [], []>} : vector<256x24xbf16>, vector<24x8xbf16>, vector<256x8xf32> -> vector<256x8xf32>
    %72 = arith.addf %63, %71 : vector<256x8xf32>
    %c0_112 = arith.constant 0 : index
    %c0_113 = arith.constant 0 : index
    %73 = vector.load %arg5[%c0_112, %c0_113] : memref<1x8xf32, #tpu.memory_space<vmem>>, vector<1x8xf32>
    %74 = vector.broadcast %73 : vector<1x8xf32> to vector<256x8xf32>
    %75 = arith.addf %72, %74 : vector<256x8xf32>
    %c0_114 = arith.constant 0 : index
    %c0_115 = arith.constant 0 : index
    %c0_116 = arith.constant 0 : index
    %c0_117 = arith.constant 0 : index
    %76 = vector.load %arg1[%c0_114, %c0_115, %c0_116, %c0_117] : memref<1x16x16x8xbf16, #tpu.memory_space<vmem>>, vector<1x16x16x8xbf16>
    %77 = vector.shape_cast %76 : vector<1x16x16x8xbf16> to vector<16x16x8xbf16>
    %78 = arith.extf %77 : vector<16x16x8xbf16> to vector<16x16x8xf32>
    %79 = vector.shape_cast %78 : vector<16x16x8xf32> to vector<256x8xf32>
    %80 = arith.addf %75, %79 : vector<256x8xf32>
    %cst_118 = arith.constant 0.000000e+00 : f32
    %81 = vector.broadcast %cst_118 : f32 to vector<256x8xf32>
    %82 = arith.maximumf %80, %81 : vector<256x8xf32>
    %83 = vector.shape_cast %82 : vector<256x8xf32> to vector<1x16x16x8xf32>
    %c0_119 = arith.constant 0 : index
    %c0_120 = arith.constant 0 : index
    %c0_121 = arith.constant 0 : index
    %c0_122 = arith.constant 0 : index
    %84 = vector.load %arg6[%c0_119, %c0_120, %c0_121, %c0_122] : memref<1x16x16x8xf32, #tpu.memory_space<vmem>>, vector<1x16x16x8xf32>
    tpu.vector_store %arg6[%c0_119, %c0_120, %c0_121, %c0_122], %83 {strides = array<i32>} : memref<1x16x16x8xf32, #tpu.memory_space<vmem>>, vector<1x16x16x8xf32>,
    return
  }
  func.func @transform_0(%arg0: i32) -> (i32, i32, i32, i32) {
    %c0_i32 = arith.constant 0 : i32
    %c0_i32_0 = arith.constant 0 : i32
    %c0_i32_1 = arith.constant 0 : i32
    %c0_i32_2 = arith.constant 0 : i32
    return %arg0, %c0_i32, %c0_i32_0, %c0_i32_1 : i32, i32, i32, i32
  }
  func.func @transform_1(%arg0: i32) -> (i32, i32, i32) {
    %c0_i32 = arith.constant 0 : i32
    %c0_i32_0 = arith.constant 0 : i32
    %c0_i32_1 = arith.constant 0 : i32
    %c0_i32_2 = arith.constant 0 : i32
    return %c0_i32, %c0_i32_0, %c0_i32_1 : i32, i32, i32
  }
  func.func @transform_2(%arg0: i32) -> (i32, i32) {
    %c0_i32 = arith.constant 0 : i32
    %c0_i32_0 = arith.constant 0 : i32
    %c0_i32_1 = arith.constant 0 : i32
    return %c0_i32, %c0_i32_0 : i32, i32
  }
  func.func @transform_3(%arg0: i32) -> (i32, i32, i32) {
    %c0_i32 = arith.constant 0 : i32
    %c0_i32_0 = arith.constant 0 : i32
    %c0_i32_1 = arith.constant 0 : i32
    %c0_i32_2 = arith.constant 0 : i32
    return %c0_i32, %c0_i32_0, %c0_i32_1 : i32, i32, i32
  }
  func.func @transform_4(%arg0: i32) -> (i32, i32) {
    %c0_i32 = arith.constant 0 : i32
    %c0_i32_0 = arith.constant 0 : i32
    %c0_i32_1 = arith.constant 0 : i32
    return %c0_i32, %c0_i32_0 : i32, i32
  }
  func.func @transform_5(%arg0: i32) -> (i32, i32, i32, i32) {
    %c0_i32 = arith.constant 0 : i32
    %c0_i32_0 = arith.constant 0 : i32
    %c0_i32_1 = arith.constant 0 : i32
    %c0_i32_2 = arith.constant 0 : i32
    return %arg0, %c0_i32, %c0_i32_0, %c0_i32_1 : i32, i32, i32, i32
  }
}

</mosaic_0001>

<bundles_post_ra>
// kernel: tpu_custom_call.1
= control target key start
LH: loop header
LB: loop body
LE: loop exit
PB: predicated region body
PF: predicated region fallthrough
CT: control target
= control target key end

     0   :  { %s8003_s18 = smov 0   ;;  %s10742_s0 = inlined_call_operand.vmem [shape: bf16[2,16,16,8], index: 0, kind: input, shape index: {}]   ;;  %s10743_s1 = inlined_call_operand.vmem [shape: bf16[3,24,8], index: 1, kind: input, shape index: {}]   ;;  %s10744_s2 = inlined_call_operand.vmem [shape: f32[1,8], index: 2, kind: input, shape index: {}]   ;;  %s10745_s3 = inlined_call_operand.vmem [shape: bf16[3,24,8], index: 3, kind: input, shape index: {}]   ;;  %s10746_s4 = inlined_call_operand.vmem [shape: f32[1,8], index: 4, kind: input, shape index: {}]   ;;  %s10747_s5 = inlined_call_operand.vmem [shape: f32[2,16,16,8], index: 5, kind: output, shape index: {}]  }
   0x1 LB: > { %s6758_s19 = sadd.s32 4294967295, %s7968_s18   ;;  %p6762_p0 = scmp.ge.s32.totalorder %s7968_s18, 1  ;;  %s7968_s18 = sphi %s8003_s18, %s15_s18  }
   0x2   : > { %p187_p1 = scmp.lt.s32.totalorder %s7968_s18, 3 }
   0x4   : > { %p188_p2 = pnand %p6762_p0, %p187_p1 }
   0x6   : > { %191 = sbr.rel (%p188_p2) target bundleno = 1091 (0x443), region = 40 }
   0xb   : > { %p215_p3 = scmp.lt.s32.totalorder %s6758_s19, 1  ;;  %vm229_vm0 = vcmask 57344   ;;  %vm236_vm1 = vsmask.f32 256  ;;  %v247_v1 = vld [vmem:[#allocation2 + $0x24] sm:$0x1] }
   0xc   : > { %vm8013_vm2 = vmand %vm229_vm0, %vm236_vm1  ;;  %vm292_vm3 = vsmask.f32 7938  ;;  %v303_v2 = vld [vmem:[#allocation2 + $0x2c] sm:$0x1]  ;;  %v297_v8 = vld [vmem:[#allocation2 + $0x14] sm:$0x1] }
   0xd   : > { %s10827_s19 = smov (!%p215_p3, %s6758_s19), 1  ;;  %v248_v3 = vsel %vm8013_vm2, 0, %v247_v1  ;;  %vm8023_vm4 = vmand %vm229_vm0, %vm292_vm3  ;;  %v241_v5 = vld [vmem:[#allocation2 + $0xc] sm:$0x1]  ;;  %v253_v10 = vld [vmem:[#allocation2 + $0x3c] sm:$0x1] }
   0xe   : > { %249 = vst [vmem:[#allocation2 + $0x24] sm:$0x1] %v248_v3  ;;  %v304_v6 = vsel %vm8023_vm4, 0, %v303_v2  ;;  %v242_v7 = vsel %vm8013_vm2, 0, %v241_v5  ;;  %s7211_s20 = sshll.u32 %s10827_s19, 7  ;;  %v298_v9 = vsel %vm8023_vm4, 0, %v297_v8 }
   0xf   : > { %305 = vst [vmem:[#allocation2 + $0x2c] sm:$0x1] %v304_v6  ;;  %243 = vst [vmem:[#allocation2 + $0xc] sm:$0x1] %v242_v7  ;;  %v309_v11 = vld [vmem:[#allocation2 + $0x44] sm:$0x1]  ;;  %s8037_s23 = scalar_lea.vmem %s10742_s0, %s7211_s20 }
  0x10   : > { %vm226_vm5 = vcmask 60416   ;;  %vm495_vm6 = vsmask.f32 4368  ;;  %299 = vst [vmem:[#allocation2 + $0x14] sm:$0x1] %v298_v9  ;;  %v254_v12 = vsel %vm8013_vm2, 0, %v253_v10 }
  0x11   : > { %v310_v13 = vsel %vm8023_vm4, 0, %v309_v11  ;;  %v467_v14 = vld [vmem:[%s8037_s23 + $0x10] sm:$0xf]  ;;  %v468_v15 = vld [vmem:[%s8037_s23 + $0x14] sm:$0xf]  ;;  %vm8050_vm7 = vmor %vm236_vm1, %vm495_vm6  ;;  %v10775_v27 = vmov 0 }
  0x12   : > { %v463_v16 = vld [vmem:[%s8037_s23] sm:$0xf]  ;;  %255 = vst [vmem:[#allocation2 + $0x3c] sm:$0x1] %v254_v12  ;;  %311 = vst [vmem:[#allocation2 + $0x44] sm:$0x1] %v310_v13 }
  0x13   : > { %v532_v17 = vshrl.u32 %v467_v14, 16  ;;  %v535_v18 = vshll.u32 %v467_v14, 16  ;;  %v540_v19 = vshrl.u32 %v468_v15, 16  ;;  %v543_v20 = vshll.u32 %v468_v15, 16  ;;  %v464_v21 = vld [vmem:[%s8037_s23 + $0x4] sm:$0xf]  ;;  %vm8057_vm8 = vmand %vm226_vm5, %vm292_vm3 }
  0x14   : > { %v498_v22 = vshrl.u32 %v463_v16, 16  ;;  %v501_v23 = vshll.u32 %v463_v16, 16  ;;  %v506_v24 = vshrl.u32 %v464_v21, 16  ;;  %v509_v25 = vshll.u32 %v464_v21, 16  ;;  %v471_v26 = vld [vmem:[%s8037_s23 + $0x20] sm:$0xf] }
  0x15   : > { %v10776_v27 = vsel %vm8050_vm7, 4294967295, %v10775_v27  ;;  %v534_v28 = vrot.slane %v532_v17, 7  ;;  %v542_v29 = vrot.slane %v540_v19, 7  ;;  %v472_v30 = vld [vmem:[%s8037_s23 + $0x24] sm:$0xf]  ;;  %v566_v31 = vshrl.u32 %v471_v26, 16 }
  0x16   : > { %10777 = vst [vmem:[#allocation4_spill] sm:$0xff] %v10776_v27  ;;  %v569_v32 = vshll.u32 %v471_v26, 16  ;;  %v10778_v33 = vmov 0  ;;  %v834_v34 = vld [vmem:[#allocation2 + $0x24] sm:$0xf]  ;;  %v500_v35 = vrot.slane %v498_v22, 7 }
  0x17   : > { %v10779_v33 = vsel %vm8057_vm8, 4294967295, %v10778_v33  ;;  %v508_v36 = vrot.slane %v506_v24, 7  ;;  %v574_v37 = vshrl.u32 %v472_v30, 16  ;;  %v577_v38 = vshll.u32 %v472_v30, 16  ;;  %v244_v39 = vld [vmem:[#allocation2 + $0x18] sm:$0x1] }
  0x18   : > { %10780 = vst [vmem:[#allocation5_spill] sm:$0xff] %v10779_v33  ;;  %v300_v40 = vld [vmem:[#allocation2 + $0x20] sm:$0x1]  ;;  %v537_v41 = vor.u32 %v535_v18, %v534_v28  ;;  %v538_v42 = vrot.slane %v534_v28, 4  ;;  %v545_v43 = vor.u32 %v543_v20, %v542_v29  ;;  %v547_v44 = vrot.slane %v542_v29, 4  ;;  %s7970_s24 = smov 16  }
  0x19   : > { %v838_v45 = vld [vmem:[#allocation2 + $0x2c] sm:$0x1]  ;;  %v503_v47 = vor.u32 %v501_v23, %v500_v35  ;;  %v504_v48 = vrot.slane %v500_v35, 4  ;;  %v511_v49 = vor.u32 %v509_v25, %v508_v36  ;;  %v513_v50 = vrot.slane %v508_v36, 4  ;;  %v824_v51 = vld [vmem:[#allocation2 + $0x14] sm:$0x1] }
  0x1a   : > { %v820_v46 = vld [vmem:[#allocation2 + $0xc] sm:$0xf]  ;;  %v465_v52 = vld [vmem:[%s8037_s23 + $0x8] sm:$0xf]  ;;  %v546_v53 = vsel %vm8050_vm7, %v538_v42, %v545_v43  ;;  %v835_v54 = vsel %vm8057_vm8, %v537_v41, %v834_v34  ;;  %v839_v55 = vsel %vm8013_vm2, %v547_v44, %v838_v45  ;;  %v568_v56 = vrot.slane %v566_v31, 7  ;;  %s7971_s25 = smov 8  }
  0x1b   : > { %v848_v57 = vld [vmem:[#allocation2 + $0x3c] sm:$0xf]  ;;  %v852_v58 = vld [vmem:[#allocation2 + $0x44] sm:$0x1]  ;;  %836 = vst [vmem:[#allocation2 + $0x24] sm:$0xf] %v835_v54  ;;  %v512_v59 = vsel %vm8050_vm7, %v504_v48, %v511_v49  ;;  %v821_v60 = vsel %vm8057_vm8, %v503_v47, %v820_v46  ;;  %v825_v61 = vsel %vm8013_vm2, %v513_v50, %v824_v51 }
  0x1c   : > { %837 = vst.msk [vmem:[#allocation2 + $0x28] sm:$0xf] %vm226_vm5, %v546_v53  ;;  %840 = vst [vmem:[#allocation2 + $0x2c] sm:$0x1] %v839_v55  ;;  %v576_v62 = vrot.slane %v574_v37, 7  ;;  %v571_v2 = vor.u32 %v569_v32, %v568_v56  ;;  %v572_v3 = vrot.slane %v568_v56, 4 }
  0x1d   : > { %v466_v63 = vld [vmem:[%s8037_s23 + $0xc] sm:$0xf]  ;;  %v259_v1 = vld [vmem:[#allocation2 + $0x54] sm:$0x1]  ;;  %822 = vst [vmem:[#allocation2 + $0xc] sm:$0xf] %v821_v60 }
  0x1e   : > { %823 = vst.msk [vmem:[#allocation2 + $0x10] sm:$0xf] %vm226_vm5, %v512_v59  ;;  %826 = vst [vmem:[#allocation2 + $0x14] sm:$0x1] %v825_v61  ;;  %v245_v5 = vsel %vm8013_vm2, 0, %v244_v39  ;;  %v301_v6 = vsel %vm8023_vm4, 0, %v300_v40  ;;  %v579_v8 = vor.u32 %v577_v38, %v576_v62  ;;  %v849_v11 = vsel %vm8057_vm8, %v571_v2, %v848_v57 }
  0x1f   : > { %v315_v7 = vld [vmem:[#allocation2 + $0x5c] sm:$0x1]  ;;  %v581_v9 = vrot.slane %v576_v62, 4  ;;  %246 = vst [vmem:[#allocation2 + $0x18] sm:$0x1] %v245_v5  ;;  %v515_v10 = vshrl.u32 %v465_v52, 16 }
  0x20   : > { %302 = vst [vmem:[#allocation2 + $0x20] sm:$0x1] %v301_v6  ;;  %v523_v12 = vshrl.u32 %v466_v63, 16  ;;  %v526_v13 = vshll.u32 %v466_v63, 16  ;;  %v260_v14 = vsel %vm8013_vm2, 0, %v259_v1  ;;  %v580_v16 = vsel %vm8050_vm7, %v572_v3, %v579_v8  ;;  %s7212_s13 = sshll.u32 %s10827_s19, 8 }
  0x21   : > { %v475_v15 = vld [vmem:[%s8037_s23 + $0x30] sm:$0xf]  ;;  %850 = vst [vmem:[#allocation2 + $0x3c] sm:$0xf] %v849_v11  ;;  %v853_v17 = vsel %vm8013_vm2, %v581_v9, %v852_v58  ;;  %v517_v18 = vrot.slane %v515_v10, 7  ;;  %v316_v19 = vsel %vm8023_vm4, 0, %v315_v7  ;;  %s10577_s16 = scalar_lea.vmem %s10747_s5, %s7212_s13 }
  0x22   : > { %261 = vst [vmem:[#allocation2 + $0x54] sm:$0x1] %v260_v14  ;;  %v250_v20 = vld [vmem:[#allocation2 + $0x30] sm:$0x1]  ;;  %851 = vst.msk [vmem:[#allocation2 + $0x40] sm:$0xf] %vm226_vm5, %v580_v16 }
  0x23   : > { %854 = vst [vmem:[#allocation2 + $0x44] sm:$0x1] %v853_v17  ;;  %v518_v21 = vshll.u32 %v465_v52, 16  ;;  %v525_v22 = vrot.slane %v523_v12, 7  ;;  %317 = vst [vmem:[#allocation2 + $0x5c] sm:$0x1] %v316_v19 }
  0x24   : > { %v476_v23 = vld [vmem:[%s8037_s23 + $0x34] sm:$0xf]  ;;  %vm1397_vm9 = vcmask 1046528   ;;  %v521_v24 = vrot.slane %v517_v18, 4  ;;  %v600_v25 = vshrl.u32 %v475_v15, 16  ;;  %v251_v26 = vsel %vm8013_vm2, 0, %v250_v20 }
  0x25   : > { %v8096_v28 = vld [vmem:[#allocation2 + $0x28] sm:$0xf]  ;;  %v1597_v29 = vld [vmem:[#allocation2 + $0x24] sm:$0xe]  ;;  %v528_v30 = vor.u32 %v526_v13, %v525_v22  ;;  %252 = vst [vmem:[#allocation2 + $0x30] sm:$0x1] %v251_v26  ;;  %v520_v38 = vor.u32 %v518_v21, %v517_v18 }
  0x26   : > { %v8098_v31 = vld [vmem:[#allocation2 + $0x2c] ss:$0 sps:$4 sm:$0x11]   ;;  %v6849_v32 = vcombine.low %v1597_v29, %v8096_v28  ;;  %v603_v34 = vshll.u32 %v475_v15, 16  ;;  %v608_v35 = vshrl.u32 %v476_v23, 16  ;;  %v602_v45 = vrot.slane %v600_v25, 7 }
  0x27   : > { %v1548_v36 = vld [vmem:[#allocation2 + $0x10] sm:$0xf]  ;;  %v1595_v37 = vld [vmem:[#allocation2 + $0xc] sm:$0xe]  ;;  %v529_v39 = vsel %vm8050_vm7, %v521_v24, %v528_v30  ;;  %v306_v40 = vld [vmem:[#allocation2 + $0x38] sm:$0x1] }
  0x28   : > { %v2017_v41 = vrot.slane %v6849_v32, 1  ;;  %v2018_v42 = vrot.slane %v8098_v31, 1  ;;  %v8104_v43 = vld [vmem:[#allocation2 + $0x14] ss:$0 sps:$4 sm:$0x11]   ;;  %v6847_v44 = vcombine.low %v1595_v37, %v1548_v36  ;;  %v530_v47 = vrot.slane %v525_v22, 4 }
  0x29   : > { %830 = vst.msk [vmem:[#allocation2 + $0x1c] sm:$0xf] %vm226_vm5, %v529_v39  ;;  %v1599_v46 = vld [vmem:[#allocation2 + $0x3c] sm:$0xe]  ;;  %v611_v48 = vshll.u32 %v476_v23, 16  ;;  %v2012_v52 = vrot.slane %v8104_v43, 1  ;;  %v605_v58 = vor.u32 %v603_v34, %v602_v45 }
  0x2a   : > { %v469_v49 = vld [vmem:[%s8037_s23 + $0x18] sm:$0xf]  ;;  %v2019_v50 = vsel %vm1397_vm9, %v2017_v41, %v2018_v42  ;;  %v2011_v51 = vrot.slane %v6847_v44, 1  ;;  %v8110_v53 = vld [vmem:[#allocation2 + $0x40] sm:$0xf]  ;;  %v606_v59 = vrot.slane %v602_v45, 4 }
  0x2b   : > { %v470_v54 = vld [vmem:[%s8037_s23 + $0x1c] sm:$0xf]  ;;  %2063 = vrot.lane.b32.xlu0 %v2019_v50, %s7970_s24  ;;  %v8114_v55 = vld [vmem:[#allocation2 + $0x44] ss:$0 sps:$4 sm:$0x11]   ;;  %v6851_v56 = vcombine.low %v1599_v46, %v8110_v53  ;;  %v610_v63 = vrot.slane %v608_v35, 7 }
  0x2c   : > { %v827_v57 = vld [vmem:[#allocation2 + $0x18] sm:$0xf]  ;;  %v2013_v60 = vsel %vm1397_vm9, %v2011_v51, %v2012_v52  ;;  %v831_v62 = vld [vmem:[#allocation2 + $0x20] sm:$0x1]  ;;  %v862_v1 = vld [vmem:[#allocation2 + $0x54] sm:$0xf] }
  0x2d   : > { %v828_v61 = vsel %vm8057_vm8, %v520_v38, %v827_v57  ;;  %v307_v2 = vsel %vm8023_vm4, 0, %v306_v40  ;;  %2059 = vrot.lane.b32.xlu1 %v2013_v60, %s7970_s24  ;;  %v1547_v3 = vld [vmem:[#allocation2 + $0xc] sm:$0xf]  ;;  %v2023_v5 = vrot.slane %v6851_v56, 1  ;;  %v2024_v6 = vrot.slane %v8114_v55, 1 }
  0x2e   : > { %829 = vst [vmem:[#allocation2 + $0x18] sm:$0xf] %v828_v61  ;;  %v832_v7 = vsel %vm8013_vm2, %v530_v47, %v831_v62  ;;  %v863_v8 = vsel %vm8057_vm8, %v605_v58, %v862_v1  ;;  %v866_v9 = vld [vmem:[#allocation2 + $0x5c] sm:$0x1]  ;;  %308 = vst [vmem:[#allocation2 + $0x38] sm:$0x1] %v307_v2  ;;  %v613_v10 = vor.u32 %v611_v48, %v610_v63 }
  0x2f   : > { %833 = vst [vmem:[#allocation2 + $0x20] sm:$0x1] %v832_v7  ;;  %v615_v11 = vrot.slane %v610_v63, 4  ;;  %864 = vst [vmem:[#allocation2 + $0x54] sm:$0xf] %v863_v8  ;;  %v549_v12 = vshrl.u32 %v469_v49, 16  ;;  %v2025_v15 = vsel %vm1397_vm9, %v2023_v5, %v2024_v6  ;;  %v8137_v25 = vcombine.low %v1547_v3, %v1548_v36 }
  0x30   : > { %v552_v13 = vshll.u32 %v469_v49, 16  ;;  %v256_v14 = vld [vmem:[#allocation2 + $0x48] sm:$0x1]  ;;  %v557_v16 = vshrl.u32 %v470_v54, 16  ;;  %v560_v17 = vshll.u32 %v470_v54, 16  ;;  %2067 = vrot.lane.b32.xlu0 %v2025_v15, %s7970_s24  ;;  %v614_v20 = vsel %vm8050_vm7, %v606_v59, %v613_v10 }
  0x31   : > { %v841_v18 = vld [vmem:[#allocation2 + $0x30] sm:$0xf]  ;;  %v257_v19 = vsel %vm8013_vm2, 0, %v256_v14  ;;  %v867_v21 = vsel %vm8013_vm2, %v615_v11, %v866_v9  ;;  %v551_v22 = vrot.slane %v549_v12, 7  ;;  %v473_v24 = vld [vmem:[%s8037_s23 + $0x28] sm:$0xf] }
  0x32   : > { %258 = vst [vmem:[#allocation2 + $0x48] sm:$0x1] %v257_v19  ;;  %v312_v23 = vld [vmem:[#allocation2 + $0x50] sm:$0x1]  ;;  %865 = vst.msk [vmem:[#allocation2 + $0x58] sm:$0xf] %vm226_vm5, %v614_v20 }
  0x33   : > { %868 = vst [vmem:[#allocation2 + $0x5c] sm:$0x1] %v867_v21  ;;  %v559_v26 = vrot.slane %v557_v16, 7  ;;  %v313_v29 = vsel %vm8023_vm4, 0, %v312_v23  ;;  %v474_v30 = vld [vmem:[%s8037_s23 + $0x2c] sm:$0xf]  ;;  %v554_v35 = vor.u32 %v552_v13, %v551_v22 }
  0x34   : > { %v583_v32 = vshrl.u32 %v473_v24, 16  ;;  %v1550_v34 = vld [vmem:[#allocation2 + $0x1c] sm:$0xf]  ;;  %v555_v37 = vrot.slane %v551_v22, 4  ;;  %314 = vst [vmem:[#allocation2 + $0x50] sm:$0x1] %v313_v29 }
  0x35   : > { %v586_v38 = vshll.u32 %v473_v24, 16  ;;  %v591_v39 = vshrl.u32 %v474_v30, 16  ;;  %v562_v40 = vor.u32 %v560_v17, %v559_v26  ;;  %v564_v41 = vrot.slane %v559_v26, 4  ;;  %v262_v44 = vld [vmem:[#allocation2 + $0x60] sm:$0x1] }
  0x36   : > { %v585_v42 = vrot.slane %v583_v32, 7  ;;  %v594_v36 = vshll.u32 %v474_v30, 16  ;;  %v1596_v45 = vld [vmem:[#allocation2 + $0x18] sm:$0xe]  ;;  %v842_v46 = vsel %vm8057_vm8, %v554_v35, %v841_v18  ;;  %v845_v47 = vld [vmem:[#allocation2 + $0x38] sm:$0x1] }
  0x37   : > { %vm1124_vm10 = vsmask.f32 7424  ;;  %v8145_v48 = vld [vmem:[#allocation2 + $0x20] ss:$0 sps:$4 sm:$0x11]   ;;  %v6848_v49 = vcombine.low %v1596_v45, %v1550_v34  ;;  %v563_v50 = vsel %vm8050_vm7, %v555_v37, %v562_v40  ;;  %v846_v51 = vsel %vm8013_vm2, %v564_v41, %v845_v47 }
  0x38   : > { %843 = vst [vmem:[#allocation2 + $0x30] sm:$0xf] %v842_v46  ;;  %v1740_v52 = vshrl.u32 %v8137_v25, 16  ;;  %v318_v54 = vld [vmem:[#allocation2 + $0x68] sm:$0x1]  ;;  %v588_v58 = vor.u32 %v586_v38, %v585_v42  ;;  %v589_v59 = vrot.slane %v585_v42, 4 }
  0x39   : > { %v1549_v56 = vld [vmem:[#allocation2 + $0x18] sm:$0xf]  ;;  %v1601_v57 = vld [vmem:[#allocation2 + $0x54] sm:$0xe]  ;;  %844 = vst.msk [vmem:[#allocation2 + $0x34] sm:$0xf] %vm226_vm5, %v563_v50 }
  0x3a   : > { %847 = vst [vmem:[#allocation2 + $0x38] sm:$0x1] %v846_v51  ;;  %v593_v60 = vrot.slane %v591_v39, 7  ;;  %v1551_v61 = vld [vmem:[#allocation2 + $0x24] sm:$0xf]  ;;  %v2014_v62 = vrot.slane %v6848_v49, 1  ;;  %v8160_v10 = vcombine.low %v1549_v56, %v1550_v34 }
  0x3b   : > { %v2015_v63 = vrot.slane %v8145_v48, 1  ;;  %v855_v1 = vld [vmem:[#allocation2 + $0x48] sm:$0xf]  ;;  %v1742_v2 = vshll.u32 %v8137_v25, 16  ;;  %v1747_v3 = vshll.u32 %v8104_v43, 16  ;;  %v263_v9 = vsel %vm8013_vm2, 0, %v262_v44 }
  0x3c   : > { %v1560_v5 = vld [vmem:[#allocation2 + $0x58] sm:$0xf]  ;;  %v596_v6 = vor.u32 %v594_v36, %v593_v60  ;;  %v598_v7 = vrot.slane %v593_v60, 4  ;;  %v856_v8 = vsel %vm8057_vm8, %v588_v58, %v855_v1  ;;  %v8163_v12 = vld [vmem:[#allocation2 + $0x5c] ss:$0 sps:$4 sm:$0x11]   ;;  %v8177_v29 = vcombine.low %v1551_v61, %v8096_v28 }
  0x3d   : > { %v2016_v11 = vsel %vm1397_vm9, %v2014_v62, %v2015_v63  ;;  %v6853_v13 = vcombine.low %v1601_v57, %v1560_v5  ;;  %857 = vst [vmem:[#allocation2 + $0x48] sm:$0xf] %v856_v8  ;;  %v859_v43 = vld [vmem:[#allocation2 + $0x50] sm:$0x1]  ;;  %v1744_v14 = vrot.slane %v1742_v2, 1  ;;  %v1749_v17 = vrot.slane %v1747_v3, 1 }
  0x3e   : > { %264 = vst [vmem:[#allocation2 + $0x60] sm:$0x1] %v263_v9  ;;  %2061 = vrot.lane.b32.xlu1 %v2016_v11, %s7970_s24  ;;  %v597_v15 = vsel %vm8050_vm7, %v589_v59, %v596_v6  ;;  %v860_v16 = vsel %vm8013_vm2, %v598_v7, %v859_v43  ;;  %v319_v18 = vsel %vm8023_vm4, 0, %v318_v54  ;;  %v477_v19 = vld [vmem:[%s8037_s23 + $0x38] sm:$0xf]  ;;  %v2030_v23 = vrot.slane %v8163_v12, 1 }
  0x3f   : > { %v478_v20 = vld [vmem:[%s8037_s23 + $0x3c] sm:$0xf]  ;;  %v2029_v22 = vrot.slane %v6853_v13, 1  ;;  %858 = vst.msk [vmem:[#allocation2 + $0x4c] sm:$0xf] %vm226_vm5, %v597_v15  ;;  %v1745_v24 = vor.u32 %v1744_v14, %v1740_v52  ;;  %v617_v26 = vshrl.u32 %v477_v19, 16 }
  0x40   : > { %v1555_v21 = vld [vmem:[#allocation2 + $0x3c] sm:$0xf]  ;;  %861 = vst [vmem:[#allocation2 + $0x50] sm:$0x1] %v860_v16  ;;  %320 = vst [vmem:[#allocation2 + $0x68] sm:$0x1] %v319_v18 }
  0x41   : > { %v1553_v30 = vld [vmem:[#allocation2 + $0x30] sm:$0xf]  ;;  %v620_v34 = vshll.u32 %v477_v19, 16  ;;  %v625_v35 = vshrl.u32 %v478_v20, 16  ;;  %v2031_v37 = vsel %vm1397_vm9, %v2029_v22, %v2030_v23  ;;  %v1554_v38 = vld [vmem:[#allocation2 + $0x34] sm:$0xf]  ;;  %v1750_v39 = vsel %vm1124_vm10, %v1745_v24, %v1749_v17 }
  0x42   : > { %v1598_v32 = vld [vmem:[#allocation2 + $0x30] sm:$0xe]  ;;  %v619_v40 = vrot.slane %v617_v26, 7  ;;  %v628_v41 = vshll.u32 %v478_v20, 16  ;;  %2071 = vrot.lane.b32.xlu0 %v2031_v37, %s7970_s24  ;;  %v8182_v42 = vcombine.low %v1553_v30, %v1554_v38  ;;  %v1752_v28 = vshrl.u32 %v8160_v10, 16 }
  0x43   : > { %v7681_v36 = vld [vmem:[#allocation2 + $0x38] ss:$0 sps:$4 sm:$0x11]   ;;  %v6850_v44 = vcombine.low %v1598_v32, %v1554_v38  ;;  %v627_v45 = vrot.slane %v625_v35, 7  ;;  %v1559_v46 = vld [vmem:[#allocation2 + $0x54] sm:$0xf]  ;;  %v8188_v52 = vcombine.low %v1555_v21, %v8110_v53 }
  0x44   : > { %v622_v47 = vor.u32 %v620_v34, %v619_v40  ;;  %v623_v49 = vrot.slane %v619_v40, 4  ;;  %v1754_v50 = vshll.u32 %v8160_v10, 16  ;;  %v1759_v51 = vshll.u32 %v8145_v48, 16  ;;  %v1557_v57 = vld [vmem:[#allocation2 + $0x48] sm:$0xf] }
  0x45   : > { %v2020_v54 = vrot.slane %v6850_v44, 1  ;;  %v2021_v56 = vrot.slane %v7681_v36, 1  ;;  %v1600_v58 = vld [vmem:[#allocation2 + $0x48] sm:$0xe]  ;;  %v630_v59 = vor.u32 %v628_v41, %v627_v45  ;;  %v632_v60 = vrot.slane %v627_v45, 4 }
  0x46   : > { %v869_v61 = vld [vmem:[#allocation2 + $0x60] sm:$0xf]  ;;  %v1756_v62 = vrot.slane %v1754_v50, 1  ;;  %v1761_v63 = vrot.slane %v1759_v51, 1  ;;  %v1776_v1 = vshrl.u32 %v8182_v42, 16  ;;  %v8191_v2 = vcombine.low %v1559_v46, %v1560_v5  ;;  %1931 = vrot.lane.b32.xlu0 %v1750_v39, %s7971_s25 }
  0x47   : > { %v2022_v3 = vsel %vm1397_vm9, %v2020_v54, %v2021_v56  ;;  %v1558_v6 = vld [vmem:[#allocation2 + $0x4c] sm:$0xf]  ;;  %v631_v53 = vsel %vm8050_vm7, %v623_v49, %v630_v59  ;;  %v870_v48 = vsel %vm8057_vm8, %v622_v47, %v869_v61  ;;  %v873_v7 = vld [vmem:[#allocation2 + $0x68] sm:$0x1]  ;;  %v1778_v43 = vshll.u32 %v8182_v42, 16 }
  0x48   : > { %2065 = vrot.lane.b32.xlu1 %v2022_v3, %s7970_s24  ;;  %v8200_v8 = vcombine.low %v1557_v57, %v1558_v6  ;;  %v7684_v9 = vld [vmem:[#allocation2 + $0x50] ss:$0 sps:$4 sm:$0x11]   ;;  %v6852_v5 = vcombine.low %v1600_v58, %v1558_v6  ;;  %871 = vst [vmem:[#allocation2 + $0x60] sm:$0xf] %v870_v48  ;;  %v874_v11 = vsel %vm8013_vm2, %v632_v60, %v873_v7  ;;  %v1783_v14 = vshll.u32 %v7681_v36, 16 }
  0x49   : > { %872 = vst.msk [vmem:[#allocation2 + $0x64] sm:$0xf] %vm226_vm5, %v631_v53  ;;  %v1757_v13 = vor.u32 %v1756_v62, %v1752_v28  ;;  %875 = vst [vmem:[#allocation2 + $0x68] sm:$0x1] %v874_v11  ;;  %v1764_v15 = vshrl.u32 %v8177_v29, 16  ;;  %v1766_v16 = vshll.u32 %v8177_v29, 16 }
  0x4a   : > { %v2026_v17 = vrot.slane %v6852_v5, 1  ;;  %v2027_v18 = vrot.slane %v7684_v9, 1  ;;  %v1771_v20 = vshll.u32 %v8098_v31, 16  ;;  %v1780_v21 = vrot.slane %v1778_v43, 1  ;;  %v265_v44 = vld [vmem:[#allocation2 + $0x6c] sm:$0x1] }
  0x4b   : > { %v1762_v19 = vsel %vm1124_vm10, %v1757_v13, %v1761_v63  ;;  %v1785_v22 = vrot.slane %v1783_v14, 1  ;;  %v1768_v23 = vrot.slane %v1766_v16, 1  ;;  %v1800_v24 = vshrl.u32 %v8200_v8, 16  ;;  %v321_v61 = vld [vmem:[#allocation2 + $0x74] sm:$0x1] }
  0x4c   : > { %1933 = vrot.lane.b32.xlu0 %v1762_v19, %s7971_s25  ;;  %v2028_v26 = vsel %vm1397_vm9, %v2026_v17, %v2027_v18  ;;  %v1773_v30 = vrot.slane %v1771_v20, 1  ;;  %v1802_v32 = vshll.u32 %v8200_v8, 16  ;;  %v1807_v34 = vshll.u32 %v7684_v9, 16  ;;  %v479_v6 = vld [vmem:[%s8037_s23 + $0x40] sm:$0xf] }
  0x4d   : > { %2069 = vrot.lane.b32.xlu1 %v2028_v26, %s7970_s24  ;;  %v1781_v35 = vor.u32 %v1780_v21, %v1776_v1  ;;  %v1769_v37 = vor.u32 %v1768_v23, %v1764_v15  ;;  %v1788_v38 = vshrl.u32 %v8188_v52, 16  ;;  %v1790_v31 = vshll.u32 %v8188_v52, 16  ;;  %v480_v53 = vld [vmem:[%s8037_s23 + $0x44] sm:$0xf]  ;;  %v268_v5 = vld [vmem:[#allocation2 + $0x78] sm:$0x1] }
  0x4e   : > { %v1804_v39 = vrot.slane %v1802_v32, 1  ;;  %v1809_v40 = vrot.slane %v1807_v34, 1  ;;  %v1795_v41 = vshll.u32 %v8114_v55, 16  ;;  %v1812_v36 = vshrl.u32 %v8191_v2, 16  ;;  %v324_v15 = vld [vmem:[#allocation2 + $0x80] sm:$0x1] }
  0x4f   : > { %v1561_v45 = vld [vmem:[#allocation2 + $0x60] sm:$0xf]  ;;  %v1786_v47 = vsel %vm1124_vm10, %v1781_v35, %v1785_v22  ;;  %v1774_v49 = vsel %vm1124_vm10, %v1769_v37, %v1773_v30  ;;  %v1792_v55 = vrot.slane %v1790_v31, 1  ;;  %v1814_v58 = vshll.u32 %v8191_v2, 16  ;;  %v481_v16 = vld [vmem:[%s8037_s23 + $0x48] sm:$0xf] }
  0x50   : > { %v1562_v28 = vld [vmem:[#allocation2 + $0x64] sm:$0xf]  ;;  %v1602_v46 = vld [vmem:[#allocation2 + $0x60] sm:$0xe]  ;;  %1935 = vrot.lane.b32.xlu0 %v1774_v49, %s7971_s25  ;;  %v1805_v56 = vor.u32 %v1804_v39, %v1800_v24  ;;  %v1797_v57 = vrot.slane %v1795_v41, 1  ;;  %v1819_v59 = vshll.u32 %v8163_v12, 16 }
  0x51   : > { %v8221_v50 = vcombine.low %v1561_v45, %v1562_v28  ;;  %v7687_v51 = vld [vmem:[#allocation2 + $0x68] ss:$0 sps:$4 sm:$0x11]   ;;  %v6854_v54 = vcombine.low %v1602_v46, %v1562_v28  ;;  %v266_v60 = vsel %vm8013_vm2, 0, %v265_v44  ;;  %v1793_v3 = vor.u32 %v1792_v55, %v1788_v38  ;;  %v482_v21 = vld [vmem:[%s8037_s23 + $0x4c] sm:$0xf] }
  0x52   : > { %v2033_v63 = vrot.slane %v7687_v51, 1  ;;  %v8229_v1 = vsel %vm1124_vm10, %v1805_v56, %v1809_v40  ;;  %267 = vst [vmem:[#allocation2 + $0x6c] sm:$0x1] %v266_v60  ;;  %v1831_v9 = vshll.u32 %v7687_v51, 16  ;;  %v1816_v12 = vrot.slane %v1814_v58, 1 }
  0x53   : > { %v2032_v62 = vrot.slane %v6854_v54, 1  ;;  %v1824_v48 = vshrl.u32 %v8221_v50, 16  ;;  %v1826_v7 = vshll.u32 %v8221_v50, 16  ;;  %v1798_v13 = vsel %vm1124_vm10, %v1793_v3, %v1797_v57  ;;  %v271_v37 = vld [vmem:[#allocation2 + $0x84] sm:$0x1] }
  0x54   : > { %v1821_v43 = vrot.slane %v1819_v59, 1  ;;  %v322_v14 = vsel %vm8023_vm4, 0, %v321_v61  ;;  %1939 = vrot.lane.b32.xlu0 %v1798_v13, %s7971_s25  ;;  %v1833_v18 = vrot.slane %v1831_v9, 1  ;;  %v1817_v19 = vor.u32 %v1816_v12, %v1812_v36  ;;  %v327_v38 = vld [vmem:[#allocation2 + $0x8c] sm:$0x1] }
  0x55   : > { %v2034_v11 = vsel %vm1397_vm9, %v2032_v62, %v2033_v63  ;;  %v1828_v17 = vrot.slane %v1826_v7, 1  ;;  %323 = vst [vmem:[#allocation2 + $0x74] sm:$0x1] %v322_v14  ;;  %v634_v20 = vshrl.u32 %v479_v6, 16  ;;  %v637_v22 = vshll.u32 %v479_v6, 16 }
  0x56   : > { %2073 = vrot.lane.b32.xlu1 %v2034_v11, %s7970_s24  ;;  %v642_v23 = vshrl.u32 %v480_v53, 16  ;;  %v645_v24 = vshll.u32 %v480_v53, 16  ;;  %v269_v26 = vsel %vm8013_vm2, 0, %v268_v5  ;;  %v1822_v32 = vsel %vm1124_vm10, %v1817_v19, %v1821_v43  ;;  %v483_v36 = vld [vmem:[%s8037_s23 + $0x50] sm:$0xf] }
  0x57   : > { %v1829_v30 = vor.u32 %v1828_v17, %v1824_v48  ;;  %v636_v34 = vrot.slane %v634_v20, 7  ;;  %270 = vst [vmem:[#allocation2 + $0x78] sm:$0x1] %v269_v26  ;;  %v325_v35 = vsel %vm8023_vm4, 0, %v324_v15  ;;  %v651_v39 = vshrl.u32 %v481_v16, 16 }
  0x58   : > { %v644_v31 = vrot.slane %v642_v23, 7  ;;  %326 = vst [vmem:[#allocation2 + $0x80] sm:$0x1] %v325_v35  ;;  %v654_v40 = vshll.u32 %v481_v16, 16  ;;  %v659_v41 = vshrl.u32 %v482_v21, 16  ;;  %1943 = vrot.lane.b32.xlu0 %v1822_v32, %s7971_s25  ;;  %v662_v49 = vshll.u32 %v482_v21, 16 }
  0x59   : > { %v1834_v44 = vsel %vm1124_vm10, %v1829_v30, %v1833_v18  ;;  %v639_v45 = vor.u32 %v637_v22, %v636_v34  ;;  %v640_v28 = vrot.slane %v636_v34, 4  ;;  %v876_v46 = vld [vmem:[#allocation2 + $0x6c] sm:$0xf]  ;;  %v484_v51 = vld [vmem:[%s8037_s23 + $0x54] sm:$0xf]  ;;  %v653_v57 = vrot.slane %v651_v39, 7 }
  0x5a   : > { %1937 = vrot.lane.b32.xlu1 %v1786_v47, %s7971_s25  ;;  %v274_v54 = vld [vmem:[#allocation2 + $0x90] sm:$0x1]  ;;  %v647_v56 = vor.u32 %v645_v24, %v644_v31  ;;  %v649_v55 = vrot.slane %v644_v31, 4  ;;  %v661_v58 = vrot.slane %v659_v41, 7  ;;  %v330_v59 = vld [vmem:[#allocation2 + $0x98] sm:$0x1] }
  0x5b   : > { %v877_v47 = vsel %vm8057_vm8, %v639_v45, %v876_v46  ;;  %v272_v60 = vsel %vm8013_vm2, 0, %v271_v37  ;;  %v328_v61 = vsel %vm8023_vm4, 0, %v327_v38  ;;  %v668_v62 = vshrl.u32 %v483_v36, 16  ;;  %v485_v63 = vld [vmem:[%s8037_s23 + $0x58] sm:$0xf] }
  0x5c   : > { %v648_v3 = vsel %vm8050_vm7, %v640_v28, %v647_v56  ;;  %878 = vst [vmem:[#allocation2 + $0x6c] sm:$0xf] %v877_v47  ;;  %v880_v6 = vld [vmem:[#allocation2 + $0x74] sm:$0x1]  ;;  %v656_v53 = vor.u32 %v654_v40, %v653_v57  ;;  %v657_v48 = vrot.slane %v653_v57, 4  ;;  %v664_v7 = vor.u32 %v662_v49, %v661_v58 }
  0x5d   : > { %273 = vst [vmem:[#allocation2 + $0x84] sm:$0x1] %v272_v60  ;;  %329 = vst [vmem:[#allocation2 + $0x8c] sm:$0x1] %v328_v61  ;;  %v8263_v9 = vld [vmem:[%s8037_s23 + $0x5c] sm:$0xf]  ;;  %v881_v5 = vsel %vm8013_vm2, %v649_v55, %v880_v6 }
  0x5e   : > { %v277_v12 = vld [vmem:[#allocation2 + $0x9c] sm:$0x1]  ;;  %1941 = vrot.lane.b32.xlu1 %v8229_v1, %s7971_s25  ;;  %879 = vst.msk [vmem:[#allocation2 + $0x70] sm:$0xf] %vm226_vm5, %v648_v3  ;;  %v666_v11 = vrot.slane %v661_v58, 4  ;;  %v670_v13 = vrot.slane %v668_v62, 7  ;;  %v665_v15 = vsel %vm8050_vm7, %v657_v48, %v664_v7 }
  0x5f   : > { %v671_v43 = vshll.u32 %v483_v36, 16  ;;  %v333_v14 = vld [vmem:[#allocation2 + $0xa4] sm:$0x1]  ;;  %882 = vst [vmem:[#allocation2 + $0x74] sm:$0x1] %v881_v5  ;;  %v676_v17 = vshrl.u32 %v484_v51, 16 }
  0x60   : > { %v883_v16 = vld [vmem:[#allocation2 + $0x78] sm:$0xf]  ;;  %v679_v18 = vshll.u32 %v484_v51, 16  ;;  %v275_v1 = vsel %vm8013_vm2, 0, %v274_v54  ;;  %886 = vst.msk [vmem:[#allocation2 + $0x7c] sm:$0xf] %vm226_vm5, %v665_v15 }
  0x61   : > { %v884_v19 = vsel %vm8057_vm8, %v656_v53, %v883_v16  ;;  %v887_v20 = vld [vmem:[#allocation2 + $0x80] sm:$0x1]  ;;  %v673_v21 = vor.u32 %v671_v43, %v670_v13  ;;  %v674_v22 = vrot.slane %v670_v13, 4  ;;  %276 = vst [vmem:[#allocation2 + $0x90] sm:$0x1] %v275_v1  ;;  %v331_v23 = vsel %vm8023_vm4, 0, %v330_v59 }
  0x62   : > { %v487_v24 = vld [vmem:[%s8037_s23 + $0x60] sm:$0xf]  ;;  %885 = vst [vmem:[#allocation2 + $0x78] sm:$0xf] %v884_v19  ;;  %v888_v26 = vsel %vm8013_vm2, %v666_v11, %v887_v20  ;;  %v678_v30 = vrot.slane %v676_v17, 7  ;;  %v685_v32 = vshrl.u32 %v485_v63, 16  ;;  %1945 = vrot.lane.b32.xlu1 %v1834_v44, %s7971_s25 }
  0x63   : > { %332 = vst [vmem:[#allocation2 + $0x98] sm:$0x1] %v331_v23  ;;  %v688_v34 = vshll.u32 %v485_v63, 16  ;;  %889 = vst [vmem:[#allocation2 + $0x80] sm:$0x1] %v888_v26  ;;  %v693_v35 = vshrl.u32 %v8263_v9, 16 }
  0x64   : > { %v696_v37 = vshll.u32 %v8263_v9, 16  ;;  %v278_v38 = vsel %vm8013_vm2, 0, %v277_v12  ;;  %v334_v31 = vsel %vm8023_vm4, 0, %v333_v14  ;;  %v681_v39 = vor.u32 %v679_v18, %v678_v30  ;;  %v1563_v45 = vld [vmem:[#allocation2 + $0x6c] sm:$0xf] }
  0x65   : > { %v683_v40 = vrot.slane %v678_v30, 4  ;;  %v687_v41 = vrot.slane %v685_v32, 7  ;;  %279 = vst [vmem:[#allocation2 + $0x9c] sm:$0x1] %v278_v38  ;;  %335 = vst [vmem:[#allocation2 + $0xa4] sm:$0x1] %v334_v31 }
  0x66   : > { %v702_v36 = vshrl.u32 %v487_v24, 16  ;;  %v1603_v28 = vld [vmem:[#allocation2 + $0x6c] sm:$0xe]  ;;  %v890_v44 = vld [vmem:[#allocation2 + $0x84] sm:$0xf]  ;;  %v682_v49 = vsel %vm8050_vm7, %v674_v22, %v681_v39  ;;  %v695_v60 = vrot.slane %v693_v35, 7 }
  0x67   : > { %v1564_v46 = vld [vmem:[#allocation2 + $0x70] sm:$0xf]  ;;  %v891_v51 = vsel %vm8057_vm8, %v673_v21, %v890_v44  ;;  %v894_v54 = vld [vmem:[#allocation2 + $0x8c] sm:$0x1]  ;;  %v690_v56 = vor.u32 %v688_v34, %v687_v41  ;;  %v691_v55 = vrot.slane %v687_v41, 4  ;;  %v705_v3 = vshll.u32 %v487_v24, 16 }
  0x68   : > { %v8293_v57 = vcombine.low %v1563_v45, %v1564_v46  ;;  %v7690_v58 = vld [vmem:[#allocation2 + $0x74] ss:$0 sps:$4 sm:$0x11]   ;;  %v6855_v59 = vcombine.low %v1603_v28, %v1564_v46  ;;  %892 = vst [vmem:[#allocation2 + $0x84] sm:$0xf] %v891_v51  ;;  %v895_v47 = vsel %vm8013_vm2, %v683_v40, %v894_v54  ;;  %v8298_v63 = vrot.slane %v702_v36, 7 }
  0x69   : > { %893 = vst.msk [vmem:[#allocation2 + $0x88] sm:$0xf] %vm226_vm5, %v682_v49  ;;  %v1566_v61 = vld [vmem:[#allocation2 + $0x7c] sm:$0xf]  ;;  %896 = vst [vmem:[#allocation2 + $0x8c] sm:$0x1] %v895_v47  ;;  %v698_v13 = vor.u32 %v696_v37, %v695_v60 }
  0x6a   : > { %v897_v62 = vld [vmem:[#allocation2 + $0x90] sm:$0xf]  ;;  %v1836_v6 = vshrl.u32 %v8293_v57, 16  ;;  %v1838_v53 = vshll.u32 %v8293_v57, 16  ;;  %v1843_v48 = vshll.u32 %v7690_v58, 16  ;;  %v2035_v9 = vrot.slane %v6855_v59, 1 }
  0x6b   : > { %v1565_v7 = vld [vmem:[#allocation2 + $0x78] sm:$0xf]  ;;  %v7692_v5 = vld [vmem:[#allocation2 + $0x80] ss:$0 sps:$4 sm:$0x11]   ;;  %v2036_v11 = vrot.slane %v7690_v58, 1  ;;  %v898_v43 = vsel %vm8057_vm8, %v690_v56, %v897_v62  ;;  %v707_v18 = vor.u32 %v705_v3, %v8298_v63  ;;  %v699_v26 = vsel %vm8050_vm7, %v691_v55, %v698_v13 }
  0x6c   : > { %v8302_v12 = vcombine.low %v1565_v7, %v1566_v61  ;;  %v1840_v14 = vrot.slane %v1838_v53, 1  ;;  %v1845_v15 = vrot.slane %v1843_v48, 1  ;;  %v1604_v16 = vld [vmem:[#allocation2 + $0x78] sm:$0xe]  ;;  %v700_v17 = vrot.slane %v695_v60, 4 }
  0x6d   : > { %899 = vst [vmem:[#allocation2 + $0x90] sm:$0xf] %v898_v43  ;;  %v1855_v20 = vshll.u32 %v7692_v5, 16  ;;  %v901_v21 = vld [vmem:[#allocation2 + $0x98] sm:$0x1]  ;;  %v6856_v23 = vcombine.low %v1604_v16, %v1566_v61  ;;  %v2039_v24 = vrot.slane %v7692_v5, 1  ;;  %v2037_v45 = vsel %vm1397_vm9, %v2035_v9, %v2036_v11 }
  0x6e   : > { %v1848_v1 = vshrl.u32 %v8302_v12, 16  ;;  %v1850_v19 = vshll.u32 %v8302_v12, 16  ;;  %v1841_v22 = vor.u32 %v1840_v14, %v1836_v6  ;;  %v488_v30 = vld [vmem:[%s8037_s23 + $0x64] sm:$0xf]  ;;  %v904_v32 = vld [vmem:[#allocation2 + $0x9c] sm:$0xf]  ;;  %v902_v31 = vsel %vm8013_vm2, %v700_v17, %v901_v21 }
  0x6f   : > { %v1857_v35 = vrot.slane %v1855_v20, 1  ;;  %v1567_v37 = vld [vmem:[#allocation2 + $0x84] sm:$0xf]  ;;  %900 = vst.msk [vmem:[#allocation2 + $0x94] sm:$0xf] %vm226_vm5, %v699_v26  ;;  %v905_v39 = vsel %vm8057_vm8, %v707_v18, %v904_v32  ;;  %v2038_v28 = vrot.slane %v6856_v23, 1 }
  0x70   : > { %v1852_v34 = vrot.slane %v1850_v19, 1  ;;  %v1568_v38 = vld [vmem:[#allocation2 + $0x88] sm:$0xf]  ;;  %v336_v41 = vld [vmem:[#allocation2 + $0xb0] sm:$0x1]  ;;  %v1846_v36 = vsel %vm1124_vm10, %v1841_v22, %v1845_v15  ;;  %v708_v54 = vrot.slane %v8298_v63, 4 }
  0x71   : > { %v280_v40 = vld [vmem:[#allocation2 + $0xa8] sm:$0x1]  ;;  %v8319_v44 = vcombine.low %v1567_v37, %v1568_v38  ;;  %v7695_v46 = vld [vmem:[#allocation2 + $0x8c] ss:$0 sps:$4 sm:$0x11]   ;;  %1947 = vrot.lane.b32.xlu0 %v1846_v36, %s7971_s25  ;;  %v710_v56 = vshrl.u32 %v488_v30, 16  ;;  %v2040_v58 = vsel %vm1397_vm9, %v2038_v28, %v2039_v24 }
  0x72   : > { %903 = vst [vmem:[#allocation2 + $0x98] sm:$0x1] %v902_v31  ;;  %906 = vst [vmem:[#allocation2 + $0x9c] sm:$0xf] %v905_v39  ;;  %v1853_v49 = vor.u32 %v1852_v34, %v1848_v1  ;;  %v1605_v51 = vld [vmem:[#allocation2 + $0x84] sm:$0xe] }
  0x73   : > { %v713_v55 = vshll.u32 %v488_v30, 16  ;;  %v1860_v59 = vshrl.u32 %v8319_v44, 16  ;;  %v1862_v47 = vshll.u32 %v8319_v44, 16  ;;  %v1867_v60 = vshll.u32 %v7695_v46, 16  ;;  %v489_v61 = vld [vmem:[%s8037_s23 + $0x68] sm:$0xf] }
  0x74   : > { %v1858_v62 = vsel %vm1124_vm10, %v1853_v49, %v1857_v35  ;;  %v1569_v3 = vld [vmem:[#allocation2 + $0x90] sm:$0xf]  ;;  %v6857_v6 = vcombine.low %v1605_v51, %v1568_v38  ;;  %v2042_v53 = vrot.slane %v7695_v46, 1  ;;  %v712_v48 = vrot.slane %v710_v56, 7  ;;  %v490_v7 = vld [vmem:[%s8037_s23 + $0x6c] sm:$0xf] }
  0x75   : > { %1949 = vrot.lane.b32.xlu1 %v1858_v62, %s7971_s25  ;;  %v1864_v63 = vrot.slane %v1862_v47, 1  ;;  %v1869_v9 = vrot.slane %v1867_v60, 1  ;;  %v1606_v5 = vld [vmem:[#allocation2 + $0x90] sm:$0xe]  ;;  %v281_v11 = vsel %vm8013_vm2, 0, %v280_v40  ;;  %v337_v13 = vsel %vm8023_vm4, 0, %v336_v41  ;;  %2075 = vrot.lane.b32.xlu0 %v2037_v45, %s7970_s24 }
  0x76   : > { %v2041_v43 = vrot.slane %v6857_v6, 1  ;;  %v715_v14 = vor.u32 %v713_v55, %v712_v48  ;;  %v717_v15 = vrot.slane %v712_v48, 4  ;;  %v908_v16 = vld [vmem:[#allocation2 + $0xa4] sm:$0x1]  ;;  %282 = vst [vmem:[#allocation2 + $0xa8] sm:$0x1] %v281_v11 }
  0x77   : > { %338 = vst [vmem:[#allocation2 + $0xb0] sm:$0x1] %v337_v13  ;;  %v719_v17 = vshrl.u32 %v489_v61, 16  ;;  %v1865_v18 = vor.u32 %v1864_v63, %v1860_v59  ;;  %v1570_v1 = vld [vmem:[#allocation2 + $0x94] sm:$0xf]  ;;  %v722_v19 = vshll.u32 %v489_v61, 16 }
  0x78   : > { %v727_v20 = vshrl.u32 %v490_v7, 16  ;;  %v730_v21 = vshll.u32 %v490_v7, 16  ;;  %v283_v22 = vld [vmem:[#allocation2 + $0xb4] sm:$0x1]  ;;  %v8335_v23 = vcombine.low %v1569_v3, %v1570_v1  ;;  %v2043_v26 = vsel %vm1397_vm9, %v2041_v43, %v2042_v53  ;;  %v339_v31 = vld [vmem:[#allocation2 + $0xbc] sm:$0x1] }
  0x79   : > { %v7697_v24 = vld [vmem:[#allocation2 + $0x98] ss:$0 sps:$4 sm:$0x11]   ;;  %v6858_v30 = vcombine.low %v1606_v5, %v1570_v1  ;;  %v716_v32 = vsel %vm8050_vm7, %v708_v54, %v715_v14  ;;  %2077 = vrot.lane.b32.xlu1 %v2040_v58, %s7970_s24  ;;  %v1870_v34 = vsel %vm1124_vm10, %v1865_v18, %v1869_v9  ;;  %v909_v35 = vsel %vm8013_vm2, %v717_v15, %v908_v16  ;;  %v491_v39 = vld [vmem:[%s8037_s23 + $0x70] sm:$0xf] }
  0x7a   : > { %907 = vst.msk [vmem:[#allocation2 + $0xa0] sm:$0xf] %vm226_vm5, %v716_v32  ;;  %v721_v37 = vrot.slane %v719_v17, 7  ;;  %v729_v38 = vrot.slane %v727_v20, 7  ;;  %1951 = vrot.lane.b32.xlu0 %v1870_v34, %s7971_s25  ;;  %v1872_v40 = vshrl.u32 %v8335_v23, 16  ;;  %v1874_v41 = vshll.u32 %v8335_v23, 16 }
  0x7b   : > { %v1879_v36 = vshll.u32 %v7697_v24, 16  ;;  %v2044_v45 = vrot.slane %v6858_v30, 1  ;;  %910 = vst [vmem:[#allocation2 + $0xa4] sm:$0x1] %v909_v35  ;;  %v492_v28 = vld [vmem:[%s8037_s23 + $0x74] sm:$0xf] }
  0x7c   : > { %v286_v46 = vld [vmem:[#allocation2 + $0xc0] sm:$0x1]  ;;  %v2045_v49 = vrot.slane %v7697_v24, 1  ;;  %v724_v51 = vor.u32 %v722_v19, %v721_v37  ;;  %v725_v54 = vrot.slane %v721_v37, 4  ;;  %v732_v56 = vor.u32 %v730_v21, %v729_v38  ;;  %v342_v55 = vld [vmem:[#allocation2 + $0xc8] sm:$0x1] }
  0x7d   : > { %v1876_v58 = vrot.slane %v1874_v41, 1  ;;  %v1881_v59 = vrot.slane %v1879_v36, 1  ;;  %v734_v47 = vrot.slane %v729_v38, 4  ;;  %v284_v60 = vsel %vm8013_vm2, 0, %v283_v22  ;;  %v493_v61 = vld [vmem:[%s8037_s23 + $0x78] sm:$0xf] }
  0x7e   : > { %v733_v62 = vsel %vm8050_vm7, %v725_v54, %v732_v56  ;;  %v911_v3 = vld [vmem:[#allocation2 + $0xa8] sm:$0xf]  ;;  %v915_v6 = vld [vmem:[#allocation2 + $0xb0] sm:$0x1]  ;;  %285 = vst [vmem:[#allocation2 + $0xb4] sm:$0x1] %v284_v60  ;;  %2079 = vrot.lane.b32.xlu0 %v2043_v26, %s7970_s24  ;;  %v2046_v22 = vsel %vm1397_vm9, %v2044_v45, %v2045_v49 }
  0x7f   : > { %v340_v53 = vsel %vm8023_vm4, 0, %v339_v31  ;;  %v736_v48 = vshrl.u32 %v491_v39, 16  ;;  %v8358_v7 = vld [vmem:[%s8037_s23 + $0x7c] sm:$0xf]  ;;  %v1877_v63 = vor.u32 %v1876_v58, %v1872_v40  ;;  %v912_v5 = vsel %vm8057_vm8, %v724_v51, %v911_v3  ;;  %914 = vst.msk [vmem:[#allocation2 + $0xac] sm:$0xf] %vm226_vm5, %v733_v62 }
  0x80   : > { %v1571_v9 = vld [vmem:[#allocation2 + $0x9c] sm:$0xf]  ;;  %v916_v11 = vsel %vm8013_vm2, %v734_v47, %v915_v6  ;;  %341 = vst [vmem:[#allocation2 + $0xbc] sm:$0x1] %v340_v53  ;;  %v739_v43 = vshll.u32 %v491_v39, 16  ;;  %v744_v15 = vshrl.u32 %v492_v28, 16 }
  0x81   : > { %v1607_v13 = vld [vmem:[#allocation2 + $0x9c] sm:$0xe]  ;;  %913 = vst [vmem:[#allocation2 + $0xa8] sm:$0xf] %v912_v5  ;;  %917 = vst [vmem:[#allocation2 + $0xb0] sm:$0x1] %v916_v11  ;;  %v1882_v18 = vsel %vm1124_vm10, %v1877_v63, %v1881_v59 }
  0x82   : > { %v738_v14 = vrot.slane %v736_v48, 7  ;;  %v747_v16 = vshll.u32 %v492_v28, 16  ;;  %v287_v17 = vsel %vm8013_vm2, 0, %v286_v46  ;;  %v1572_v1 = vld [vmem:[#allocation2 + $0xa0] sm:$0xf]  ;;  %v343_v19 = vsel %vm8023_vm4, 0, %v342_v55  ;;  %1953 = vrot.lane.b32.xlu1 %v1882_v18, %s7971_s25 }
  0x83   : > { %288 = vst [vmem:[#allocation2 + $0xc0] sm:$0x1] %v287_v17  ;;  %v753_v20 = vshrl.u32 %v493_v61, 16  ;;  %v756_v21 = vshll.u32 %v493_v61, 16  ;;  %v8373_v24 = vcombine.low %v1571_v9, %v1572_v1  ;;  %v6859_v30 = vcombine.low %v1607_v13, %v1572_v1  ;;  %344 = vst [vmem:[#allocation2 + $0xc8] sm:$0x1] %v343_v19 }
  0x84   : > { %v8375_v26 = vld [vmem:[#allocation2 + $0xa4] ss:$0 sps:$4 sm:$0x11]   ;;  %v741_v32 = vor.u32 %v739_v43, %v738_v14  ;;  %v742_v34 = vrot.slane %v738_v14, 4  ;;  %v746_v35 = vrot.slane %v744_v15, 7  ;;  %v761_v38 = vshrl.u32 %v8358_v7, 16 }
  0x85   : > { %v755_v37 = vrot.slane %v753_v20, 7  ;;  %v1884_v31 = vshrl.u32 %v8373_v24, 16  ;;  %v1886_v39 = vshll.u32 %v8373_v24, 16  ;;  %v1891_v40 = vshll.u32 %v8375_v26, 16  ;;  %v918_v46 = vld [vmem:[#allocation2 + $0xb4] sm:$0xf] }
  0x86   : > { %v764_v41 = vshll.u32 %v8358_v7, 16  ;;  %v2047_v36 = vrot.slane %v6859_v30, 1  ;;  %v749_v45 = vor.u32 %v747_v16, %v746_v35  ;;  %v751_v28 = vrot.slane %v746_v35, 4  ;;  %2081 = vrot.lane.b32.xlu1 %v2046_v22, %s7970_s24  ;;  %v1574_v56 = vld [vmem:[#allocation2 + $0xac] sm:$0xf] }
  0x87   : > { %v758_v49 = vor.u32 %v756_v21, %v755_v37  ;;  %v1888_v51 = vrot.slane %v1886_v39, 1  ;;  %v1893_v54 = vrot.slane %v1891_v40, 1  ;;  %v919_v55 = vsel %vm8057_vm8, %v741_v32, %v918_v46  ;;  %v922_v58 = vld [vmem:[#allocation2 + $0xbc] sm:$0x1]  ;;  %v2580_v27 = vld [vmem:[#allocation2 + $0x48] sm:$0xf] }
  0x88   : > { %v1573_v59 = vld [vmem:[#allocation2 + $0xa8] sm:$0xf]  ;;  %v750_v60 = vsel %vm8050_vm7, %v742_v34, %v749_v45  ;;  %920 = vst [vmem:[#allocation2 + $0xb4] sm:$0xf] %v919_v55  ;;  %v923_v61 = vsel %vm8013_vm2, %v751_v28, %v922_v58  ;;  %v2048_v53 = vrot.slane %v8375_v26, 1  ;;  %v759_v63 = vrot.slane %v755_v37, 4 }
  0x89   : > { %v1608_v47 = vld [vmem:[#allocation2 + $0xa8] sm:$0xe]  ;;  %v1889_v62 = vor.u32 %v1888_v51, %v1884_v31  ;;  %v8389_v3 = vcombine.low %v1573_v59, %v1574_v56  ;;  %v7702_v6 = vld [vmem:[#allocation2 + $0xb0] ss:$0 sps:$4 sm:$0x11]   ;;  %v763_v9 = vrot.slane %v761_v38, 7 }
  0x8a   : > { %v6860_v48 = vcombine.low %v1608_v47, %v1574_v56  ;;  %921 = vst.msk [vmem:[#allocation2 + $0xb8] sm:$0xf] %vm226_vm5, %v750_v60  ;;  %924 = vst [vmem:[#allocation2 + $0xbc] sm:$0x1] %v923_v61  ;;  %v925_v7 = vld [vmem:[#allocation2 + $0xc0] sm:$0xf]  ;;  %v2049_v20 = vsel %vm1397_vm9, %v2047_v36, %v2048_v53 }
  0x8b   : > { %v926_v5 = vsel %vm8057_vm8, %v758_v49, %v925_v7  ;;  %v1894_v11 = vsel %vm1124_vm10, %v1889_v62, %v1893_v54  ;;  %v1896_v13 = vshrl.u32 %v8389_v3, 16  ;;  %v1898_v43 = vshll.u32 %v8389_v3, 16  ;;  %v929_v15 = vld [vmem:[#allocation2 + $0xc8] sm:$0x1]  ;;  %v934_v38 = vld [vmem:[#allocation2 + $0xc] sm:$0xf] }
  0x8c   : > { %v1903_v14 = vshll.u32 %v7702_v6, 16  ;;  %927 = vst [vmem:[#allocation2 + $0xc0] sm:$0xf] %v926_v5  ;;  %v7972_v16 = vmov 0   ;;  %1955 = vrot.lane.b32.xlu0 %v1894_v11, %s7971_s25  ;;  %v766_v17 = vor.u32 %v764_v41, %v763_v9  ;;  %v768_v18 = vrot.slane %v763_v9, 4 }
  0x8d   : > { %227 = vst.msk [vmem:[#allocation2] sm:$0xf] %vm226_vm5, %v7972_v16  ;;  %228 = vst.msk [vmem:[#allocation2 + $0x4] sm:$0xf] %vm226_vm5, %v7972_v16  ;;  %v1900_v1 = vrot.slane %v1898_v43, 1  ;;  %v2050_v30 = vrot.slane %v6860_v48, 1 }
  0x8e   : > { %230 = vst.msk [vmem:[#allocation2 + $0x8] sm:$0x1] %vm229_vm0, %v7972_v16  ;;  %234 = vst.msk [vmem:[#allocation2 + $0xd4] sm:$0x1] %vm229_vm0, %v7972_v16  ;;  %v1905_v19 = vrot.slane %v1903_v14, 1  ;;  %v767_v21 = vsel %vm8050_vm7, %v759_v63, %v766_v17  ;;  %v930_v22 = vsel %vm8013_vm2, %v768_v18, %v929_v15  ;;  %v2051_v32 = vrot.slane %v7702_v6, 1 }
  0x8f   : > { %232 = vst.msk [vmem:[#allocation2 + $0xcc] sm:$0xf] %vm226_vm5, %v7972_v16  ;;  %233 = vst.msk [vmem:[#allocation2 + $0xd0] sm:$0xf] %vm226_vm5, %v7972_v16  ;;  %v1901_v26 = vor.u32 %v1900_v1, %v1896_v13  ;;  %v1575_v34 = vld [vmem:[#allocation2 + $0xb4] sm:$0xf] }
  0x90   : > { %348 = vst.msk [vmem:[#allocation3] sm:$0xf] %vm226_vm5, %v7972_v16  ;;  %349 = vst.msk [vmem:[#allocation3 + $0x4] sm:$0xf] %vm226_vm5, %v7972_v16  ;;  %v1609_v35 = vld [vmem:[#allocation2 + $0xb4] sm:$0xe]  ;;  %2083 = vrot.lane.b32.xlu0 %v2049_v20, %s7970_s24  ;;  %v2052_v28 = vsel %vm1397_vm9, %v2050_v30, %v2051_v32 }
  0x91   : > { %350 = vst.msk [vmem:[#allocation3 + $0x8] sm:$0x1] %vm229_vm0, %v7972_v16  ;;  %354 = vst.msk [vmem:[#allocation3 + $0xd4] sm:$0x1] %vm229_vm0, %v7972_v16  ;;  %v1576_v37 = vld [vmem:[#allocation2 + $0xb8] sm:$0xf]  ;;  %v1906_v31 = vsel %vm1124_vm10, %v1901_v26, %v1905_v19 }
  0x92   : > { %352 = vst.msk [vmem:[#allocation3 + $0xcc] sm:$0xf] %vm226_vm5, %v7972_v16  ;;  %353 = vst.msk [vmem:[#allocation3 + $0xd0] sm:$0xf] %vm226_vm5, %v7972_v16  ;;  %v8419_v39 = vcombine.low %v1575_v34, %v1576_v37  ;;  %v8421_v41 = vld [vmem:[#allocation2 + $0x10] sm:$0xf]  ;;  %1957 = vrot.lane.b32.xlu1 %v1906_v31, %s7971_s25  ;;  %v6861_v36 = vcombine.low %v1609_v35, %v1576_v37 }
  0x93   : > { %928 = vst.msk [vmem:[#allocation2 + $0xc4] sm:$0xf] %vm226_vm5, %v767_v21  ;;  %931 = vst [vmem:[#allocation2 + $0xc8] sm:$0x1] %v930_v22  ;;  %v1577_v56 = vld [vmem:[#allocation2 + $0xc0] sm:$0xf]  ;;  %v8432_v59 = vcombine.low %v934_v38, %v8421_v41 }
  0x94   : > { %v7705_v40 = vld [vmem:[#allocation2 + $0xbc] ss:$0 sps:$4 sm:$0x11]   ;;  %v238_v45 = vld [vmem:[#allocation2] sm:$0x1]  ;;  %v1908_v46 = vshrl.u32 %v8419_v39, 16 }
  0x95   : > { %v1910_v49 = vshll.u32 %v8419_v39, 16  ;;  %v1915_v51 = vshll.u32 %v7705_v40, 16  ;;  %v294_v54 = vld [vmem:[#allocation2 + $0x8] sm:$0x1]  ;;  %v239_v55 = vsel %vm8013_vm2, 0, %v238_v45  ;;  %v2053_v48 = vrot.slane %v6861_v36, 1 }
  0x96   : > { %v295_v58 = vsel %vm8023_vm4, 0, %v294_v54  ;;  %v1610_v61 = vld [vmem:[#allocation2 + $0xc0] sm:$0xe]  ;;  %240 = vst [vmem:[#allocation2] sm:$0x1] %v239_v55  ;;  %2085 = vrot.lane.b32.xlu1 %v2052_v28, %s7970_s24  ;;  %v2054_v5 = vrot.slane %v7705_v40, 1 }
  0x97   : > { %v1912_v47 = vrot.slane %v1910_v49, 1  ;;  %v1917_v60 = vrot.slane %v1915_v51, 1  ;;  %296 = vst [vmem:[#allocation2 + $0x8] sm:$0x1] %v295_v58  ;;  %v2572_v62 = vld [vmem:[#allocation2 + $0x18] sm:$0xf] }
  0x98   : > { %v8434_v6 = vld [vmem:[#allocation2 + $0x1c] sm:$0xf]  ;;  %v8439_v13 = vld [vmem:[#allocation2 + $0x14] ss:$0 sps:$4 sm:$0x11]   ;;  %v1140_v43 = vshll.u32 %v8432_v59, 16  ;;  %v2055_v30 = vsel %vm1397_vm9, %v2053_v48, %v2054_v5 }
  0x99   : > { %v1913_v7 = vor.u32 %v1912_v47, %v1908_v46  ;;  %v2574_v14 = vld [vmem:[#allocation2 + $0x24] sm:$0xf]  ;;  %v8445_v1 = vld [vmem:[#allocation2 + $0x28] sm:$0xf]  ;;  %v1138_v20 = vshrl.u32 %v8432_v59, 16  ;;  %v8450_v21 = vcombine.low %v2572_v62, %v8434_v6  ;;  %v1145_v38 = vshll.u32 %v8439_v13, 16 }
  0x9a   : > { %v1578_v53 = vld [vmem:[#allocation2 + $0xc4] sm:$0xf]  ;;  %v7707_v9 = vld [vmem:[#allocation2 + $0xc8] ss:$0 sps:$4 sm:$0x11]   ;;  %v1142_v37 = vrot.slane %v1140_v43, 1  ;;  %v8457_v40 = vcombine.low %v2574_v14, %v8445_v1 }
  0x9b   : > { %v8437_v63 = vcombine.low %v1577_v56, %v1578_v53  ;;  %v6862_v11 = vcombine.low %v1610_v61, %v1578_v53  ;;  %v1918_v15 = vsel %vm1124_vm10, %v1913_v7, %v1917_v60  ;;  %v1927_v18 = vshll.u32 %v7707_v9, 16  ;;  %v933_v19 = vld [vmem:[#allocation2 + $0x4] sm:$0xf]  ;;  %v980_v32 = vld [vmem:[#allocation2] sm:$0xe] }
  0x9c   : > { %1959 = vrot.lane.b32.xlu0 %v1918_v15, %s7971_s25  ;;  %v981_v34 = vld [vmem:[#allocation2 + $0xc] sm:$0xe]  ;;  %v8454_v31 = vld [vmem:[#allocation2 + $0x20] ss:$0 sps:$4 sm:$0x11]   ;;  %v2057_v28 = vrot.slane %v7707_v9, 1  ;;  %v6799_v51 = vcombine.low %v980_v32, %v933_v19  ;;  %v1143_v14 = vor.u32 %v1142_v37, %v1138_v20 }
  0x9d   : > { %v1920_v16 = vshrl.u32 %v8437_v63, 16  ;;  %v1922_v17 = vshll.u32 %v8437_v63, 16  ;;  %v1929_v26 = vrot.slane %v1927_v18, 1  ;;  %v932_v35 = vld [vmem:[#allocation2] sm:$0xf]  ;;  %v2056_v45 = vrot.slane %v6862_v11, 1 }
  0x9e   : > { %v8459_v46 = vcombine.low %v932_v35, %v933_v19  ;;  %v7710_v49 = vld [vmem:[#allocation2 + $0x8] ss:$0 sps:$4 sm:$0x11]   ;;  %v2767_v54 = vshll.u32 %v8450_v21, 16  ;;  %v2620_v61 = vld [vmem:[#allocation2 + $0x18] sm:$0xe]  ;;  %v6800_v53 = vcombine.low %v981_v34, %v8421_v41 }
  0x9f   : > { %v1924_v22 = vrot.slane %v1922_v17, 1  ;;  %v8463_v56 = vld [vmem:[#allocation2 + $0x2c] ss:$0 sps:$4 sm:$0x11]   ;;  %v1133_v60 = vshll.u32 %v7710_v49, 16  ;;  %v1147_v62 = vrot.slane %v1145_v38, 1  ;;  %v2058_v5 = vsel %vm1397_vm9, %v2056_v45, %v2057_v28 }
  0xa0   : > { %2087 = vrot.lane.b32.xlu0 %v2055_v30, %s7970_s24  ;;  %v1126_v58 = vshrl.u32 %v8459_v46, 16  ;;  %v1128_v47 = vshll.u32 %v8459_v46, 16  ;;  %v2779_v48 = vshll.u32 %v8457_v40, 16  ;;  %v936_v7 = vld [vmem:[#allocation2 + $0x18] sm:$0xf]  ;;  %v2765_v17 = vshrl.u32 %v8450_v21, 16 }
  0xa1   : > { %v1925_v36 = vor.u32 %v1924_v22, %v1920_v16  ;;  %v8471_v9 = vld [vmem:[#allocation2 + $0x1c] sm:$0xf]  ;;  %v1135_v43 = vrot.slane %v1133_v60, 1  ;;  %v938_v15 = vld [vmem:[#allocation2 + $0x24] sm:$0xf]  ;;  %v2769_v18 = vrot.slane %v2767_v54, 1  ;;  %v6934_v41 = vcombine.low %v2620_v61, %v8434_v6 }
  0xa2   : > { %v1130_v11 = vrot.slane %v1128_v47, 1  ;;  %v8474_v16 = vld [vmem:[#allocation2 + $0x28] sm:$0xf]  ;;  %v2772_v19 = vshll.u32 %v8454_v31, 16  ;;  %v1399_v30 = vrot.slane %v7710_v49, 1  ;;  %v8480_v34 = vcombine.low %v936_v7, %v8471_v9 }
  0xa3   : > { %v1930_v55 = vsel %vm1124_vm10, %v1925_v36, %v1929_v26  ;;  %v1398_v26 = vrot.slane %v6799_v51, 1  ;;  %v2621_v32 = vld [vmem:[#allocation2 + $0x24] sm:$0xe]  ;;  %v1401_v20 = vrot.slane %v6800_v53, 1  ;;  %v1402_v35 = vrot.slane %v8439_v13, 1 }
  0xa4   : > { %1961 = vrot.lane.b32.xlu1 %v1930_v55, %s7971_s25  ;;  %v1131_v22 = vor.u32 %v1130_v11, %v1126_v58  ;;  %v2784_v37 = vshll.u32 %v8463_v56, 16  ;;  %v8486_v38 = vcombine.low %v938_v15, %v8474_v16  ;;  %v1148_v6 = vsel %vm1124_vm10, %v1143_v14, %v1147_v62  ;;  %v8493_v13 = vld [vmem:[#allocation2 + $0x20] ss:$0 sps:$4 sm:$0x11]   ;;  %v982_v61 = vld [vmem:[#allocation2 + $0x18] sm:$0xe] }
  0xa5   : > { %v2777_v45 = vshrl.u32 %v8457_v40, 16  ;;  %v2781_v28 = vrot.slane %v2779_v48, 1  ;;  %v2770_v49 = vor.u32 %v2769_v18, %v2765_v17  ;;  %v2774_v51 = vrot.slane %v2772_v19, 1  ;;  %v8497_v60 = vld [vmem:[#allocation2 + $0x2c] ss:$0 sps:$4 sm:$0x11]  }
  0xa6   : > { %v1136_v36 = vsel %vm1124_vm10, %v1131_v22, %v1135_v43  ;;  %v3036_v54 = vrot.slane %v6934_v41, 1  ;;  %v6935_v55 = vcombine.low %v2621_v32, %v8445_v1  ;;  %v1400_v58 = vsel %vm1397_vm9, %v1398_v26, %v1399_v30  ;;  %v2576_v48 = vld [vmem:[#allocation2 + $0x30] sm:$0xf]  ;;  %v8501_v7 = vld [vmem:[#allocation2 + $0x34] sm:$0xf] }
  0xa7   : > { %1317 = vrot.lane.b32.xlu0 %v1136_v36, %s7971_s25  ;;  %v1152_v47 = vshll.u32 %v8480_v34, 16  ;;  %v2786_v62 = vrot.slane %v2784_v37, 1  ;;  %v1164_v53 = vshll.u32 %v8486_v38, 16  ;;  %v2782_v1 = vor.u32 %v2781_v28, %v2777_v45  ;;  %v2578_v11 = vld [vmem:[#allocation2 + $0x3c] sm:$0xf] }
  0xa8   : > { %2089 = vrot.lane.b32.xlu1 %v2058_v5, %s7970_s24  ;;  %v1403_v5 = vsel %vm1397_vm9, %v1401_v20, %v1402_v35  ;;  %v8504_v43 = vld [vmem:[#allocation2 + $0x40] sm:$0xf]  ;;  %v2775_v14 = vsel %vm1124_vm10, %v2770_v49, %v2774_v51  ;;  %v3037_v15 = vrot.slane %v8454_v31, 1  ;;  %v3039_v17 = vrot.slane %v6935_v55, 1  ;;  %v983_v26 = vld [vmem:[#allocation2 + $0x24] sm:$0xe] }
  0xa9   : > { %v3040_v18 = vrot.slane %v8463_v56, 1  ;;  %v1150_v19 = vshrl.u32 %v8480_v34, 16  ;;  %v1154_v41 = vrot.slane %v1152_v47, 1  ;;  %v1157_v22 = vshll.u32 %v8493_v13, 16  ;;  %v940_v49 = vld [vmem:[#allocation2 + $0x30] sm:$0xf] }
  0xaa   : > { %v8513_v30 = vcombine.low %v2576_v48, %v8501_v7  ;;  %v1169_v32 = vshll.u32 %v8497_v60, 16  ;;  %v6801_v20 = vcombine.low %v982_v61, %v8471_v9  ;;  %v8518_v35 = vld [vmem:[#allocation2 + $0x38] ss:$0 sps:$4 sm:$0x11]   ;;  %v8521_v31 = vcombine.low %v2578_v11, %v8504_v43  ;;  %v8530_v9 = vld [vmem:[#allocation2 + $0x34] sm:$0xf]  ;;  %v8534_v61 = vpop.permute.xlu0 %2063 }
  0xab   : > { %1446 = vrot.lane.b32.xlu0 %v1400_v58, %s7970_s24  ;;  %v2787_v56 = vsel %vm1124_vm10, %v2782_v1, %v2786_v62  ;;  %v1162_v37 = vshrl.u32 %v8486_v38, 16  ;;  %v1166_v36 = vrot.slane %v1164_v53, 1  ;;  %v3038_v45 = vsel %vm1397_vm9, %v3036_v54, %v3037_v15  ;;  %v8544_v15 = vld [vmem:[#allocation2 + $0x40] sm:$0xf]  ;;  %v8571_v33 = vld [vmem:[#allocation2 + $0x4c] sm:$0xf] }
  0xac   : > { %1319 = vrot.lane.b32.xlu1 %v1148_v6, %s7971_s25  ;;  %10781 = vst [vmem:[#allocation6_spill] sm:$0xff] %v8513_v30  ;;  %10782 = vst [vmem:[#allocation7_spill] sm:$0xff] %v8521_v31  ;;  %v8525_v6 = vld [vmem:[#allocation2 + $0x44] ss:$0 sps:$4 sm:$0x11]   ;;  %v3041_v28 = vsel %vm1397_vm9, %v3039_v17, %v3040_v18  ;;  %v1155_v51 = vor.u32 %v1154_v41, %v1150_v19  ;;  %v1159_v55 = vrot.slane %v1157_v22, 1 }
  0xad   : > { %v1405_v58 = vrot.slane %v8493_v13, 1  ;;  %v2791_v47 = vshll.u32 %v8513_v30, 16  ;;  %v1171_v62 = vrot.slane %v1169_v32, 1  ;;  %v1404_v53 = vrot.slane %v6801_v20, 1  ;;  %v942_v13 = vld [vmem:[#allocation2 + $0x3c] sm:$0xf] }
  0xae   : > { %v6802_v48 = vcombine.low %v983_v26, %v8474_v16  ;;  %v2803_v54 = vshll.u32 %v8521_v31, 16  ;;  %v1408_v1 = vrot.slane %v8497_v60, 1  ;;  %v2796_v11 = vshll.u32 %v8518_v35, 16  ;;  %v8548_v18 = vld [vmem:[#allocation2 + $0x38] ss:$0 sps:$4 sm:$0x11]  }
  0xaf   : > { %2956 = vrot.lane.b32.xlu0 %v2775_v14, %s7971_s25  ;;  %v8542_v14 = vcombine.low %v940_v49, %v8530_v9  ;;  %v2808_v17 = vshll.u32 %v8525_v6, 16  ;;  %v1160_v16 = vsel %vm1124_vm10, %v1155_v51, %v1159_v55  ;;  %v2789_v19 = vshrl.u32 %v8513_v30, 16  ;;  %v2622_v60 = vld [vmem:[#allocation2 + $0x30] sm:$0xe]  ;;  %v2623_v22 = vld [vmem:[#allocation2 + $0x3c] sm:$0xe]  ;;  %v8562_v55 = vpop.permute.xlu1 %2059 }
  0xb0   : > { %1448 = vrot.lane.b32.xlu1 %v1403_v5, %s7970_s24  ;;  %v1167_v5 = vor.u32 %v1166_v36, %v1162_v37  ;;  %v2793_v41 = vrot.slane %v2791_v47, 1  ;;  %v1407_v26 = vrot.slane %v6802_v48, 1  ;;  %v2801_v32 = vshrl.u32 %v8521_v31, 16  ;;  %v8560_v51 = vld [vmem:[#allocation2 + $0x44] ss:$0 sps:$4 sm:$0x11]   ;;  %v8564_v47 = vpop.permute.xlu0 %2067 }
  0xb1   : > { %10783 = vst [vmem:[#allocation8_spill] sm:$0xff] %v8542_v14  ;;  %v2805_v20 = vrot.slane %v2803_v54, 1  ;;  %v2798_v36 = vrot.slane %v2796_v11, 1  ;;  %v1176_v49 = vshll.u32 %v8542_v14, 16  ;;  %v6936_v48 = vcombine.low %v2622_v60, %v8501_v7 }
  0xb2   : > { %v1172_v37 = vsel %vm1124_vm10, %v1167_v5, %v1171_v62  ;;  %v6937_v54 = vcombine.low %v2623_v22, %v8504_v43  ;;  %v1181_v62 = vshll.u32 %v8548_v18, 16  ;;  %v984_v5 = vld [vmem:[#allocation2 + $0x30] sm:$0xe]  ;;  %v2794_v11 = vor.u32 %v2793_v41, %v2789_v19  ;;  %v8580_v19 = vld [vmem:[#allocation2 + $0x58] sm:$0xf] }
  0xb3   : > { %3084 = vrot.lane.b32.xlu0 %v3038_v45, %s7970_s24  ;;  %v3043_v45 = vrot.slane %v8518_v35, 1  ;;  %v1406_v35 = vsel %vm1397_vm9, %v1404_v53, %v1405_v58  ;;  %v2806_v31 = vor.u32 %v2805_v20, %v2801_v32  ;;  %v1409_v43 = vsel %vm1397_vm9, %v1407_v26, %v1408_v1  ;;  %v2582_v53 = vld [vmem:[#allocation2 + $0x54] sm:$0xf]  ;;  %v8639_v30 = vld [vmem:[#allocation2 + $0x50] ss:$0 sps:$4 sm:$0x11]  }
  0xb4   : > { %2958 = vrot.lane.b32.xlu1 %v2787_v56, %s7971_s25  ;;  %v8555_v56 = vcombine.low %v942_v13, %v8544_v15  ;;  %v985_v13 = vld [vmem:[#allocation2 + $0x3c] sm:$0xe]  ;;  %v1178_v60 = vrot.slane %v1176_v49, 1  ;;  %v1193_v22 = vshll.u32 %v8560_v51, 16  ;;  %v6803_v58 = vcombine.low %v984_v5, %v8530_v9  ;;  %v8590_v9 = vpop.permute.xlu1 %2061  ;;  %v8592_v5 = vpop.permute.xlu0 %2071 }
  0xb5   : > { %v3042_v41 = vrot.slane %v6936_v48, 1  ;;  %v3045_v32 = vrot.slane %v6937_v54, 1  ;;  %v8585_v20 = vcombine.low %v2580_v27, %v8571_v33  ;;  %v1183_v1 = vrot.slane %v1181_v62, 1 }
  0xb6   : > { %10784 = vst [vmem:[#allocation9_spill] sm:$0xff] %v8555_v56  ;;  %v1188_v7 = vshll.u32 %v8555_v56, 16  ;;  %v1186_v26 = vshrl.u32 %v8555_v56, 16  ;;  %v1411_v49 = vrot.slane %v8548_v18, 1  ;;  %v8599_v27 = vcombine.low %v2582_v53, %v8580_v19  ;;  %v8614_v53 = vld [vmem:[#allocation2 + $0x4c] sm:$0xf] }
  0xb7   : > { %1321 = vrot.lane.b32.xlu0 %v1160_v16, %s7971_s25  ;;  %v3046_v16 = vrot.slane %v8525_v6, 1  ;;  %v6804_v6 = vcombine.low %v985_v13, %v8544_v15  ;;  %10785 = vst [vmem:[#allocation10_spill] sm:$0xff] %v8585_v20  ;;  %v8596_v15 = vld [vmem:[#allocation2 + $0x50] ss:$0 sps:$4 sm:$0x11]   ;;  %v1195_v62 = vrot.slane %v1193_v22, 1 }
  0xb8   : > { %3086 = vrot.lane.b32.xlu1 %v3041_v28, %s7970_s24  ;;  %v2810_v28 = vrot.slane %v2808_v17, 1  ;;  %v1174_v17 = vshrl.u32 %v8542_v14, 16  ;;  %v1190_v54 = vrot.slane %v1188_v7, 1  ;;  %10786 = vst [vmem:[#allocation11_spill] sm:$0xff] %v8599_v27  ;;  %v2815_v13 = vshll.u32 %v8585_v20, 16 }
  0xb9   : > { %v1413_v18 = vrot.slane %v6804_v6, 1  ;;  %v8604_v56 = vld [vmem:[#allocation2 + $0x5c] ss:$0 sps:$4 sm:$0x11]   ;;  %vm2201_vm11 = vcmask 1043456   ;;  %vm1478_vm12 = vcmask 64512  }
  0xba   : > { %v2811_v48 = vsel %vm1124_vm10, %v2806_v31, %v2810_v28  ;;  %v3044_v31 = vsel %vm1397_vm9, %v3042_v41, %v3043_v45  ;;  %v2813_v28 = vshrl.u32 %v8585_v20, 16  ;;  %v2624_v7 = vld [vmem:[#allocation2 + $0x48] sm:$0xe]  ;;  %v2820_v22 = vshll.u32 %v8596_v15, 16  ;;  %v2625_v6 = vld [vmem:[#allocation2 + $0x54] sm:$0xe] }
  0xbb   : > { %1450 = vrot.lane.b32.xlu0 %v1406_v35, %s7970_s24  ;;  %v1410_v35 = vrot.slane %v6803_v58, 1  ;;  %v2827_v58 = vshll.u32 %v8599_v27, 16  ;;  %v3047_v45 = vsel %vm1397_vm9, %v3045_v32, %v3046_v16  ;;  %v7754_v20 = vld [vmem:[%s10743_s1 + $0x14] ss:$0 sps:$4 sm:$0xff]   ;;  %v8625_v14 = vld [vmem:[#allocation2 + $0x58] sm:$0xf] }
  0xbc   : > { %1323 = vrot.lane.b32.xlu1 %v1172_v37, %s7971_s25  ;;  %v2799_v37 = vsel %vm1124_vm10, %v2794_v11, %v2798_v36  ;;  %v1179_v36 = vor.u32 %v1178_v60, %v1174_v17  ;;  %v1414_v11 = vrot.slane %v8560_v51, 1  ;;  %v1932_v17 = vpop.permute.xlu0 %1931  ;;  %v7757_v51 = vld [vmem:[%s10743_s1 + $0xc] sm:$0xff]   ;;  %v1191_v60 = vor.u32 %v1190_v54, %v1186_v26  ;;  %v946_v54 = vld [vmem:[#allocation2 + $0x54] sm:$0xf]  ;;  %7648 = vmatprep.subr.msk.bf16.mxu0 %vm2201_vm11, %v7754_v20 }
  0xbd   : > { %v2817_v26 = vrot.slane %v2815_v13, 1  ;;  %v2092_v16 = vsel %vm1478_vm12, %v8137_v25, %v1932_v17  ;;  %vm1511_vm13 = vcmask 130048   ;;  %v2832_v32 = vshll.u32 %v8604_v56, 16 }
  0xbe   : > { %v1184_v41 = vsel %vm1124_vm10, %v1179_v36, %v1183_v1  ;;  %v2203_v36 = vsel %vm2201_vm11, %v7754_v20, 0  ;;  %vm2168_vm14 = vcmask 195584   ;;  %v2822_v17 = vrot.slane %v2820_v22, 1  ;;  %v8651_v22 = vld [vmem:[#allocation2 + $0x64] sm:$0xf] }
  0xbf   : > { %2960 = vrot.lane.b32.xlu0 %v2799_v37, %s7971_s25  ;;  %v8618_v37 = vpop.permute.xlu1 %2065  ;;  %7433 = vmatpush3.bf16.msra.mxu0 %v2203_v36  ;;  %v2124_v20 = vsel %vm1511_vm13, %v2092_v16, %v8562_v55  ;;  %v2834_v36 = vrot.slane %v2832_v32, 1  ;;  %v1205_v16 = vshll.u32 %v8639_v30, 16  ;;  %v2586_v32 = vld [vmem:[#allocation2 + $0x6c] sm:$0xf] }
  0xc0   : > { %1452 = vrot.lane.b32.xlu1 %v1409_v43, %s7970_s24  ;;  %v944_v43 = vld [vmem:[#allocation2 + $0x48] sm:$0xf]  ;;  %v1934_v13 = vpop.permute.xlu0 %1933  ;;  %7434 = vmatprep.subr.bf16.mxu0 %v7757_v51 }
  0xc1   : > { %v8631_v1 = vcombine.low %v944_v43, %v8614_v53  ;;  %v8642_v43 = vcombine.low %v946_v54, %v8625_v14  ;;  %7436 = vmatprep.mubr.msk.bf16.mxu0 %vm2168_vm14, %v2124_v20  ;;  %v2818_v54 = vor.u32 %v2817_v26, %v2813_v28  ;;  %v3052_v26 = vrot.slane %v8604_v56, 1  ;;  %v986_v20 = vld [vmem:[#allocation2 + $0x48] sm:$0xe] }
  0xc3   : > { %3088 = vrot.lane.b32.xlu0 %v3044_v31, %s7970_s24  ;;  %v2825_v31 = vshrl.u32 %v8599_v27, 16  ;;  %10787 = vst [vmem:[#allocation12_spill] sm:$0xff] %v8642_v43  ;;  %v1200_v27 = vshll.u32 %v8631_v1, 16  ;;  %v8655_v55 = vpop.permute.xlu1 %2069  ;;  %7435 = vmatpush3.bf16.msra.mxu0 %v7757_v51 }
  0xc4   : > { %2962 = vrot.lane.b32.xlu1 %v2811_v48, %s7971_s25  ;;  %v6938_v48 = vcombine.low %v2624_v7, %v8571_v33  ;;  %v1196_v33 = vsel %vm1124_vm10, %v1191_v60, %v1195_v62  ;;  %v2829_v7 = vrot.slane %v2827_v58, 1  ;;  %v1412_v62 = vsel %vm1397_vm9, %v1410_v35, %v1411_v49  ;;  %v2584_v58 = vld [vmem:[#allocation2 + $0x60] sm:$0xf]  ;;  %v8659_v49 = vld [vmem:[#allocation2 + $0x5c] ss:$0 sps:$4 sm:$0x11]   ;;  %v1936_v28 = vpop.permute.xlu0 %1935 }
  0xc5   : > { %v6939_v60 = vcombine.low %v2625_v6, %v8580_v19  ;;  %v8661_v19 = vld [vmem:[#allocation2 + $0x68] ss:$0 sps:$4 sm:$0x11]   ;;  %v7788_v6 = vld [vmem:[%s10743_s1 + $0x18] sm:$0xff]   ;;  %v2096_v51 = vsel %vm1478_vm12, %v8177_v29, %v1936_v28 }
  0xc6   : > { %v3048_v25 = vrot.slane %v6938_v48, 1  ;;  %v1212_v48 = vshll.u32 %v8642_v43, 16  ;;  %v2128_v56 = vsel %vm1511_vm13, %v2096_v51, %v8534_v61  ;;  %v1210_v61 = vshrl.u32 %v8642_v43, 16  ;;  %v8704_v28 = vld [vmem:[#allocation2 + $0x74] ss:$0 sps:$4 sm:$0x11]  }
  0xc7   : > { %1325 = vrot.lane.b32.xlu0 %v1184_v41, %s7971_s25  ;;  %v2830_v41 = vor.u32 %v2829_v7, %v2825_v31  ;;  %v1198_v31 = vshrl.u32 %v8631_v1, 16  ;;  %v1202_v7 = vrot.slane %v1200_v27, 1 }
  0xc8   : > { %3090 = vrot.lane.b32.xlu1 %v3047_v45, %s7970_s24  ;;  %v2094_v45 = vsel %vm1478_vm12, %v8160_v10, %v1934_v13  ;;  %v1415_v10 = vsel %vm1397_vm9, %v1413_v18, %v1414_v11  ;;  %v8671_v11 = vcombine.low %v2584_v58, %v8651_v22  ;;  %v7762_v18 = vld [vmem:[%s10743_s1 + $0x20] ss:$0 sps:$4 sm:$0xff]   ;;  %v8680_v13 = vld [vmem:[#allocation2 + $0x70] sm:$0xf] }
  0xc9   : > { %v2126_v35 = vsel %vm1511_vm13, %v2094_v45, %v8590_v9  ;;  %v3051_v9 = vrot.slane %v6939_v60, 1  ;;  %v987_v45 = vld [vmem:[#allocation2 + $0x54] sm:$0xe]  ;;  %7650 = vmatprep.subr.msk.bf16.mxu0 %vm2201_vm11, %v7762_v18  ;;  %v2835_v29 = vsel %vm1124_vm10, %v2830_v41, %v2834_v36  ;;  %v3226_v60 = vsel %vm2201_vm11, %v7762_v18, 0 }
  0xca   : > { %7437 = vmatmul.mubr.msk.bf16.vlgmr.msra.gmra.mxu0 %vm2168_vm14, %v2126_v35  ;;  %v2839_v27 = vshll.u32 %v8671_v11, 16  ;;  %v8696_v58 = vcombine.low %v2586_v32, %v8680_v13  ;;  %v1207_v36 = vrot.slane %v1205_v16, 1  ;;  %v6806_v41 = vcombine.low %v987_v45, %v8625_v14 }
  0xcb   : > { %1454 = vrot.lane.b32.xlu0 %v1412_v62, %s7970_s24  ;;  %v1217_v62 = vshll.u32 %v8659_v49, 16  ;;  %7440 = vmatprep.mubr.msk.bf16.mxu0 %vm2168_vm14, %v2128_v56  ;;  %v2844_v35 = vshll.u32 %v8661_v19, 16  ;;  %v10788_v18 = vrot.slane %v8596_v15, 1  ;;  %v3053_v32 = vsel %vm1397_vm9, %v3051_v9, %v3052_v26 }
  0xcc   : > { %1327 = vrot.lane.b32.xlu1 %v1196_v33, %s7971_s25  ;;  %v2823_v33 = vsel %vm1124_vm10, %v2818_v54, %v2822_v17  ;;  %v1214_v17 = vrot.slane %v1212_v48, 1  ;;  %v8698_v54 = vpop.permute.xlu1 %2073  ;;  %7505 = vmatpush3.bf16.msra.mxu0 %v3226_v60  ;;  %v1940_v48 = vpop.permute.xlu0 %1939  ;;  %v1203_v56 = vor.u32 %v1202_v7, %v1198_v31  ;;  %v948_v60 = vld [vmem:[#allocation2 + $0x60] sm:$0xf]  ;;  %v1417_v14 = vrot.slane %v8639_v30, 1 }
  0xcd   : > { %7506 = vmatprep.subr.bf16.mxu0 %v7788_v6  ;;  %v3050_v51 = vsel %vm1397_vm9, %v3048_v25, %v10788_v18  ;;  %v1420_v16 = vrot.slane %v8659_v49, 1  ;;  %v2841_v43 = vrot.slane %v2839_v27, 1  ;;  %v2851_v15 = vshll.u32 %v8696_v58, 16  ;;  %v950_v25 = vld [vmem:[#allocation2 + $0x6c] sm:$0xf] }
  0xce   : > { %v1215_v45 = vor.u32 %v1214_v17, %v1210_v61  ;;  %v8717_v18 = vld [vmem:[#allocation2 + $0x70] sm:$0xf]  ;;  %v2100_v9 = vsel %vm1478_vm12, %v8188_v52, %v1940_v48  ;;  %v1419_v30 = vrot.slane %v6806_v41, 1  ;;  %v2856_v61 = vshll.u32 %v8704_v28, 16  ;;  %v2626_v17 = vld [vmem:[#allocation2 + $0x60] sm:$0xe] }
  0xcf   : > { %2964 = vrot.lane.b32.xlu0 %v2823_v33, %s7971_s25  ;;  %v8710_v33 = vld [vmem:[#allocation2 + $0x64] sm:$0xf]  ;;  %v2627_v27 = vld [vmem:[#allocation2 + $0x6c] sm:$0xe]  ;;  %v8736_v41 = vcombine.low %v950_v25, %v8717_v18  ;;  %v2853_v48 = vrot.slane %v2851_v15, 1 }
  0xd0   : > { %1456 = vrot.lane.b32.xlu1 %v1415_v10, %s7970_s24  ;;  %v6805_v10 = vcombine.low %v986_v20, %v8614_v53  ;;  %v1219_v53 = vrot.slane %v1217_v62, 1  ;;  %v2837_v20 = vshrl.u32 %v8671_v11, 16  ;;  %v1938_v26 = vpop.permute.xlu1 %1937  ;;  %7507 = vmatpush3.bf16.msra.mxu0 %v7788_v6  ;;  %v8723_v49 = vcombine.low %v948_v60, %v8710_v33  ;;  %v2588_v25 = vld [vmem:[#allocation2 + $0x78] sm:$0xf]  ;;  %v988_v15 = vld [vmem:[#allocation2 + $0x60] sm:$0xe] }
  0xd1   : > { %v2098_v7 = vsel %vm1478_vm12, %v8182_v42, %v1938_v26  ;;  %v2846_v62 = vrot.slane %v2844_v35, 1  ;;  %v2849_v6 = vshrl.u32 %v8696_v58, 16  ;;  %v2132_v42 = vsel %vm1511_vm13, %v2100_v9, %v8564_v47  ;;  %v8749_v26 = vld [vmem:[#allocation2 + $0x7c] sm:$0xf]  ;;  %v1944_v47 = vpop.permute.xlu0 %1943 }
  0xd2   : > { %v1416_v31 = vrot.slane %v6805_v10, 1  ;;  %v2130_v52 = vsel %vm1511_vm13, %v2098_v7, %v8618_v37  ;;  %v8733_v10 = vld [vmem:[#allocation2 + $0x68] ss:$0 sps:$4 sm:$0x11]   ;;  %v2842_v35 = vor.u32 %v2841_v43, %v2837_v20  ;;  %v1224_v60 = vshll.u32 %v8723_v49, 16 }
  0xd3   : > { %3092 = vrot.lane.b32.xlu0 %v3050_v51, %s7970_s24  ;;  %7441 = vmatmul.mubr.msk.bf16.gmra.mxu0 %vm2168_vm14, %v2130_v52  ;;  %v8742_v37 = vld [vmem:[#allocation2 + $0x74] ss:$0 sps:$4 sm:$0x11]   ;;  %v6940_v43 = vcombine.low %v2626_v17, %v8651_v22  ;;  %v3055_v20 = vrot.slane %v8661_v19, 1  ;;  %v1236_v9 = vshll.u32 %v8736_v41, 16  ;;  %v2854_v22 = vor.u32 %v2853_v48, %v2849_v6 }
  0xd4   : > { %2966 = vrot.lane.b32.xlu1 %v2835_v29, %s7971_s25  ;;  %v1208_v29 = vsel %vm1124_vm10, %v1203_v56, %v1207_v36  ;;  %v1220_v36 = vsel %vm1124_vm10, %v1215_v45, %v1219_v53  ;;  %v1942_v51 = vpop.permute.xlu1 %1941  ;;  %7444 = vmatprep.mubr.msk.bf16.mxu0 %vm2168_vm14, %v2132_v42  ;;  %v1421_v56 = vsel %vm1397_vm9, %v1419_v30, %v1420_v16  ;;  %v2858_v53 = vrot.slane %v2856_v61, 1 }
  0xd5   : > { %v6941_v45 = vcombine.low %v2627_v27, %v8680_v13  ;;  %v1229_v16 = vshll.u32 %v8733_v10, 16  ;;  %v2102_v30 = vsel %vm1478_vm12, %v8200_v8, %v1942_v51  ;;  %v2847_v7 = vsel %vm1124_vm10, %v2842_v35, %v2846_v62  ;;  %v2590_v13 = vld [vmem:[#allocation2 + $0x84] sm:$0xf] }
  0xd6   : > { %v8762_v19 = vcombine.low %v2588_v25, %v8749_v26  ;;  %v1222_v61 = vshrl.u32 %v8723_v49, 16  ;;  %v1226_v17 = vrot.slane %v1224_v60, 1  ;;  %v1241_v52 = vshll.u32 %v8742_v37, 16  ;;  %v8785_v60 = vld [vmem:[#allocation2 + $0x80] ss:$0 sps:$4 sm:$0x11]  }
  0xd7   : > { %1329 = vrot.lane.b32.xlu0 %v1208_v29, %s7971_s25  ;;  %v8764_v29 = vld [vmem:[#allocation2 + $0x88] sm:$0xf]  ;;  %v6807_v8 = vcombine.low %v988_v15, %v8710_v33  ;;  %v3054_v62 = vrot.slane %v6940_v43, 1  ;;  %v3057_v6 = vrot.slane %v6941_v45, 1  ;;  %v1234_v27 = vshrl.u32 %v8736_v41, 16 }
  0xd8   : > { %3094 = vrot.lane.b32.xlu1 %v3053_v32, %s7970_s24  ;;  %v1418_v32 = vsel %vm1397_vm9, %v1416_v31, %v1417_v14  ;;  %v3058_v14 = vrot.slane %v8704_v28, 1  ;;  %v989_v31 = vld [vmem:[#allocation2 + $0x6c] sm:$0xe]  ;;  %v2104_v28 = vsel %vm1478_vm12, %v8191_v2, %v1944_v47  ;;  %v2134_v42 = vsel %vm1511_vm13, %v2102_v30, %v8655_v55  ;;  %v2628_v45 = vld [vmem:[#allocation2 + $0x78] sm:$0xe] }
  0xd9   : > { %v6808_v2 = vcombine.low %v989_v31, %v8717_v18  ;;  %v8778_v35 = vcombine.low %v2590_v13, %v8764_v29  ;;  %v2136_v33 = vsel %vm1511_vm13, %v2104_v28, %v8592_v5  ;;  %v2859_v48 = vsel %vm1124_vm10, %v2854_v22, %v2858_v53  ;;  %v8791_v5 = vld [vmem:[#allocation2 + $0x8c] ss:$0 sps:$4 sm:$0x11]   ;;  %v2629_v15 = vld [vmem:[#allocation2 + $0x84] sm:$0xe] }
  0xda   : > { %v1231_v51 = vrot.slane %v1229_v16, 1  ;;  %v2863_v55 = vshll.u32 %v8762_v19, 16  ;;  %v1227_v18 = vor.u32 %v1226_v17, %v1222_v61  ;;  %v1243_v25 = vrot.slane %v1241_v52, 1  ;;  %v8799_v22 = vld [vmem:[#allocation2 + $0x7c] sm:$0xf] }
  0xdb   : > { %1458 = vrot.lane.b32.xlu0 %v1418_v32, %s7970_s24  ;;  %7445 = vmatmul.mubr.msk.bf16.gmra.mxu0 %vm2168_vm14, %v2134_v42  ;;  %v1423_v32 = vrot.slane %v8733_v10, 1  ;;  %v1422_v47 = vrot.slane %v6807_v8, 1  ;;  %v1426_v43 = vrot.slane %v8742_v37, 1  ;;  %v3056_v53 = vsel %vm1397_vm9, %v3054_v62, %v3055_v20  ;;  %v954_v52 = vld [vmem:[#allocation2 + $0x84] sm:$0xf] }
  0xdc   : > { %1331 = vrot.lane.b32.xlu1 %v1220_v36, %s7971_s25  ;;  %v1238_v36 = vrot.slane %v1236_v9, 1  ;;  %7448 = vmatprep.mubr.msk.bf16.mxu0 %vm2168_vm14, %v2136_v33  ;;  %v3059_v10 = vsel %vm1397_vm9, %v3057_v6, %v3058_v14  ;;  %v1425_v9 = vrot.slane %v6808_v2, 1  ;;  %v2875_v31 = vshll.u32 %v8778_v35, 16  ;;  %v8825_v33 = vld [vmem:[#allocation2 + $0x8c] ss:$0 sps:$4 sm:$0x11]  }
  0xdd   : > { %v2861_v37 = vshrl.u32 %v8762_v19, 16  ;;  %v2865_v13 = vrot.slane %v2863_v55, 1  ;;  %v2868_v20 = vshll.u32 %v8785_v60, 16  ;;  %v3061_v14 = vrot.slane %v8785_v60, 1 }
  0xde   : > { %v1239_v16 = vor.u32 %v1238_v36, %v1234_v27  ;;  %v1232_v28 = vsel %vm1124_vm10, %v1227_v18, %v1231_v51  ;;  %v6942_v61 = vcombine.low %v2628_v45, %v8749_v26  ;;  %v6943_v17 = vcombine.low %v2629_v15, %v8764_v29  ;;  %v8818_v36 = vld [vmem:[#allocation2 + $0x80] ss:$0 sps:$4 sm:$0x11]   ;;  %v2592_v18 = vld [vmem:[#allocation2 + $0x90] sm:$0xf] }
  0xdf   : > { %2968 = vrot.lane.b32.xlu0 %v2847_v7, %s7971_s25  ;;  %v952_v7 = vld [vmem:[#allocation2 + $0x78] sm:$0xf]  ;;  %v2873_v8 = vshrl.u32 %v8778_v35, 16  ;;  %v2880_v62 = vshll.u32 %v8791_v5, 16  ;;  %v2877_v42 = vrot.slane %v2875_v31, 1  ;;  %v2870_v29 = vrot.slane %v2868_v20, 1 }
  0xe0   : > { %1460 = vrot.lane.b32.xlu1 %v1421_v56, %s7970_s24  ;;  %v1946_v56 = vpop.permute.xlu1 %1945  ;;  %v8813_v6 = vcombine.low %v952_v7, %v8799_v22  ;;  %v1244_v26 = vsel %vm1124_vm10, %v1239_v16, %v1243_v25  ;;  %v3060_v51 = vrot.slane %v6942_v61, 1  ;;  %v3064_v25 = vrot.slane %v8791_v5, 1  ;;  %v8832_v15 = vld [vmem:[#allocation2 + $0x94] sm:$0xf]  ;;  %v2594_v61 = vld [vmem:[#allocation2 + $0x9c] sm:$0xf] }
  0xe1   : > { %v2106_v30 = vsel %vm1478_vm12, %v8221_v50, %v1946_v56  ;;  %v8808_v50 = vld [vmem:[#allocation2 + $0x88] sm:$0xf]  ;;  %v990_v56 = vld [vmem:[#allocation2 + $0x78] sm:$0xe]  ;;  %v2878_v16 = vor.u32 %v2877_v42, %v2873_v8  ;;  %v2882_v31 = vrot.slane %v2880_v62, 1  ;;  %v1429_v5 = vrot.slane %v8818_v36, 1 }
  0xe2   : > { %v2138_v27 = vsel %vm1511_vm13, %v2106_v30, %v8698_v54  ;;  %v8823_v2 = vcombine.low %v954_v52, %v8808_v50  ;;  %v3063_v54 = vrot.slane %v6943_v17, 1  ;;  %v1248_v45 = vshll.u32 %v8813_v6, 16 }
  0xe3   : > { %3096 = vrot.lane.b32.xlu0 %v3056_v53, %s7970_s24  ;;  %7449 = vmatmul.mubr.msk.bf16.gmra.mxu0 %vm2168_vm14, %v2138_v27  ;;  %v1948_v55 = vpop.permute.xlu0 %1947  ;;  %v1424_v53 = vsel %vm1397_vm9, %v1422_v47, %v1423_v32  ;;  %v1253_v30 = vshll.u32 %v8818_v36, 16  ;;  %v1265_v32 = vshll.u32 %v8825_v33, 16  ;;  %v1246_v17 = vshrl.u32 %v8813_v6, 16 }
  0xe4   : > { %2970 = vrot.lane.b32.xlu1 %v2859_v48, %s7971_s25  ;;  %v2866_v48 = vor.u32 %v2865_v13, %v2861_v37  ;;  %v2108_v7 = vsel %vm1478_vm12, %v8293_v57, %v1948_v55  ;;  %v1260_v37 = vshll.u32 %v8823_v2, 16  ;;  %v8847_v57 = vld [vmem:[#allocation2 + $0xa0] sm:$0xf]  ;;  %v1250_v52 = vrot.slane %v1248_v45, 1 }
  0xe5   : > { %v2883_v62 = vsel %vm1124_vm10, %v2878_v16, %v2882_v31  ;;  %v1255_v27 = vrot.slane %v1253_v30, 1  ;;  %v1258_v42 = vshrl.u32 %v8823_v2, 16  ;;  %v956_v16 = vld [vmem:[#allocation2 + $0x90] sm:$0xf]  ;;  %v3062_v31 = vsel %vm1397_vm9, %v3060_v51, %v3061_v14 }
  0xe6   : > { %v2871_v13 = vsel %vm1124_vm10, %v2866_v48, %v2870_v29  ;;  %v1262_v29 = vrot.slane %v1260_v37, 1  ;;  %v1267_v48 = vrot.slane %v1265_v32, 1  ;;  %v1251_v30 = vor.u32 %v1250_v52, %v1246_v17  ;;  %v7798_v37 = vld [vmem:[%s10743_s1 + $0x8] ss:$0 sps:$4 sm:$0xff]  }
  0xe7   : > { %1333 = vrot.lane.b32.xlu0 %v1232_v28, %s7971_s25  ;;  %v1950_v47 = vpop.permute.xlu1 %1949  ;;  %v2076_v20 = vpop.permute.xlu0 %2075  ;;  %v8845_v28 = vcombine.low %v2592_v18, %v8832_v15  ;;  %v7802_v18 = vld [vmem:[%s10743_s1] sm:$0xff]   ;;  %v3065_v14 = vsel %vm1397_vm9, %v3063_v54, %v3064_v25  ;;  %7649 = vmatprep.subr.msk.bf16.mxu1 %vm2201_vm11, %v7798_v37 }
  0xe8   : > { %3098 = vrot.lane.b32.xlu1 %v3059_v10, %s7970_s24  ;;  %v1427_v10 = vsel %vm1397_vm9, %v1425_v9, %v1426_v43  ;;  %v6809_v43 = vcombine.low %v990_v56, %v8799_v22  ;;  %v991_v9 = vld [vmem:[#allocation2 + $0x84] sm:$0xe]  ;;  %v2110_v22 = vsel %vm1478_vm12, %v8302_v12, %v1950_v47  ;;  %v2140_v8 = vsel %vm1511_vm13, %v2108_v7, %v2076_v20  ;;  %v8874_v7 = vld [vmem:[#allocation2 + $0x94] sm:$0xf]  ;;  %v8895_v54 = vld [vmem:[#allocation2 + $0xa0] sm:$0xf] }
  0xe9   : > { %v6810_v36 = vcombine.low %v991_v9, %v8808_v50  ;;  %7452 = vmatprep.mubr.msk.bf16.mxu0 %vm2168_vm14, %v2140_v8  ;;  %v8861_v12 = vcombine.low %v2594_v61, %v8847_v57  ;;  %v2887_v50 = vshll.u32 %v8845_v28, 16  ;;  %v1432_v47 = vrot.slane %v8825_v33, 1 }
  0xea   : > { %v1428_v55 = vrot.slane %v6809_v43, 1  ;;  %v1263_v51 = vor.u32 %v1262_v29, %v1258_v42  ;;  %v2408_v20 = vsel %vm2201_vm11, %v7798_v37, 0  ;;  %v2885_v61 = vshrl.u32 %v8845_v28, 16 }
  0xeb   : > { %1462 = vrot.lane.b32.xlu0 %v1424_v53, %s7970_s24  ;;  %v2078_v56 = vpop.permute.xlu1 %2077  ;;  %v1431_v32 = vrot.slane %v6810_v36, 1  ;;  %v2899_v9 = vshll.u32 %v8861_v12, 16  ;;  %v8893_v52 = vcombine.low %v956_v16, %v8874_v7  ;;  %7469 = vmatpush3.bf16.msra.mxu1 %v2408_v20  ;;  %v1256_v25 = vsel %vm1124_vm10, %v1251_v30, %v1255_v27 }
  0xec   : > { %1335 = vrot.lane.b32.xlu1 %v1244_v26, %s7971_s25  ;;  %v8857_v26 = vld [vmem:[#allocation2 + $0x98] ss:$0 sps:$4 sm:$0x11]   ;;  %v2142_v53 = vsel %vm1511_vm13, %v2110_v22, %v2078_v56  ;;  %v1952_v45 = vpop.permute.xlu0 %1951  ;;  %v2889_v22 = vrot.slane %v2887_v50, 1  ;;  %7470 = vmatprep.subr.bf16.mxu1 %v7802_v18  ;;  %v1430_v42 = vsel %vm1397_vm9, %v1428_v55, %v1429_v5  ;;  %v2631_v56 = vld [vmem:[#allocation2 + $0x9c] sm:$0xe] }
  0xed   : > { %7453 = vmatmul.mubr.msk.bf16.gmra.mxu0 %vm2168_vm14, %v2142_v53  ;;  %v2892_v43 = vshll.u32 %v8857_v26, 16  ;;  %v2112_v60 = vsel %vm1478_vm12, %v8319_v44, %v1952_v45  ;;  %v958_v44 = vld [vmem:[#allocation2 + $0x9c] sm:$0xf]  ;;  %v3067_v29 = vrot.slane %v8857_v26, 1  ;;  %v1268_v53 = vsel %vm1124_vm10, %v1263_v51, %v1267_v48  ;;  %v992_v51 = vld [vmem:[#allocation2 + $0x90] sm:$0xe] }
  0xee   : > { %v2897_v27 = vshrl.u32 %v8861_v12, 16  ;;  %v2901_v50 = vrot.slane %v2899_v9, 1  ;;  %v8908_v16 = vcombine.low %v958_v44, %v8895_v54  ;;  %v1272_v26 = vshll.u32 %v8893_v52, 16  ;;  %v345_v9 = vld [vmem:[#allocation2 + $0xd4] sm:$0x1] }
  0xef   : > { %2972 = vrot.lane.b32.xlu0 %v2871_v13, %s7971_s25  ;;  %v2630_v13 = vld [vmem:[#allocation2 + $0x90] sm:$0xe]  ;;  %v2894_v36 = vrot.slane %v2892_v43, 1  ;;  %7471 = vmatpush3.bf16.msra.mxu1 %v7802_v18  ;;  %v2890_v30 = vor.u32 %v2889_v22, %v2885_v61  ;;  %v6945_v37 = vcombine.low %v2631_v56, %v8847_v57  ;;  %v1433_v18 = vsel %vm1397_vm9, %v1431_v32, %v1432_v47  ;;  %v2598_v61 = vld [vmem:[#allocation2 + $0xb4] sm:$0xf] }
  0xf0   : > { %1464 = vrot.lane.b32.xlu1 %v1427_v10, %s7970_s24  ;;  %v8869_v10 = vld [vmem:[#allocation2 + $0xa4] ss:$0 sps:$4 sm:$0x11]   ;;  %v2080_v17 = vpop.permute.xlu0 %2079  ;;  %v6944_v5 = vcombine.low %v2630_v13, %v8832_v15  ;;  %v8921_v15 = vld [vmem:[#allocation2 + $0xac] sm:$0xf]  ;;  %v2902_v13 = vor.u32 %v2901_v50, %v2897_v27  ;;  %v1284_v57 = vshll.u32 %v8908_v16, 16 }
  0xf1   : > { %v2904_v33 = vshll.u32 %v8869_v10, 16  ;;  %v2144_v8 = vsel %vm1511_vm13, %v2112_v60, %v2080_v17  ;;  %v3070_v55 = vrot.slane %v8869_v10, 1  ;;  %v8918_v60 = vld [vmem:[#allocation2 + $0xa4] ss:$0 sps:$4 sm:$0x11]   ;;  %v1274_v44 = vrot.slane %v1272_v26, 1 }
  0xf2   : > { %7456 = vmatprep.mubr.msk.bf16.mxu0 %vm2168_vm14, %v2144_v8  ;;  %v289_v10 = vld [vmem:[#allocation2 + $0xcc] sm:$0x1]  ;;  %v346_v32 = vsel %vm8023_vm4, 0, %v345_v9  ;;  %v2895_v47 = vsel %vm1124_vm10, %v2890_v30, %v2894_v36  ;;  %v3066_v22 = vrot.slane %v6944_v5, 1  ;;  %v3069_v8 = vrot.slane %v6945_v37, 1 }
  0xf3   : > { %3100 = vrot.lane.b32.xlu0 %v3062_v31, %s7970_s24  ;;  %v2906_v31 = vrot.slane %v2904_v33, 1  ;;  %v8926_v33 = vld [vmem:[#allocation2 + $0xb8] sm:$0xf]  ;;  %347 = vst [vmem:[#allocation2 + $0xd4] sm:$0x1] %v346_v32  ;;  %v1282_v36 = vshrl.u32 %v8908_v16, 16  ;;  %v6811_v5 = vcombine.low %v992_v51, %v8874_v7 }
  0xf4   : > { %2974 = vrot.lane.b32.xlu1 %v2883_v62, %s7971_s25  ;;  %v8899_v62 = vld [vmem:[#allocation2 + $0x98] ss:$0 sps:$4 sm:$0x11]   ;;  %v1954_v45 = vpop.permute.xlu1 %1953  ;;  %v8942_v27 = vcombine.low %v2598_v61, %v8926_v33  ;;  %v8947_v26 = vld [vmem:[#allocation2 + $0xb0] ss:$0 sps:$4 sm:$0x11]  }
  0xf5   : > { %v2114_v48 = vsel %vm1478_vm12, %v8335_v23, %v1954_v45  ;;  %v1277_v43 = vshll.u32 %v8899_v62, 16  ;;  %v1270_v23 = vshrl.u32 %v8893_v52, 16  ;;  %v2907_v50 = vsel %vm1124_vm10, %v2902_v13, %v2906_v31  ;;  %v993_v37 = vld [vmem:[#allocation2 + $0x9c] sm:$0xe]  ;;  %v960_v13 = vld [vmem:[#allocation2 + $0xa8] sm:$0xf] }
  0xf6   : > { %v1286_v45 = vrot.slane %v1284_v57, 1  ;;  %v8953_v9 = vld [vmem:[#allocation2 + $0xbc] ss:$0 sps:$4 sm:$0x11]   ;;  %v3071_v31 = vsel %vm1397_vm9, %v3069_v8, %v3070_v55  ;;  %v2916_v32 = vshll.u32 %v8947_v26, 16  ;;  %v2921_v8 = vshrl.u32 %v8942_v27, 16 }
  0xf7   : > { %1337 = vrot.lane.b32.xlu0 %v1256_v25, %s7971_s25  ;;  %v290_v25 = vsel %vm8013_vm2, 0, %v289_v10  ;;  %v1275_v30 = vor.u32 %v1274_v44, %v1270_v23  ;;  %v1434_v23 = vrot.slane %v6811_v5, 1  ;;  %v8966_v44 = vld [vmem:[#allocation2 + $0xb8] sm:$0xf]  ;;  %v2633_v5 = vld [vmem:[#allocation2 + $0xb4] sm:$0xe] }
  0xf8   : > { %3102 = vrot.lane.b32.xlu1 %v3065_v14, %s7970_s24  ;;  %v2596_v14 = vld [vmem:[#allocation2 + $0xa8] sm:$0xf]  ;;  %v2082_v20 = vpop.permute.xlu1 %2081  ;;  %291 = vst [vmem:[#allocation2 + $0xcc] sm:$0x1] %v290_v25 }
  0xf9   : > { %v2146_v17 = vsel %vm1511_vm13, %v2114_v48, %v2082_v20  ;;  %v8936_v56 = vcombine.low %v2596_v14, %v8921_v15  ;;  %v1435_v14 = vrot.slane %v8899_v62, 1  ;;  %v8960_v20 = vld [vmem:[#allocation2 + $0xac] sm:$0xf]  ;;  %v6812_v62 = vcombine.low %v993_v37, %v8895_v54 }
  0xfa   : > { %7457 = vmatmul.mubr.msk.bf16.gmra.mxu0 %vm2168_vm14, %v2146_v17  ;;  %v962_v17 = vld [vmem:[#allocation2 + $0xb4] sm:$0xf] }
  0xfb   : > { %1466 = vrot.lane.b32.xlu0 %v1430_v42, %s7970_s24  ;;  %v1279_v42 = vrot.slane %v1277_v43, 1  ;;  %v3068_v43 = vsel %vm1397_vm9, %v3066_v22, %v3067_v29  ;;  %v2911_v10 = vshll.u32 %v8936_v56, 16  ;;  %v1287_v29 = vor.u32 %v1286_v45, %v1282_v36 }
  0xfc   : > { %1339 = vrot.lane.b32.xlu1 %v1268_v53, %s7971_s25  ;;  %v1289_v53 = vshll.u32 %v8918_v60, 16  ;;  %v2909_v57 = vshrl.u32 %v8936_v56, 16  ;;  %v8971_v22 = vcombine.low %v960_v13, %v8960_v20  ;;  %v1437_v36 = vrot.slane %v6812_v62, 1  ;;  %v2600_v62 = vld [vmem:[#allocation2 + $0xc0] sm:$0xf] }
  0xfd   : > { %v1280_v61 = vsel %vm1124_vm10, %v1275_v30, %v1279_v42  ;;  %v2913_v25 = vrot.slane %v2911_v10, 1  ;;  %v2928_v42 = vshll.u32 %v8953_v9, 16  ;;  %v1438_v45 = vrot.slane %v8918_v60, 1 }
  0xfe   : > { %v1956_v48 = vpop.permute.xlu0 %1955  ;;  %v1291_v7 = vrot.slane %v1289_v53, 1  ;;  %v8980_v30 = vcombine.low %v962_v17, %v8966_v44  ;;  %v1436_v10 = vsel %vm1397_vm9, %v1434_v23, %v1435_v14  ;;  %v3073_v14 = vrot.slane %v8947_v26, 1  ;;  %v8997_v23 = vld [vmem:[#allocation2 + $0xbc] ss:$0 sps:$4 sm:$0x11]  }
  0xff   : > { %2976 = vrot.lane.b32.xlu0 %v2895_v47, %s7971_s25  ;;  %v2116_v51 = vsel %vm1478_vm12, %v8373_v24, %v1956_v48  ;;  %v2632_v47 = vld [vmem:[#allocation2 + $0xa8] sm:$0xe]  ;;  %v2930_v13 = vrot.slane %v2928_v42, 1 }
 0x100   : > { %1468 = vrot.lane.b32.xlu1 %v1433_v18, %s7970_s24  ;;  %v2923_v18 = vshll.u32 %v8942_v27, 16  ;;  %v6946_v37 = vcombine.low %v2632_v47, %v8921_v15  ;;  %v994_v26 = vld [vmem:[#allocation2 + $0xa8] sm:$0xe] }
 0x102   : > { %v2084_v55 = vpop.permute.xlu0 %2083  ;;  %v2925_v53 = vrot.slane %v2923_v18, 1 }
 0x103   : > { %3104 = vrot.lane.b32.xlu0 %v3068_v43, %s7970_s24  ;;  %v2148_v24 = vsel %vm1511_vm13, %v2116_v51, %v2084_v55  ;;  %v8986_v43 = vld [vmem:[#allocation2 + $0xb0] ss:$0 sps:$4 sm:$0x11]   ;;  %v1296_v51 = vshll.u32 %v8971_v22, 16  ;;  %v3072_v55 = vrot.slane %v6946_v37, 1 }
 0x104   : > { %2978 = vrot.lane.b32.xlu1 %v2907_v50, %s7971_s25  ;;  %v1958_v54 = vpop.permute.xlu1 %1957  ;;  %7460 = vmatprep.mubr.msk.bf16.mxu0 %vm2168_vm14, %v2148_v24  ;;  %v1292_v50 = vsel %vm1124_vm10, %v1287_v29, %v1291_v7  ;;  %v2918_v7 = vrot.slane %v2916_v32, 1  ;;  %v2926_v18 = vor.u32 %v2925_v53, %v2921_v8  ;;  %v6947_v29 = vcombine.low %v2633_v5, %v8926_v33  ;;  %v2602_v33 = vld [vmem:[#allocation2 + $0xcc] sm:$0xf]  ;;  %v9003_v24 = vld [vmem:[#allocation2 + $0xd0] sm:$0xf] }
 0x105   : > { %v2118_v48 = vsel %vm1478_vm12, %v8389_v3, %v1958_v54  ;;  %v1439_v3 = vsel %vm1397_vm9, %v1437_v36, %v1438_v45  ;;  %v1301_v17 = vshll.u32 %v8986_v43, 16  ;;  %v1294_v32 = vshrl.u32 %v8971_v22, 16 }
 0x106   : > { %v1298_v47 = vrot.slane %v1296_v51, 1  ;;  %v2931_v8 = vsel %vm1124_vm10, %v2926_v18, %v2930_v13  ;;  %v3075_v42 = vrot.slane %v6947_v29, 1  ;;  %v1306_v36 = vshrl.u32 %v8980_v30, 16 }
 0x107   : > { %1341 = vrot.lane.b32.xlu0 %v1280_v61, %s7971_s25  ;;  %v8992_v61 = vld [vmem:[#allocation2 + $0xc4] sm:$0xf]  ;;  %v1313_v5 = vshll.u32 %v8997_v23, 16  ;;  %v9016_v37 = vcombine.low %v2602_v33, %v9003_v24 }
 0x108   : > { %3106 = vrot.lane.b32.xlu1 %v3071_v31, %s7970_s24  ;;  %v2914_v31 = vor.u32 %v2913_v25, %v2909_v57  ;;  %v2086_v60 = vpop.permute.xlu1 %2085  ;;  %v1308_v57 = vshll.u32 %v8980_v30, 16  ;;  %v9008_v54 = vcombine.low %v2600_v62, %v8992_v61  ;;  %v1299_v51 = vor.u32 %v1298_v47, %v1294_v32 }
 0x109   : > { %v2150_v15 = vsel %vm1511_vm13, %v2118_v48, %v2086_v60  ;;  %v995_v48 = vld [vmem:[#allocation2 + $0xb4] sm:$0xe]  ;;  %v9023_v60 = vld [vmem:[#allocation2 + $0xc8] ss:$0 sps:$4 sm:$0x11]  }
 0x10a   : > { %7461 = vmatmul.mubr.msk.bf16.gmra.mxu0 %vm2168_vm14, %v2150_v15  ;;  %v2919_v25 = vsel %vm1124_vm10, %v2914_v31, %v2918_v7  ;;  %v1310_v45 = vrot.slane %v1308_v57, 1  ;;  %v6813_v31 = vcombine.low %v994_v26, %v8960_v20  ;;  %v3074_v7 = vsel %vm1397_vm9, %v3072_v55, %v3073_v14  ;;  %v7807_v20 = vld [vmem:[#allocation2 + $0xd4] ss:$0 sps:$4 sm:$0x11]  }
 0x10b   : > { %1470 = vrot.lane.b32.xlu0 %v1436_v10, %s7970_s24  ;;  %v2935_v18 = vshll.u32 %v9008_v54, 16  ;;  %v6814_v62 = vcombine.low %v995_v48, %v8966_v44  ;;  %v1315_v15 = vrot.slane %v1313_v5, 1  ;;  %v2947_v14 = vshll.u32 %v9016_v37, 16  ;;  %v2635_v48 = vld [vmem:[#allocation2 + $0xcc] sm:$0xe] }
 0x10c   : > { %1343 = vrot.lane.b32.xlu1 %v1292_v50, %s7971_s25  ;;  %v3076_v50 = vrot.slane %v8953_v9, 1  ;;  %v1303_v9 = vrot.slane %v1301_v17, 1  ;;  %v1440_v55 = vrot.slane %v6813_v31, 1  ;;  %v1441_v17 = vrot.slane %v8986_v43, 1 }
 0x10d   : > { %v2937_v44 = vrot.slane %v2935_v18, 1  ;;  %v2940_v32 = vshll.u32 %v9023_v60, 16  ;;  %v1443_v26 = vrot.slane %v6814_v62, 1 }
 0x10e   : > { %v1960_v53 = vpop.permute.xlu0 %1959  ;;  %v3077_v13 = vsel %vm1397_vm9, %v3075_v42, %v3076_v50  ;;  %v1304_v33 = vsel %vm1124_vm10, %v1299_v51, %v1303_v9  ;;  %v2945_v42 = vshrl.u32 %v9016_v37, 16  ;;  %v2949_v50 = vrot.slane %v2947_v14, 1 }
 0x10f   : > { %2980 = vrot.lane.b32.xlu0 %v2919_v25, %s7971_s25  ;;  %v2120_v10 = vsel %vm1478_vm12, %v8419_v39, %v1960_v53  ;;  %v1311_v39 = vor.u32 %v1310_v45, %v1306_v36  ;;  %v2933_v25 = vshrl.u32 %v9008_v54, 16  ;;  %v2634_v53 = vld [vmem:[#allocation2 + $0xc0] sm:$0xe]  ;;  %v2952_v36 = vshll.u32 %v7807_v20, 16 }
 0x110   : > { %1472 = vrot.lane.b32.xlu1 %v1439_v3, %s7970_s24  ;;  %v1442_v5 = vsel %vm1397_vm9, %v1440_v55, %v1441_v17  ;;  %v2942_v31 = vrot.slane %v2940_v32, 1  ;;  %v2950_v9 = vor.u32 %v2949_v50, %v2945_v42 }
 0x111   : > { %v1316_v43 = vsel %vm1124_vm10, %v1311_v39, %v1315_v15  ;;  %v2954_v18 = vrot.slane %v2952_v36, 1  ;;  %v3079_v39 = vrot.slane %v9023_v60, 1 }
 0x112   : > { %v2088_v29 = vpop.permute.xlu0 %2087 }
 0x113   : > { %v2152_v3 = vsel %vm1511_vm13, %v2120_v10, %v2088_v29  ;;  %3108 = vrot.lane.b32.xlu0 %v3074_v7, %s7970_s24  ;;  %v2938_v10 = vor.u32 %v2937_v44, %v2933_v25  ;;  %v6948_v7 = vcombine.low %v2634_v53, %v8992_v61 }
 0x114   : > { %2982 = vrot.lane.b32.xlu1 %v2931_v8, %s7971_s25  ;;  %7464 = vmatprep.mubr.msk.bf16.mxu0 %vm2168_vm14, %v2152_v3  ;;  %v1444_v8 = vrot.slane %v8997_v23, 1 }
 0x115   : > { %v2943_v3 = vsel %vm1124_vm10, %v2938_v10, %v2942_v31  ;;  %v3078_v61 = vrot.slane %v6948_v7, 1 }
 0x116   : > { %v1962_v57 = vpop.permute.xlu1 %1961  ;;  %v1445_v51 = vsel %vm1397_vm9, %v1443_v26, %v1444_v8 }
 0x117   : > { %v2122_v47 = vsel %vm1478_vm12, %v8437_v63, %v1962_v57  ;;  %1345 = vrot.lane.b32.xlu0 %v1304_v33, %s7971_s25  ;;  %v3080_v60 = vsel %vm1397_vm9, %v3078_v61, %v3079_v39 }
 0x118   : > { %3110 = vrot.lane.b32.xlu1 %v3077_v13, %s7970_s24  ;;  %v6949_v13 = vcombine.low %v2635_v48, %v9003_v24  ;;  %v2955_v24 = vsel %vm1124_vm10, %v2950_v9, %v2954_v18 }
 0x119   : > { %v1318_v23 = vpop.permute.xlu0 %1317 }
 0x11a   : > { %v2090_v45 = vpop.permute.xlu1 %2089  ;;  %v1480_v29 = vsel %vm1478_vm12, %v8459_v46, %v1318_v23  ;;  %v3081_v55 = vrot.slane %v6949_v13, 1  ;;  %v3082_v46 = vrot.slane %v7807_v20, 1  ;;  %v10791_v13 = vld [vmem:[#allocation8_spill] sm:$0xff] }
 0x11b   : > { %v2154_v63 = vsel %vm1511_vm13, %v2122_v47, %v2090_v45  ;;  %1474 = vrot.lane.b32.xlu0 %v1442_v5, %s7970_s24 }
 0x11c   : > { %1347 = vrot.lane.b32.xlu1 %v1316_v43, %s7971_s25  ;;  %7465 = vmatmul.mubr.msk.bf16.gmra.mxu0 %vm2168_vm14, %v2154_v63  ;;  %v3083_v25 = vsel %vm1397_vm9, %v3081_v55, %v3082_v46  ;;  %v10789_v63 = vld [vmem:[#allocation6_spill] sm:$0xff] }
 0x11d   : > { %v1447_v14 = vpop.permute.xlu0 %1446  ;;  %v10793_v55 = vld [vmem:[#allocation10_spill] sm:$0xff] }
 0x11e   : > { %v1320_v62 = vpop.permute.xlu1 %1319  ;;  %v1513_v57 = vsel %vm1511_vm13, %v1480_v29, %v1447_v14 }
 0x11f   : > { %v1482_v15 = vsel %vm1478_vm12, %v8432_v59, %v1320_v62  ;;  %2984 = vrot.lane.b32.xlu0 %v2943_v3, %s7971_s25  ;;  %7472 = vmatprep.mubr.msk.bf16.mxu1 %vm2168_vm14, %v1513_v57  ;;  %v10792_v3 = vld [vmem:[#allocation9_spill] sm:$0xff] }
 0x120   : > { %1476 = vrot.lane.b32.xlu1 %v1445_v51, %s7970_s24 }
 0x121   : > { %v2957_v59 = vpop.permute.xlu0 %2956 }
 0x122   : > { %v1449_v17 = vpop.permute.xlu1 %1448  ;;  %v3117_v44 = vsel %vm1478_vm12, %v8450_v21, %v2957_v59 }
 0x123   : > { %v1515_v33 = vsel %vm1511_vm13, %v1482_v15, %v1449_v17  ;;  %3112 = vrot.lane.b32.xlu0 %v3080_v60, %s7970_s24 }
 0x124   : > { %2986 = vrot.lane.b32.xlu1 %v2955_v24, %s7971_s25  ;;  %7473 = vmatmul.mubr.msk.bf16.vlgmr.msra.gmra.mxu1 %vm2168_vm14, %v1515_v33  ;;  %v10794_v33 = vld [vmem:[#allocation11_spill] sm:$0xff] }
 0x125   : > { %v3085_v47 = vpop.permute.xlu0 %3084 }
 0x126   : > { %v2959_v20 = vpop.permute.xlu1 %2958  ;;  %v3149_v26 = vsel %vm1511_vm13, %v3117_v44, %v3085_v47 }
 0x127   : > { %v3119_v32 = vsel %vm1478_vm12, %v8457_v40, %v2959_v20  ;;  %7508 = vmatprep.mubr.msk.bf16.mxu0 %vm2168_vm14, %v3149_v26 }
 0x128   : > { %3114 = vrot.lane.b32.xlu1 %v3083_v25, %s7970_s24 }
 0x129   : > { %v1322_v43 = vpop.permute.xlu0 %1321 }
 0x12a   : > { %v3087_v8 = vpop.permute.xlu1 %3086  ;;  %v1484_v21 = vsel %vm1478_vm12, %v8480_v34, %v1322_v43  ;;  %v10790_v34 = vld [vmem:[#allocation7_spill] sm:$0xff] }
 0x12b   : > { %v3151_v53 = vsel %vm1511_vm13, %v3119_v32, %v3087_v8  ;;  %v10795_v8 = vld [vmem:[#allocation12_spill] sm:$0xff] }
 0x12c   : > { %7509 = vmatmul.mubr.msk.bf16.vlgmr.msra.gmra.mxu0 %vm2168_vm14, %v3151_v53 }
 0x12d   : > { %v1451_v50 = vpop.permute.xlu0 %1450 }
 0x12e   : > { %v1324_v42 = vpop.permute.xlu1 %1323  ;;  %v1517_v36 = vsel %vm1511_vm13, %v1484_v21, %v1451_v50 }
 0x12f   : > { %v1486_v40 = vsel %vm1478_vm12, %v8486_v38, %v1324_v42  ;;  %7476 = vmatprep.mubr.msk.bf16.mxu1 %vm2168_vm14, %v1517_v36 }
 0x131   : > { %v2961_v48 = vpop.permute.xlu0 %2960 }
 0x132   : > { %v1453_v45 = vpop.permute.xlu1 %1452  ;;  %v3121_v10 = vsel %vm1478_vm12, %v10789_v63, %v2961_v48 }
 0x133   : > { %v1519_v5 = vsel %vm1511_vm13, %v1486_v40, %v1453_v45 }
 0x134   : > { %7477 = vmatmul.mubr.msk.bf16.gmra.mxu1 %vm2168_vm14, %v1519_v5 }
 0x135   : > { %v3089_v23 = vpop.permute.xlu0 %3088 }
 0x136   : > { %v2963_v31 = vpop.permute.xlu1 %2962  ;;  %v3153_v38 = vsel %vm1511_vm13, %v3121_v10, %v3089_v23 }
 0x137   : > { %v3123_v7 = vsel %vm1478_vm12, %v10790_v34, %v2963_v31  ;;  %7512 = vmatprep.mubr.msk.bf16.mxu0 %vm2168_vm14, %v3153_v38 }
 0x139   : > { %v1326_v18 = vpop.permute.xlu0 %1325 }
 0x13a   : > { %v3091_v51 = vpop.permute.xlu1 %3090  ;;  %v1488_v29 = vsel %vm1478_vm12, %v10791_v13, %v1326_v18 }
 0x13b   : > { %v3155_v9 = vsel %vm1511_vm13, %v3123_v7, %v3091_v51 }
 0x13c   : > { %7513 = vmatmul.mubr.msk.bf16.gmra.mxu0 %vm2168_vm14, %v3155_v9 }
 0x13d   : > { %v1455_v39 = vpop.permute.xlu0 %1454 }
 0x13e   : > { %v1328_v62 = vpop.permute.xlu1 %1327  ;;  %v1521_v15 = vsel %vm1511_vm13, %v1488_v29, %v1455_v39 }
 0x13f   : > { %v1490_v61 = vsel %vm1478_vm12, %v10792_v3, %v1328_v62  ;;  %7480 = vmatprep.mubr.msk.bf16.mxu1 %vm2168_vm14, %v1521_v15 }
 0x141   : > { %v2965_v24 = vpop.permute.xlu0 %2964 }
 0x142   : > { %v1457_v14 = vpop.permute.xlu1 %1456  ;;  %v3125_v46 = vsel %vm1478_vm12, %v10793_v55, %v2965_v24 }
 0x143   : > { %v1523_v57 = vsel %vm1511_vm13, %v1490_v61, %v1457_v14  ;;  %v361_v61 = vld [vmem:[#allocation3 + $0x18] sm:$0x1] }
 0x144   : > { %7481 = vmatmul.mubr.msk.bf16.gmra.mxu1 %vm2168_vm14, %v1523_v57  ;;  %v362_v15 = vsel %vm8013_vm2, 0, %v361_v61  ;;  %v418_v61 = vld [vmem:[#allocation3 + $0x2c] sm:$0x1] }
 0x145   : > { %v3093_v59 = vpop.permute.xlu0 %3092  ;;  %363 = vst [vmem:[#allocation3 + $0x18] sm:$0x1] %v362_v15  ;;  %v4069_v15 = vld [vmem:[#allocation3] sm:$0xe] }
 0x146   : > { %v2967_v17 = vpop.permute.xlu1 %2966  ;;  %v3157_v25 = vsel %vm1511_vm13, %v3125_v46, %v3093_v59  ;;  %v355_v59 = vld [vmem:[#allocation3] sm:$0x1] }
 0x147   : > { %v3127_v60 = vsel %vm1478_vm12, %v10794_v33, %v2967_v17  ;;  %7516 = vmatprep.mubr.msk.bf16.mxu0 %vm2168_vm14, %v3157_v25 }
 0x149   : > { %v1330_v32 = vpop.permute.xlu0 %1329 }
 0x14a   : > { %v3095_v44 = vpop.permute.xlu1 %3094  ;;  %v1492_v47 = vsel %vm1478_vm12, %v8631_v1, %v1330_v32 }
 0x14b   : > { %v3159_v20 = vsel %vm1511_vm13, %v3127_v60, %v3095_v44 }
 0x14c   : > { %7517 = vmatmul.mubr.msk.bf16.gmra.mxu0 %vm2168_vm14, %v3159_v20  ;;  %v356_v20 = vsel %vm8013_vm2, 0, %v355_v59 }
 0x14d   : > { %v1459_v43 = vpop.permute.xlu0 %1458  ;;  %357 = vst [vmem:[#allocation3] sm:$0x1] %v356_v20 }
 0x14e   : > { %v1332_v26 = vpop.permute.xlu1 %1331  ;;  %v1525_v21 = vsel %vm1511_vm13, %v1492_v47, %v1459_v43  ;;  %v415_v47 = vld [vmem:[#allocation3 + $0x20] sm:$0x1] }
 0x14f   : > { %v1494_v53 = vsel %vm1478_vm12, %v10795_v8, %v1332_v26  ;;  %7484 = vmatprep.mubr.msk.bf16.mxu1 %vm2168_vm14, %v1525_v21  ;;  %v409_v8 = vld [vmem:[#allocation3 + $0x8] sm:$0x1] }
 0x150   : > { %v410_v43 = vsel %vm8023_vm4, 0, %v409_v8 }
 0x151   : > { %v2969_v50 = vpop.permute.xlu0 %2968  ;;  %411 = vst [vmem:[#allocation3 + $0x8] sm:$0x1] %v410_v43 }
 0x152   : > { %v1461_v42 = vpop.permute.xlu1 %1460  ;;  %v3129_v36 = vsel %vm1478_vm12, %v8671_v11, %v2969_v50 }
 0x153   : > { %v1527_v40 = vsel %vm1511_vm13, %v1494_v53, %v1461_v42  ;;  %v412_v53 = vld [vmem:[#allocation3 + $0x14] sm:$0x1] }
 0x154   : > { %7485 = vmatmul.mubr.msk.bf16.gmra.mxu1 %vm2168_vm14, %v1527_v40  ;;  %v413_v42 = vsel %vm8023_vm4, 0, %v412_v53 }
 0x155   : > { %v3097_v5 = vpop.permute.xlu0 %3096  ;;  %414 = vst [vmem:[#allocation3 + $0x14] sm:$0x1] %v413_v42 }
 0x156   : > { %v2971_v45 = vpop.permute.xlu1 %2970  ;;  %v3161_v48 = vsel %vm1511_vm13, %v3129_v36, %v3097_v5  ;;  %v4022_v5 = vld [vmem:[#allocation3 + $0x4] sm:$0xf] }
 0x157   : > { %v3131_v1 = vsel %vm1478_vm12, %v8696_v58, %v2971_v45  ;;  %7520 = vmatprep.mubr.msk.bf16.mxu0 %vm2168_vm14, %v3161_v48 }
 0x159   : > { %v1334_v31 = vpop.permute.xlu0 %1333 }
 0x15a   : > { %v3099_v63 = vpop.permute.xlu1 %3098  ;;  %v1496_v34 = vsel %vm1478_vm12, %v8723_v49, %v1334_v31 }
 0x15b   : > { %v3163_v10 = vsel %vm1511_vm13, %v3131_v1, %v3099_v63  ;;  %v4021_v1 = vld [vmem:[#allocation3] sm:$0xf]  ;;  %v367_v63 = vld [vmem:[#allocation3 + $0x30] sm:$0x1] }
 0x15c   : > { %7521 = vmatmul.mubr.msk.bf16.gmra.mxu0 %vm2168_vm14, %v3163_v10  ;;  %v9175_v10 = vcombine.low %v4021_v1, %v4022_v5 }
 0x15d   : > { %v1463_v23 = vpop.permute.xlu0 %1462 }
 0x15e   : > { %v1336_v7 = vpop.permute.xlu1 %1335  ;;  %v1529_v58 = vsel %vm1511_vm13, %v1496_v34, %v1463_v23  ;;  %v368_v34 = vsel %vm8013_vm2, 0, %v367_v63  ;;  %v424_v63 = vld [vmem:[#allocation3 + $0x44] sm:$0x1] }
 0x15f   : > { %v1498_v11 = vsel %vm1478_vm12, %v8736_v41, %v1336_v7  ;;  %7488 = vmatprep.mubr.msk.bf16.mxu1 %vm2168_vm14, %v1529_v58  ;;  %369 = vst [vmem:[#allocation3 + $0x30] sm:$0x1] %v368_v34  ;;  %v364_v7 = vld [vmem:[#allocation3 + $0x24] sm:$0x1] }
 0x160   : > { %v365_v23 = vsel %vm8013_vm2, 0, %v364_v7  ;;  %v7811_v58 = vld [vmem:[#allocation3 + $0x8] ss:$0 sps:$4 sm:$0x11]  }
 0x161   : > { %v2973_v9 = vpop.permute.xlu0 %2972  ;;  %366 = vst [vmem:[#allocation3 + $0x24] sm:$0x1] %v365_v23 }
 0x162   : > { %v1465_v38 = vpop.permute.xlu1 %1464  ;;  %v3133_v18 = vsel %vm1478_vm12, %v8762_v19, %v2973_v9 }
 0x163   : > { %v1531_v51 = vsel %vm1511_vm13, %v1498_v11, %v1465_v38  ;;  %v421_v38 = vld [vmem:[#allocation3 + $0x38] sm:$0x1] }
 0x164   : > { %7489 = vmatmul.mubr.msk.bf16.gmra.mxu1 %vm2168_vm14, %v1531_v51  ;;  %v4214_v51 = vshrl.u32 %v9175_v10, 16 }
 0x165   : > { %v3101_v29 = vpop.permute.xlu0 %3100 }
 0x166   : > { %v2975_v13 = vpop.permute.xlu1 %2974  ;;  %v3165_v41 = vsel %vm1511_vm13, %v3133_v18, %v3101_v29  ;;  %v4221_v29 = vshll.u32 %v7811_v58, 16 }
 0x167   : > { %v3135_v49 = vsel %vm1478_vm12, %v8778_v35, %v2975_v13  ;;  %7524 = vmatprep.mubr.msk.bf16.mxu0 %vm2168_vm14, %v3165_v41 }
 0x169   : > { %v1338_v39 = vpop.permute.xlu0 %1337 }
 0x16a   : > { %v3103_v62 = vpop.permute.xlu1 %3102  ;;  %v1500_v19 = vsel %vm1478_vm12, %v8813_v6, %v1338_v39  ;;  %v358_v6 = vld [vmem:[#allocation3 + $0xc] sm:$0x1]  ;;  %v4223_v39 = vrot.slane %v4221_v29, 1  ;;  %v433_v29 = vld [vmem:[#allocation3 + $0x68] sm:$0x1] }
 0x16b   : > { %v3167_v3 = vsel %vm1511_vm13, %v3135_v49, %v3103_v62  ;;  %v359_v44 = vsel %vm8013_vm2, 0, %v358_v6  ;;  %v422_v49 = vsel %vm8023_vm4, 0, %v421_v38 }
 0x16c   : > { %7525 = vmatmul.mubr.msk.bf16.gmra.mxu0 %vm2168_vm14, %v3167_v3  ;;  %360 = vst [vmem:[#allocation3 + $0xc] sm:$0x1] %v359_v44  ;;  %423 = vst [vmem:[#allocation3 + $0x38] sm:$0x1] %v422_v49 }
 0x16d   : > { %v1467_v57 = vpop.permute.xlu0 %1466 }
 0x16e   : > { %v1340_v35 = vpop.permute.xlu1 %1339  ;;  %v1533_v24 = vsel %vm1511_vm13, %v1500_v19, %v1467_v57 }
 0x16f   : > { %v1502_v14 = vsel %vm1478_vm12, %v8823_v2, %v1340_v35  ;;  %7492 = vmatprep.mubr.msk.bf16.mxu1 %vm2168_vm14, %v1533_v24  ;;  %v419_v35 = vsel %vm8023_vm4, 0, %v418_v61 }
 0x170   : > { %420 = vst [vmem:[#allocation3 + $0x2c] sm:$0x1] %v419_v35 }
 0x171   : > { %v2977_v17 = vpop.permute.xlu0 %2976 }
 0x172   : > { %v1469_v55 = vpop.permute.xlu1 %1468  ;;  %v3137_v33 = vsel %vm1478_vm12, %v8845_v28, %v2977_v17  ;;  %v416_v28 = vsel %vm8023_vm4, 0, %v415_v47 }
 0x173   : > { %v1535_v46 = vsel %vm1511_vm13, %v1502_v14, %v1469_v55  ;;  %417 = vst [vmem:[#allocation3 + $0x20] sm:$0x1] %v416_v28  ;;  %v4486_v55 = vrot.slane %v7811_v58, 1 }
 0x174   : > { %7493 = vmatmul.mubr.msk.bf16.gmra.mxu1 %vm2168_vm14, %v1535_v46 }
 0x175   : > { %v3105_v25 = vpop.permute.xlu0 %3104 }
 0x176   : > { %v2979_v60 = vpop.permute.xlu1 %2978  ;;  %v3169_v32 = vsel %vm1511_vm13, %v3137_v33, %v3105_v25 }
 0x177   : > { %v3139_v2 = vsel %vm1478_vm12, %v8861_v12, %v2979_v60  ;;  %7528 = vmatprep.mubr.msk.bf16.mxu0 %vm2168_vm14, %v3169_v32  ;;  %v373_v32 = vld [vmem:[#allocation3 + $0x48] sm:$0x1] }
 0x179   : > { %v1342_v21 = vpop.permute.xlu0 %1341 }
 0x17a   : > { %v3107_v26 = vpop.permute.xlu1 %3106  ;;  %v1504_v40 = vsel %vm1478_vm12, %v8893_v52, %v1342_v21  ;;  %v427_v21 = vld [vmem:[#allocation3 + $0x50] sm:$0x1] }
 0x17b   : > { %v3171_v12 = vsel %vm1511_vm13, %v3139_v2, %v3107_v26  ;;  %v374_v26 = vsel %vm8013_vm2, 0, %v373_v32  ;;  %v428_v42 = vsel %vm8023_vm4, 0, %v427_v21 }
 0x17c   : > { %7529 = vmatmul.mubr.msk.bf16.gmra.mxu0 %vm2168_vm14, %v3171_v12  ;;  %375 = vst [vmem:[#allocation3 + $0x48] sm:$0x1] %v374_v26  ;;  %429 = vst [vmem:[#allocation3 + $0x50] sm:$0x1] %v428_v42 }
 0x17d   : > { %v1471_v45 = vpop.permute.xlu0 %1470 }
 0x17e   : > { %v1344_v50 = vpop.permute.xlu1 %1343  ;;  %v1537_v48 = vsel %vm1511_vm13, %v1504_v40, %v1471_v45 }
 0x17f   : > { %v1506_v36 = vsel %vm1478_vm12, %v8908_v16, %v1344_v50  ;;  %7496 = vmatprep.mubr.msk.bf16.mxu1 %vm2168_vm14, %v1537_v48  ;;  %v4216_v16 = vshll.u32 %v9175_v10, 16 }
 0x181   : > { %v2981_v11 = vpop.permute.xlu0 %2980  ;;  %v4218_v9 = vrot.slane %v4216_v16, 1 }
 0x182   : > { %v1473_v31 = vpop.permute.xlu1 %1472  ;;  %v3141_v18 = vsel %vm1478_vm12, %v8936_v56, %v2981_v11  ;;  %v7036_v56 = vcombine.low %v4069_v15, %v4022_v5  ;;  %v379_v11 = vld [vmem:[#allocation3 + $0x60] sm:$0x1] }
 0x183   : > { %v1539_v52 = vsel %vm1511_vm13, %v1506_v36, %v1473_v31  ;;  %v4219_v41 = vor.u32 %v4218_v9, %v4214_v51  ;;  %v380_v23 = vsel %vm8013_vm2, 0, %v379_v11  ;;  %v9318_v11 = vld [vmem:[%s10744_s2] ss:$0 sm:$0xff] }
 0x184   : > { %7497 = vmatmul.mubr.msk.bf16.gmra.mxu1 %vm2168_vm14, %v1539_v52  ;;  %381 = vst [vmem:[#allocation3 + $0x60] sm:$0x1] %v380_v23  ;;  %v397_v23 = vld [vmem:[#allocation3 + $0xa8] sm:$0x1] }
 0x185   : > { %v3109_v3 = vpop.permute.xlu0 %3108  ;;  %v4224_v57 = vsel %vm1124_vm10, %v4219_v41, %v4223_v39  ;;  %v434_v41 = vsel %vm8023_vm4, 0, %v433_v29  ;;  %v398_v29 = vsel %vm8013_vm2, 0, %v397_v23 }
 0x186   : > { %v2983_v13 = vpop.permute.xlu1 %2982  ;;  %v3173_v19 = vsel %vm1511_vm13, %v3141_v18, %v3109_v3  ;;  %4405 = vrot.lane.b32.xlu0 %v4224_v57, %s7971_s25  ;;  %v376_v18 = vld [vmem:[#allocation3 + $0x54] sm:$0x1]  ;;  %435 = vst [vmem:[#allocation3 + $0x68] sm:$0x1] %v434_v41  ;;  %399 = vst [vmem:[#allocation3 + $0xa8] sm:$0x1] %v398_v29 }
 0x187   : > { %v3143_v62 = vsel %vm1478_vm12, %v8942_v27, %v2983_v13  ;;  %7532 = vmatprep.mubr.msk.bf16.mxu0 %vm2168_vm14, %v3173_v19  ;;  %v4485_v27 = vrot.slane %v7036_v56, 1  ;;  %v377_v13 = vsel %vm8013_vm2, 0, %v376_v18  ;;  %v385_v19 = vld [vmem:[#allocation3 + $0x78] sm:$0x1] }
 0x188   : > { %378 = vst [vmem:[#allocation3 + $0x54] sm:$0x1] %v377_v13  ;;  %v386_v35 = vsel %vm8013_vm2, 0, %v385_v19 }
 0x189   : > { %v1346_v46 = vpop.permute.xlu0 %1345  ;;  %v4487_v17 = vsel %vm1397_vm9, %v4485_v27, %v4486_v55  ;;  %387 = vst [vmem:[#allocation3 + $0x78] sm:$0x1] %v386_v35 }
 0x18a   : > { %v3111_v14 = vpop.permute.xlu1 %3110  ;;  %v1508_v33 = vsel %vm1478_vm12, %v8971_v22, %v1346_v46  ;;  %v9203_v6 = vpop.f32.mrf.mxu0  ;;  %4533 = vrot.lane.b32.xlu0 %v4487_v17, %s7970_s24  ;;  %v439_v46 = vld [vmem:[#allocation3 + $0x80] sm:$0x1] }
 0x18b   : > { %v3175_v24 = vsel %vm1511_vm13, %v3143_v62, %v3111_v14  ;;  %v430_v62 = vld [vmem:[#allocation3 + $0x5c] sm:$0x1]  ;;  %v440_v17 = vsel %vm8023_vm4, 0, %v439_v46 }
 0x18c   : > { %7533 = vmatmul.mubr.msk.bf16.gmra.mxu0 %vm2168_vm14, %v3175_v24  ;;  %v9209_v44 = vpop.f32.mrf.mxu0  ;;  %v431_v61 = vsel %vm8023_vm4, 0, %v430_v62  ;;  %v382_v24 = vld [vmem:[#allocation3 + $0x6c] sm:$0x1]  ;;  %441 = vst [vmem:[#allocation3 + $0x80] sm:$0x1] %v440_v17 }
 0x18d   : > { %v1475_v2 = vpop.permute.xlu0 %1474  ;;  %432 = vst [vmem:[#allocation3 + $0x5c] sm:$0x1] %v431_v61  ;;  %v383_v27 = vsel %vm8013_vm2, 0, %v382_v24 }
 0x18e   : > { %v1348_v60 = vpop.permute.xlu1 %1347  ;;  %v1541_v25 = vsel %vm1511_vm13, %v1508_v33, %v1475_v2  ;;  %v9213_v22 = vpop.f32.mrf.mxu0  ;;  %384 = vst [vmem:[#allocation3 + $0x6c] sm:$0x1] %v383_v27  ;;  %v436_v33 = vld [vmem:[#allocation3 + $0x74] sm:$0x1] }
 0x18f   : > { %v1510_v59 = vsel %vm1478_vm12, %v8980_v30, %v1348_v60  ;;  %7500 = vmatprep.mubr.msk.bf16.mxu1 %vm2168_vm14, %v1541_v25  ;;  %v370_v30 = vld [vmem:[#allocation3 + $0x3c] sm:$0x1]  ;;  %v437_v60 = vsel %vm8023_vm4, 0, %v436_v33 }
 0x190   : > { %v9218_v8 = vpop.f32.mrf.mxu0  ;;  %v371_v12 = vsel %vm8013_vm2, 0, %v370_v30  ;;  %438 = vst [vmem:[#allocation3 + $0x74] sm:$0x1] %v437_v60 }
 0x191   : > { %v2985_v28 = vpop.permute.xlu0 %2984  ;;  %372 = vst [vmem:[#allocation3 + $0x3c] sm:$0x1] %v371_v12 }
 0x192   : > { %v1477_v20 = vpop.permute.xlu1 %1476  ;;  %v3145_v53 = vsel %vm1478_vm12, %v9008_v54, %v2985_v28  ;;  %v388_v28 = vld [vmem:[#allocation3 + $0x84] sm:$0x1] }
 0x193   : > { %v1543_v47 = vsel %vm1511_vm13, %v1510_v59, %v1477_v20  ;;  %v9228_v36 = vpop.f32.mrf.mxu0  ;;  %v391_v20 = vld [vmem:[#allocation3 + $0x90] sm:$0x1]  ;;  %v389_v12 = vsel %vm8013_vm2, 0, %v388_v28 }
 0x194   : > { %7501 = vmatmul.mubr.msk.bf16.gmra.mxu1 %vm2168_vm14, %v1543_v47  ;;  %v392_v32 = vsel %vm8013_vm2, 0, %v391_v20  ;;  %390 = vst [vmem:[#allocation3 + $0x84] sm:$0x1] %v389_v12 }
 0x195   : > { %v3113_v50 = vpop.permute.xlu0 %3112  ;;  %v9232_v5 = vpop.f32.mrf.mxu0  ;;  %393 = vst [vmem:[#allocation3 + $0x90] sm:$0x1] %v392_v32 }
 0x196   : > { %v2987_v43 = vpop.permute.xlu1 %2986  ;;  %v3177_v45 = vsel %vm1511_vm13, %v3145_v53, %v3113_v50  ;;  %v445_v53 = vld [vmem:[#allocation3 + $0x98] sm:$0x1] }
 0x197   : > { %v3147_v40 = vsel %vm1478_vm12, %v9016_v37, %v2987_v43  ;;  %7536 = vmatprep.mubr.msk.bf16.mxu0 %vm2168_vm14, %v3177_v45  ;;  %v9236_v48 = vpop.f32.mrf.mxu0  ;;  %v425_v37 = vsel %vm8023_vm4, 0, %v424_v63  ;;  %v446_v42 = vsel %vm8023_vm4, 0, %v445_v53 }
 0x198   : > { %426 = vst [vmem:[#allocation3 + $0x44] sm:$0x1] %v425_v37  ;;  %447 = vst [vmem:[#allocation3 + $0x98] sm:$0x1] %v446_v42 }
 0x199   : > { %v9238_v31 = vpop.f32.mrf.mxu0 }
 0x19a   : > { %v3115_v1 = vpop.permute.xlu1 %3114 }
 0x19b   : > { %v3179_v54 = vsel %vm1511_vm13, %v3147_v40, %v3115_v1  ;;  %v9242_v34 = vpop.f32.mrf.mxu0  ;;  %v442_v40 = vld [vmem:[#allocation3 + $0x8c] sm:$0x1] }
 0x19c   : > { %7537 = vmatmul.mubr.msk.bf16.gmra.mxu0 %vm2168_vm14, %v3179_v54  ;;  %v443_v50 = vsel %vm8023_vm4, 0, %v442_v40 }
 0x19d   : > { %v9244_v52 = vpop.f32.mrf.mxu0  ;;  %444 = vst [vmem:[#allocation3 + $0x8c] sm:$0x1] %v443_v50 }
 0x19f   : > { %v9246_v7 = vpop.f32.mrf.mxu0 }
 0x1a1   : > { %v9248_v16 = vpop.f32.mrf.mxu0 }
 0x1a3   : > { %v9252_v58 = vpop.f32.mrf.mxu0 }
 0x1a5   : > { %v9254_v38 = vpop.f32.mrf.mxu0 }
 0x1a7   : > { %v9256_v51 = vpop.f32.mrf.mxu0 }
 0x1a9   : > { %v9258_v9 = vpop.f32.mrf.mxu0 }
 0x1ad   : > { %v9262_v49 = vpop.f32.mrf.mxu0 }
 0x1af   : > { %v9266_v3 = vpop.f32.mrf.mxu0 }
 0x1b1   : > { %v9270_v39 = vpop.f32.mrf.mxu0 }
 0x1b3   : > { %v9272_v15 = vpop.f32.mrf.mxu0 }
 0x1ba   : > { %v9276_v56 = vpop.f32.mrf.mxu0 }
 0x1bc   : > { %v9278_v14 = vpop.f32.mrf.mxu0 }
 0x1be   : > { %v9280_v57 = vpop.f32.mrf.mxu0 }
 0x1c0   : > { %v9284_v55 = vpop.f32.mrf.mxu0 }
 0x1ca   : > { %v9290_v59 = vpop.f32.mrf.mxu0 }
 0x1cc   : > { %v9292_v2 = vpop.f32.mrf.mxu0 }
 0x1ce   : > { %v9294_v25 = vpop.f32.mrf.mxu0 }
 0x1d0   : > { %v9298_v47 = vpop.f32.mrf.mxu0 }
 0x1dc   : > { %v9300_v26 = vpop.f32.mrf.mxu0 }
 0x1de   : > { %v9302_v30 = vpop.f32.mrf.mxu0 }
 0x1e0   : > { %v9306_v21 = vpop.f32.mrf.mxu0 }
 0x1e2   : > { %v9312_v1 = vpop.f32.mrf.mxu0 }
 0x1e4   : > { %v7474_v43 = vpop.f32.mrf.mxu1 }
 0x1e5   : > { %v2453_v63 = vadd.f32 %v7474_v43, %v9203_v6 }
 0x1e6   : > { %v2444_v45 = vpop.f32.mrf.mxu1 }
 0x1e7   : > { %v2445_v18 = vadd.f32 %v2444_v45, %v9209_v44 }
 0x1e8   : > { %v7475_v54 = vpop.f32.mrf.mxu1 }
 0x1e9   : > { %v2456_v61 = vadd.f32 %v7475_v54, %v9213_v22  ;;  %v394_v22 = vld [vmem:[#allocation3 + $0x9c] sm:$0x1] }
 0x1ea   : > { %v2447_v41 = vpop.f32.mrf.mxu1 }
 0x1eb   : > { %v2448_v24 = vadd.f32 %v2447_v41, %v9218_v8  ;;  %v395_v8 = vsel %vm8013_vm2, 0, %v394_v22  ;;  %v3909_v41 = vld [vmem:[#allocation3 + $0xc] sm:$0xf] }
 0x1ec   : > { %v7510_v37 = vpop.f32.mrf.mxu0  ;;  %396 = vst [vmem:[#allocation3 + $0x9c] sm:$0x1] %v395_v8 }
 0x1ed   : > { %v3391_v13 = vadd.f32 %v7510_v37, %v2453_v63  ;;  %v3916_v63 = vld [vmem:[#allocation3 + $0x18] sm:$0xf] }
 0x1ee   : > { %v3262_v62 = vpop.f32.mrf.mxu0 }
 0x1ef   : > { %v3430_v6 = vadd.f32 %v9318_v11, %v3391_v13  ;;  %v3389_v19 = vadd.f32 %v3262_v62, %v2445_v18 }
 0x1f0   : > { %v7511_v35 = vpop.f32.mrf.mxu0 }
 0x1f1   : > { %v3462_v27 = vmax.f32 %v3430_v6, 0.0  ;;  %v3428_v46 = vadd.f32 %v9318_v11, %v3389_v19  ;;  %v3392_v17 = vadd.f32 %v7511_v35, %v2456_v61  ;;  %v451_v19 = vld [vmem:[#allocation3 + $0xb0] sm:$0x1] }
 0x1f2   : > { %v3265_v44 = vpop.f32.mrf.mxu0 }
 0x1f3   : > { %v7215_v33 = vpack.c.bf16 %v3462_v27, %v3462_v27  ;;  %v3460_v60 = vmax.f32 %v3428_v46, 0.0  ;;  %v3431_v20 = vadd.f32 %v9318_v11, %v3392_v17  ;;  %v3390_v32 = vadd.f32 %v3265_v44, %v2448_v24 }
 0x1f4   : > { %v7478_v28 = vpop.f32.mrf.mxu1 }
 0x1f5   : > { %v3606_v12 = vshrl.u32 %v7215_v33, 16  ;;  %v7213_v53 = vpack.c.bf16 %v3460_v60, %v3460_v60  ;;  %v3463_v43 = vmax.f32 %v3431_v20, 0.0  ;;  %v3429_v40 = vadd.f32 %v9318_v11, %v3390_v32 }
 0x1f6   : > { %v2460_v42 = vpop.f32.mrf.mxu1  ;;  %v3609_v45 = vshll.u32 %v7215_v33, 16  ;;  %v2469_v46 = vadd.f32 %v7478_v28, %v9228_v36  ;;  %v452_v32 = vsel %vm8023_vm4, 0, %v451_v19 }
 0x1f7   : > { %v3608_v50 = vrot.slane %v3606_v12, 7  ;;  %v3589_v54 = vshrl.u32 %v7213_v53, 16  ;;  %v7216_v37 = vpack.c.bf16 %v3463_v43, %v3463_v43  ;;  %v3461_v23 = vmax.f32 %v3429_v40, 0.0  ;;  %v448_v12 = vld [vmem:[#allocation3 + $0xa4] sm:$0x1] }
 0x1f8   : > { %v3592_v29 = vshll.u32 %v7213_v53, 16  ;;  %v7479_v6 = vpop.f32.mrf.mxu1  ;;  %v2461_v17 = vadd.f32 %v2460_v42, %v9232_v5  ;;  %v3920_v43 = vld [vmem:[#allocation3 + $0x20] sm:$0x1]  ;;  %453 = vst [vmem:[#allocation3 + $0xb0] sm:$0x1] %v452_v32  ;;  %v449_v36 = vsel %vm8023_vm4, 0, %v448_v12 }
 0x1f9   : > { %v3611_v18 = vor.u32 %v3609_v45, %v3608_v50  ;;  %v3591_v13 = vrot.slane %v3589_v54, 7  ;;  %v3614_v62 = vshrl.u32 %v7216_v37, 16  ;;  %v7214_v61 = vpack.c.bf16 %v3461_v23, %v3461_v23  ;;  %450 = vst [vmem:[#allocation3 + $0xa4] sm:$0x1] %v449_v36 }
 0x1fa   : > { %v3617_v33 = vshll.u32 %v7216_v37, 16  ;;  %v3612_v53 = vrot.slane %v3608_v50, 4  ;;  %v2463_v45 = vpop.f32.mrf.mxu1  ;;  %v3913_v37 = vld [vmem:[#allocation3 + $0x14] sm:$0x1]  ;;  %v2472_v50 = vadd.f32 %v7479_v6, %v9236_v48 }
 0x1fb   : > { %v3917_v24 = vsel %vm8057_vm8, %v3611_v18, %v3916_v63  ;;  %v3594_v27 = vor.u32 %v3592_v29, %v3591_v13  ;;  %v3616_v44 = vrot.slane %v3614_v62, 7  ;;  %v3597_v60 = vshrl.u32 %v7214_v61, 16 }
 0x1fc   : > { %3918 = vst [vmem:[#allocation3 + $0x18] sm:$0xf] %v3917_v24  ;;  %v7514_v20 = vpop.f32.mrf.mxu0  ;;  %v3600_v8 = vshll.u32 %v7214_v61, 16  ;;  %v3595_v63 = vrot.slane %v3591_v13, 4  ;;  %v2464_v13 = vadd.f32 %v2463_v45, %v9238_v31 }
 0x1fd   : > { %v3910_v22 = vsel %vm8057_vm8, %v3594_v27, %v3909_v41  ;;  %v3395_v40 = vadd.f32 %v7514_v20, %v2469_v46  ;;  %v3619_v5 = vor.u32 %v3617_v33, %v3616_v44  ;;  %v3621_v28 = vrot.slane %v3616_v44, 4 }
 0x1fe   : > { %3911 = vst [vmem:[#allocation3 + $0xc] sm:$0xf] %v3910_v22  ;;  %v3599_v42 = vrot.slane %v3597_v60, 7  ;;  %v3278_v54 = vpop.f32.mrf.mxu0 }
 0x1ff   : > { %v3434_v23 = vadd.f32 %v9318_v11, %v3395_v40  ;;  %v3393_v18 = vadd.f32 %v3278_v54, %v2461_v17  ;;  %v3620_v41 = vsel %vm8050_vm7, %v3612_v53, %v3619_v5  ;;  %v3921_v62 = vsel %vm8013_vm2, %v3621_v28, %v3920_v43  ;;  %v3930_v28 = vld [vmem:[#allocation3 + $0x30] sm:$0xf]  ;;  %v3923_v54 = vld [vmem:[#allocation3 + $0x24] sm:$0xf] }
 0x200   : > { %v3602_v19 = vor.u32 %v3600_v8, %v3599_v42  ;;  %v3604_v24 = vrot.slane %v3599_v42, 4  ;;  %v7515_v27 = vpop.f32.mrf.mxu0  ;;  %3919 = vst.msk [vmem:[#allocation3 + $0x1c] sm:$0xf] %vm226_vm5, %v3620_v41  ;;  %3922 = vst [vmem:[#allocation3 + $0x20] sm:$0x1] %v3921_v62 }
 0x201   : > { %v3466_v61 = vmax.f32 %v3434_v23, 0.0  ;;  %v3432_v48 = vadd.f32 %v9318_v11, %v3393_v18  ;;  %v3396_v6 = vadd.f32 %v7515_v27, %v2472_v50 }
 0x202   : > { %v3603_v46 = vsel %vm8050_vm7, %v3595_v63, %v3602_v19  ;;  %v3914_v17 = vsel %vm8013_vm2, %v3604_v24, %v3913_v37  ;;  %v3281_v44 = vpop.f32.mrf.mxu0 }
 0x203   : > { %3912 = vst.msk [vmem:[#allocation3 + $0x10] sm:$0xf] %vm226_vm5, %v3603_v46  ;;  %3915 = vst [vmem:[#allocation3 + $0x14] sm:$0x1] %v3914_v17  ;;  %v7219_v33 = vpack.c.bf16 %v3466_v61, %v3466_v61  ;;  %v3464_v60 = vmax.f32 %v3432_v48, 0.0  ;;  %v3435_v20 = vadd.f32 %v9318_v11, %v3396_v6  ;;  %v3394_v32 = vadd.f32 %v3281_v44, %v2464_v13 }
 0x204   : > { %v7482_v31 = vpop.f32.mrf.mxu1  ;;  %v5703_v24 = vld [vmem:[#allocation3 + $0x18] sm:$0xe] }
 0x205   : > { %v3640_v12 = vshrl.u32 %v7219_v33, 16  ;;  %v7217_v53 = vpack.c.bf16 %v3464_v60, %v3464_v60  ;;  %v3467_v22 = vmax.f32 %v3435_v20, 0.0  ;;  %v3433_v43 = vadd.f32 %v9318_v11, %v3394_v32 }
 0x206   : > { %v2476_v40 = vpop.f32.mrf.mxu1  ;;  %v3643_v5 = vshll.u32 %v7219_v33, 16  ;;  %v2485_v37 = vadd.f32 %v7482_v31, %v9242_v34  ;;  %v3934_v34 = vld [vmem:[#allocation3 + $0x38] sm:$0x1] }
 0x207   : > { %v3642_v36 = vrot.slane %v3640_v12, 7  ;;  %v3623_v42 = vshrl.u32 %v7217_v53, 16  ;;  %v7220_v8 = vpack.c.bf16 %v3467_v22, %v3467_v22  ;;  %v3626_v45 = vshll.u32 %v7217_v53, 16  ;;  %v5656_v23 = vld [vmem:[#allocation3 + $0x1c] sm:$0xf] }
 0x208   : > { %v3465_v63 = vmax.f32 %v3433_v43, 0.0  ;;  %v7483_v50 = vpop.f32.mrf.mxu1  ;;  %v2477_v61 = vadd.f32 %v2476_v40, %v9244_v52  ;;  %v9359_v48 = vld [vmem:[#allocation3 + $0x20] ss:$0 sps:$4 sm:$0x11]   ;;  %v7171_v6 = vcombine.low %v5703_v24, %v5656_v23  ;;  %v4635_v20 = vld [vmem:[#allocation3 + $0x1c] sm:$0xf] }
 0x209   : > { %v3645_v18 = vor.u32 %v3643_v5, %v3642_v36  ;;  %v3646_v41 = vrot.slane %v3642_v36, 4  ;;  %v3625_v62 = vrot.slane %v3623_v42, 7  ;;  %v3648_v19 = vshrl.u32 %v7220_v8, 16  ;;  %v4681_v52 = vld [vmem:[#allocation3 + $0x18] sm:$0xe] }
 0x20a   : > { %v3651_v27 = vshll.u32 %v7220_v8, 16  ;;  %v7218_v13 = vpack.c.bf16 %v3465_v63, %v3465_v63  ;;  %v2488_v33 = vadd.f32 %v7483_v50, %v9246_v7  ;;  %v2479_v60 = vpop.f32.mrf.mxu1  ;;  %v6119_v22 = vrot.slane %v7171_v6, 1  ;;  %v3927_v7 = vld [vmem:[#allocation3 + $0x2c] sm:$0x1] }
 0x20b   : > { %v3931_v46 = vsel %vm8057_vm8, %v3645_v18, %v3930_v28  ;;  %v3628_v17 = vor.u32 %v3626_v45, %v3625_v62  ;;  %v3650_v44 = vrot.slane %v3648_v19, 7  ;;  %v3629_v32 = vrot.slane %v3625_v62, 4  ;;  %v9366_v28 = vld [vmem:[#allocation3 + $0x20] ss:$0 sps:$4 sm:$0x11]  }
 0x20c   : > { %3932 = vst [vmem:[#allocation3 + $0x30] sm:$0xf] %v3931_v46  ;;  %v3631_v31 = vshrl.u32 %v7218_v13, 16  ;;  %v3634_v12 = vshll.u32 %v7218_v13, 16  ;;  %v7518_v53 = vpop.f32.mrf.mxu0  ;;  %v2480_v8 = vadd.f32 %v2479_v60, %v9248_v16  ;;  %v6120_v63 = vrot.slane %v9359_v48, 1 }
 0x20d   : > { %v3924_v43 = vsel %vm8057_vm8, %v3628_v17, %v3923_v54  ;;  %v3653_v40 = vor.u32 %v3651_v27, %v3650_v44  ;;  %v3655_v36 = vrot.slane %v3650_v44, 4  ;;  %v3399_v5 = vadd.f32 %v7518_v53, %v2485_v37  ;;  %v4026_v19 = vld [vmem:[#allocation3 + $0x1c] sm:$0xf]  ;;  %v9375_v24 = vld [vmem:[#allocation3 + $0x20] ss:$0 sps:$4 sm:$0x11]  }
 0x20e   : > { %3925 = vst [vmem:[#allocation3 + $0x24] sm:$0xf] %v3924_v43  ;;  %v3633_v42 = vrot.slane %v3631_v31, 7  ;;  %v3294_v45 = vpop.f32.mrf.mxu0  ;;  %v7085_v50 = vcombine.low %v4681_v52, %v4635_v20  ;;  %v6121_v6 = vsel %vm1397_vm9, %v6119_v22, %v6120_v63  ;;  %v4071_v60 = vld [vmem:[#allocation3 + $0x18] sm:$0xe] }
 0x20f   : > { %v3654_v18 = vsel %vm8050_vm7, %v3646_v41, %v3653_v40  ;;  %v3935_v54 = vsel %vm8013_vm2, %v3655_v36, %v3934_v34  ;;  %v3438_v62 = vadd.f32 %v9318_v11, %v3399_v5  ;;  %v3397_v37 = vadd.f32 %v3294_v45, %v2477_v61  ;;  %v5655_v34 = vld [vmem:[#allocation3 + $0x18] sm:$0xf]  ;;  %6167 = vrot.lane.b32.xlu0 %v6121_v6, %s7970_s24  ;;  %v4024_v45 = vld [vmem:[#allocation3 + $0x10] sm:$0xf]  ;;  %v3944_v6 = vld [vmem:[#allocation3 + $0x48] sm:$0xf] }
 0x210   : > { %3933 = vst.msk [vmem:[#allocation3 + $0x34] sm:$0xf] %vm226_vm5, %v3654_v18  ;;  %3936 = vst [vmem:[#allocation3 + $0x38] sm:$0x1] %v3935_v54  ;;  %v3636_v16 = vor.u32 %v3634_v12, %v3633_v42  ;;  %v3638_v27 = vrot.slane %v3633_v42, 4  ;;  %v7519_v13 = vpop.f32.mrf.mxu0  ;;  %v5099_v46 = vrot.slane %v7085_v50, 1  ;;  %v9386_v53 = vcombine.low %v5655_v34, %v5656_v23 }
 0x211   : > { %v3470_v17 = vmax.f32 %v3438_v62, 0.0  ;;  %v3436_v41 = vadd.f32 %v9318_v11, %v3397_v37  ;;  %v3400_v44 = vadd.f32 %v7519_v13, %v2488_v33  ;;  %v5100_v61 = vrot.slane %v9366_v28, 1  ;;  %v4634_v22 = vld [vmem:[#allocation3 + $0x18] sm:$0xf] }
 0x212   : > { %v3637_v31 = vsel %vm8050_vm7, %v3629_v32, %v3636_v16  ;;  %v3928_v12 = vsel %vm8013_vm2, %v3638_v27, %v3927_v7  ;;  %10798 = vst [vmem:[#allocation6_spill] sm:$0xff] %v9386_v53  ;;  %v3297_v52 = vpop.f32.mrf.mxu0  ;;  %v7038_v43 = vcombine.low %v4071_v60, %v4026_v19  ;;  %v4025_v42 = vld [vmem:[#allocation3 + $0x18] sm:$0xf]  ;;  %v9392_v32 = vcombine.low %v4634_v22, %v4635_v20  ;;  %v9395_v18 = vld [vmem:[#allocation3 + $0x14] ss:$0 sps:$4 sm:$0x11]  }
 0x213   : > { %3926 = vst.msk [vmem:[#allocation3 + $0x28] sm:$0xf] %vm226_vm5, %v3637_v31  ;;  %3929 = vst [vmem:[#allocation3 + $0x2c] sm:$0x1] %v3928_v12  ;;  %v7223_v33 = vpack.c.bf16 %v3470_v17, %v3470_v17  ;;  %v3468_v40 = vmax.f32 %v3436_v41, 0.0  ;;  %v3439_v36 = vadd.f32 %v9318_v11, %v3400_v44  ;;  %v5101_v5 = vsel %vm1397_vm9, %v5099_v46, %v5100_v61 }
 0x214   : > { %5146 = vrot.lane.b32.xlu1 %v5101_v5, %s7970_s24  ;;  %v3398_v23 = vadd.f32 %v3297_v52, %v2480_v8  ;;  %v7486_v7 = vpop.f32.mrf.mxu1  ;;  %v4491_v63 = vrot.slane %v7038_v43, 1  ;;  %v4492_v50 = vrot.slane %v9375_v24, 1  ;;  %v9397_v16 = vcombine.low %v4025_v42, %v4026_v19  ;;  %v4070_v27 = vld [vmem:[#allocation3 + $0xc] sm:$0xe]  ;;  %v4633_v31 = vld [vmem:[#allocation3 + $0x10] sm:$0xf] }
 0x215   : > { %v3674_v54 = vshrl.u32 %v7223_v33, 16  ;;  %v7221_v62 = vpack.c.bf16 %v3468_v40, %v3468_v40  ;;  %v3471_v37 = vmax.f32 %v3439_v36, 0.0  ;;  %v3677_v13 = vshll.u32 %v7223_v33, 16  ;;  %v4023_v60 = vld [vmem:[#allocation3 + $0xc] sm:$0xf] }
 0x216   : > { %v3437_v46 = vadd.f32 %v9318_v11, %v3398_v23  ;;  %v4493_v20 = vsel %vm1397_vm9, %v4491_v63, %v4492_v50  ;;  %v7037_v17 = vcombine.low %v4070_v27, %v4024_v45  ;;  %v2492_v8 = vpop.f32.mrf.mxu1  ;;  %v2501_v61 = vadd.f32 %v7486_v7, %v9252_v58  ;;  %v9406_v5 = vld [vmem:[#allocation3 + $0x14] ss:$0 sps:$4 sm:$0x11]   ;;  %v3937_v23 = vld [vmem:[#allocation3 + $0x3c] sm:$0xf] }
 0x217   : > { %v3676_v41 = vrot.slane %v3674_v54, 7  ;;  %v3657_v44 = vshrl.u32 %v7221_v62, 16  ;;  %v7224_v34 = vpack.c.bf16 %v3471_v37, %v3471_v37  ;;  %4537 = vrot.lane.b32.xlu0 %v4493_v20, %s7970_s24  ;;  %v3660_v19 = vshll.u32 %v7221_v62, 16  ;;  %v3948_v27 = vld [vmem:[#allocation3 + $0x50] sm:$0x1] }
 0x218   : > { %v3469_v12 = vmax.f32 %v3437_v46, 0.0  ;;  %v4488_v22 = vrot.slane %v7037_v17, 1  ;;  %v4489_v52 = vrot.slane %v9395_v18, 1  ;;  %v9404_v36 = vcombine.low %v4023_v60, %v4024_v45  ;;  %v7487_v50 = vpop.f32.mrf.mxu1 }
 0x219   : > { %v3679_v43 = vor.u32 %v3677_v13, %v3676_v41  ;;  %v3659_v33 = vrot.slane %v3657_v44, 7  ;;  %v3682_v40 = vshrl.u32 %v7224_v34, 16  ;;  %v3680_v42 = vrot.slane %v3676_v41, 4  ;;  %v4680_v13 = vld [vmem:[#allocation3 + $0xc] sm:$0xe] }
 0x21a   : > { %v3685_v63 = vshll.u32 %v7224_v34, 16  ;;  %v7222_v58 = vpack.c.bf16 %v3469_v12, %v3469_v12  ;;  %v4490_v7 = vsel %vm1397_vm9, %v4488_v22, %v4489_v52  ;;  %v2493_v45 = vadd.f32 %v2492_v8, %v9254_v38 }
 0x21b   : > { %v3945_v54 = vsel %vm8057_vm8, %v3679_v43, %v3944_v6  ;;  %v3662_v62 = vor.u32 %v3660_v19, %v3659_v33  ;;  %v3684_v37 = vrot.slane %v3682_v40, 7  ;;  %4535 = vrot.lane.b32.xlu1 %v4490_v7, %s7970_s24  ;;  %v3663_v46 = vrot.slane %v3659_v33, 4  ;;  %v4632_v6 = vld [vmem:[#allocation3 + $0xc] sm:$0xf]  ;;  %v2495_v43 = vpop.f32.mrf.mxu1 }
 0x21c   : > { %3946 = vst [vmem:[#allocation3 + $0x48] sm:$0xf] %v3945_v54  ;;  %v3665_v20 = vshrl.u32 %v7222_v58, 16  ;;  %v3668_v17 = vshll.u32 %v7222_v58, 16  ;;  %v7084_v41 = vcombine.low %v4680_v13, %v4633_v31  ;;  %v7522_v44 = vpop.f32.mrf.mxu0  ;;  %v5097_v19 = vrot.slane %v9406_v5, 1 }
 0x21d   : > { %v3938_v34 = vsel %vm8057_vm8, %v3662_v62, %v3937_v23  ;;  %v3687_v60 = vor.u32 %v3685_v63, %v3684_v37  ;;  %v3689_v12 = vrot.slane %v3684_v37, 4  ;;  %v2504_v52 = vadd.f32 %v7487_v50, %v9256_v51  ;;  %v3941_v63 = vld [vmem:[#allocation3 + $0x44] sm:$0x1] }
 0x21e   : > { %3939 = vst [vmem:[#allocation3 + $0x3c] sm:$0xf] %v3938_v34  ;;  %v3667_v22 = vrot.slane %v3665_v20, 7  ;;  %v5096_v38 = vrot.slane %v7084_v41, 1  ;;  %v9417_v8 = vcombine.low %v4632_v6, %v4633_v31  ;;  %v3310_v33 = vpop.f32.mrf.mxu0  ;;  %v4839_v58 = vshll.u32 %v9392_v32, 16 }
 0x21f   : > { %v3688_v40 = vsel %vm8050_vm7, %v3680_v42, %v3687_v60  ;;  %v3949_v23 = vsel %vm8013_vm2, %v3689_v12, %v3948_v27  ;;  %v4844_v7 = vshll.u32 %v9366_v28, 16  ;;  %v4837_v54 = vshrl.u32 %v9392_v32, 16 }
 0x220   : > { %3947 = vst.msk [vmem:[#allocation3 + $0x4c] sm:$0xf] %vm226_vm5, %v3688_v40  ;;  %3950 = vst [vmem:[#allocation3 + $0x50] sm:$0x1] %v3949_v23  ;;  %v3670_v51 = vor.u32 %v3668_v17, %v3667_v22  ;;  %v3672_v50 = vrot.slane %v3667_v22, 4  ;;  %v5098_v31 = vsel %vm1397_vm9, %v5096_v38, %v5097_v19  ;;  %v4841_v42 = vrot.slane %v4839_v58, 1  ;;  %v7523_v41 = vpop.f32.mrf.mxu0 }
 0x221   : > { %5144 = vrot.lane.b32.xlu0 %v5098_v31, %s7970_s24  ;;  %v4846_v62 = vrot.slane %v4844_v7, 1  ;;  %v2496_v37 = vadd.f32 %v2495_v43, %v9258_v9  ;;  %v3403_v27 = vadd.f32 %v7522_v44, %v2501_v61  ;;  %v5850_v20 = vshll.u32 %v9386_v53, 16  ;;  %v4639_v43 = vld [vmem:[#allocation3 + $0x34] sm:$0xf] }
 0x222   : > { %v3671_v13 = vsel %vm8050_vm7, %v3663_v46, %v3670_v51  ;;  %v3942_v28 = vsel %vm8013_vm2, %v3672_v50, %v3941_v63  ;;  %v5855_v17 = vshll.u32 %v9359_v48, 16  ;;  %v4842_v34 = vor.u32 %v4841_v42, %v4837_v54 }
 0x223   : > { %3940 = vst.msk [vmem:[#allocation3 + $0x40] sm:$0xf] %vm226_vm5, %v3671_v13  ;;  %3943 = vst [vmem:[#allocation3 + $0x44] sm:$0x1] %v3942_v28  ;;  %v3442_v60 = vadd.f32 %v9318_v11, %v3403_v27  ;;  %v5848_v9 = vshrl.u32 %v9386_v53, 16  ;;  %v4228_v61 = vshll.u32 %v9404_v36, 16  ;;  %v3401_v6 = vadd.f32 %v3310_v33, %v2493_v45 }
 0x224   : > { %v5852_v44 = vrot.slane %v5850_v20, 1  ;;  %v4226_v46 = vshrl.u32 %v9404_v36, 16  ;;  %v4233_v12 = vshll.u32 %v9395_v18, 16  ;;  %v4847_v19 = vsel %vm1124_vm10, %v4842_v34, %v4846_v62  ;;  %v4683_v45 = vld [vmem:[#allocation3 + $0x30] sm:$0xe]  ;;  %v3313_v20 = vpop.f32.mrf.mxu0 }
 0x225   : > { %v3474_v48 = vmax.f32 %v3442_v60, 0.0  ;;  %v4230_v22 = vrot.slane %v4228_v61, 1  ;;  %v3404_v38 = vadd.f32 %v7523_v41, %v2504_v52  ;;  %5018 = vrot.lane.b32.xlu1 %v4847_v19, %s7971_s25  ;;  %v5857_v23 = vrot.slane %v5855_v17, 1  ;;  %v9447_v33 = vld [vmem:[#allocation3 + $0x38] ss:$0 sps:$4 sm:$0x11]   ;;  %v7490_v61 = vpop.f32.mrf.mxu1 }
 0x226   : > { %v5853_v40 = vor.u32 %v5852_v44, %v5848_v9  ;;  %v4235_v63 = vrot.slane %v4233_v12, 1  ;;  %v3440_v58 = vadd.f32 %v9318_v11, %v3401_v6  ;;  %v4240_v18 = vshll.u32 %v9397_v16, 16  ;;  %v4638_v60 = vld [vmem:[#allocation3 + $0x30] sm:$0xf]  ;;  %v3958_v6 = vld [vmem:[#allocation3 + $0x60] sm:$0xf] }
 0x227   : > { %v7227_v7 = vpack.c.bf16 %v3474_v48, %v3474_v48  ;;  %v4231_v51 = vor.u32 %v4230_v22, %v4226_v46  ;;  %v3443_v50 = vadd.f32 %v9318_v11, %v3404_v38  ;;  %v4245_v54 = vshll.u32 %v9375_v24, 16 }
 0x228   : > { %v5858_v31 = vsel %vm1124_vm10, %v5853_v40, %v5857_v23  ;;  %v3472_v52 = vmax.f32 %v3440_v58, 0.0  ;;  %v7087_v42 = vcombine.low %v4683_v45, %v4639_v43  ;;  %v4238_v28 = vshrl.u32 %v9397_v16, 16  ;;  %v3951_v58 = vld [vmem:[#allocation3 + $0x54] sm:$0xf] }
 0x229   : > { %v3708_v62 = vshrl.u32 %v7227_v7, 16  ;;  %6039 = vrot.lane.b32.xlu0 %v5858_v31, %s7971_s25  ;;  %v4236_v27 = vsel %vm1124_vm10, %v4231_v51, %v4235_v63  ;;  %v3475_v13 = vmax.f32 %v3443_v50, 0.0  ;;  %v3711_v17 = vshll.u32 %v7227_v7, 16  ;;  %v5658_v51 = vld [vmem:[#allocation3 + $0x28] sm:$0xf] }
 0x22a   : > { %4407 = vrot.lane.b32.xlu1 %v4236_v27, %s7971_s25  ;;  %v7225_v41 = vpack.c.bf16 %v3472_v52, %v3472_v52  ;;  %v4242_v34 = vrot.slane %v4240_v18, 1  ;;  %v5105_v9 = vrot.slane %v7087_v42, 1  ;;  %v4247_v46 = vrot.slane %v4245_v54, 1  ;;  %v9463_v52 = vld [vmem:[#allocation3 + $0x2c] ss:$0 sps:$4 sm:$0x11]   ;;  %v2508_v54 = vpop.f32.mrf.mxu1 }
 0x22b   : > { %v3710_v44 = vrot.slane %v3708_v62, 7  ;;  %v7228_v24 = vpack.c.bf16 %v3475_v13, %v3475_v13  ;;  %v5106_v12 = vrot.slane %v9447_v33, 1  ;;  %v9456_v22 = vcombine.low %v4638_v60, %v4639_v43  ;;  %v3962_v62 = vld [vmem:[#allocation3 + $0x68] sm:$0x1]  ;;  %v5704_v13 = vld [vmem:[#allocation3 + $0x24] sm:$0xe] }
 0x22c   : > { %v3691_v19 = vshrl.u32 %v7225_v41, 16  ;;  %v4243_v48 = vor.u32 %v4242_v34, %v4238_v28  ;;  %v3402_v38 = vadd.f32 %v3313_v20, %v2496_v37  ;;  %v3694_v63 = vshll.u32 %v7225_v41, 16  ;;  %v9473_v34 = vld [vmem:[#allocation3 + $0x38] ss:$0 sps:$4 sm:$0x11]  }
 0x22d   : > { %v3713_v40 = vor.u32 %v3711_v17, %v3710_v44  ;;  %v3714_v23 = vrot.slane %v3710_v44, 4  ;;  %v3716_v7 = vshrl.u32 %v7228_v24, 16  ;;  %v5107_v45 = vsel %vm1397_vm9, %v5105_v9, %v5106_v12 }
 0x22e   : > { %v9458_v50 = vrot.slane %v3691_v19, 7  ;;  %v4248_v18 = vsel %vm1124_vm10, %v4243_v48, %v4247_v46  ;;  %v3441_v31 = vadd.f32 %v9318_v11, %v3402_v38  ;;  %v3719_v42 = vshll.u32 %v7228_v24, 16  ;;  %5150 = vrot.lane.b32.xlu1 %v5107_v45, %s7970_s24  ;;  %v7526_v46 = vpop.f32.mrf.mxu0  ;;  %v7491_v48 = vpop.f32.mrf.mxu1  ;;  %v5660_v38 = vld [vmem:[#allocation3 + $0x34] sm:$0xf] }
 0x22f   : > { %v3959_v37 = vsel %vm8057_vm8, %v3713_v40, %v3958_v6  ;;  %v3718_v43 = vrot.slane %v3716_v7, 7  ;;  %4409 = vrot.lane.b32.xlu0 %v4248_v18, %s7971_s25  ;;  %v2517_v27 = vadd.f32 %v7490_v61, %v9262_v49  ;;  %v4825_v17 = vshrl.u32 %v9417_v8, 16  ;;  %v5657_v6 = vld [vmem:[#allocation3 + $0x24] sm:$0xf]  ;;  %v5705_v40 = vld [vmem:[#allocation3 + $0x30] sm:$0xe] }
 0x230   : > { %3960 = vst [vmem:[#allocation3 + $0x60] sm:$0xf] %v3959_v37  ;;  %v3696_v28 = vor.u32 %v3694_v63, %v9458_v50  ;;  %v3473_v20 = vmax.f32 %v3441_v31, 0.0  ;;  %v4827_v41 = vshll.u32 %v9417_v8, 16  ;;  %v4832_v44 = vshll.u32 %v9406_v5, 16 }
 0x231   : > { %v3721_v60 = vor.u32 %v3719_v42, %v3718_v43  ;;  %v3723_v9 = vrot.slane %v3718_v43, 4  ;;  %v7172_v24 = vcombine.low %v5704_v13, %v5658_v51  ;;  %v6123_v19 = vrot.slane %v9463_v52, 1  ;;  %v4028_v63 = vld [vmem:[#allocation3 + $0x28] sm:$0xf]  ;;  %v3955_v13 = vld [vmem:[#allocation3 + $0x5c] sm:$0x1] }
 0x232   : > { %v3952_v49 = vsel %vm8057_vm8, %v3696_v28, %v3951_v58  ;;  %v7226_v61 = vpack.c.bf16 %v3473_v20, %v3473_v20  ;;  %v4829_v12 = vrot.slane %v4827_v41, 1  ;;  %v3697_v7 = vrot.slane %v9458_v50, 4  ;;  %v9484_v58 = vld [vmem:[#allocation3 + $0x2c] ss:$0 sps:$4 sm:$0x11]  }
 0x233   : > { %3953 = vst [vmem:[#allocation3 + $0x54] sm:$0xf] %v3952_v49  ;;  %v3722_v5 = vsel %vm8050_vm7, %v3714_v23, %v3721_v60  ;;  %v3963_v18 = vsel %vm8013_vm2, %v3723_v9, %v3962_v62  ;;  %v6122_v45 = vrot.slane %v7172_v24, 1  ;;  %v4834_v42 = vrot.slane %v4832_v44, 1  ;;  %v5659_v20 = vld [vmem:[#allocation3 + $0x30] sm:$0xf]  ;;  %v3326_v9 = vpop.f32.mrf.mxu0 }
 0x234   : > { %3961 = vst.msk [vmem:[#allocation3 + $0x64] sm:$0xf] %vm226_vm5, %v3722_v5  ;;  %3964 = vst [vmem:[#allocation3 + $0x68] sm:$0x1] %v3963_v18  ;;  %v3699_v31 = vshrl.u32 %v7226_v61, 16  ;;  %v3702_v37 = vshll.u32 %v7226_v61, 16  ;;  %v4830_v43 = vor.u32 %v4829_v12, %v4825_v17  ;;  %v9488_v28 = vcombine.low %v5657_v6, %v5658_v51  ;;  %v2511_v61 = vpop.f32.mrf.mxu1 }
 0x235   : > { %v6124_v50 = vsel %vm1397_vm9, %v6122_v45, %v6123_v19  ;;  %v2509_v23 = vadd.f32 %v2508_v54, %v9266_v3  ;;  %v7173_v41 = vcombine.low %v5705_v40, %v5660_v38  ;;  %v4072_v62 = vld [vmem:[#allocation3 + $0x24] sm:$0xe]  ;;  %v4030_v60 = vld [vmem:[#allocation3 + $0x34] sm:$0xf]  ;;  %v2520_v17 = vadd.f32 %v7491_v48, %v9270_v39  ;;  %v4073_v39 = vld [vmem:[#allocation3 + $0x30] sm:$0xe] }
 0x236   : > { %v3701_v24 = vrot.slane %v3699_v31, 7  ;;  %v4835_v49 = vsel %vm1124_vm10, %v4830_v43, %v4834_v42  ;;  %6169 = vrot.lane.b32.xlu1 %v6124_v50, %s7970_s24  ;;  %v6126_v44 = vrot.slane %v9473_v34, 1  ;;  %v9495_v12 = vld [vmem:[#allocation3 + $0x38] ss:$0 sps:$4 sm:$0x11]   ;;  %v9498_v51 = vcombine.low %v5659_v20, %v5660_v38  ;;  %v7527_v50 = vpop.f32.mrf.mxu0 }
 0x237   : > { %5016 = vrot.lane.b32.xlu0 %v4835_v49, %s7971_s25  ;;  %v6125_v3 = vrot.slane %v7173_v41, 1  ;;  %v4027_v54 = vld [vmem:[#allocation3 + $0x24] sm:$0xf]  ;;  %v7039_v6 = vcombine.low %v4072_v62, %v4028_v63  ;;  %v4495_v19 = vrot.slane %v9484_v58, 1  ;;  %v3407_v45 = vadd.f32 %v7526_v46, %v2517_v27  ;;  %v4029_v20 = vld [vmem:[#allocation3 + $0x30] sm:$0xf] }
 0x238   : > { %v3704_v40 = vor.u32 %v3702_v37, %v3701_v24  ;;  %v3706_v5 = vrot.slane %v3701_v24, 4  ;;  %v9501_v18 = vcombine.low %v4027_v54, %v4028_v63  ;;  %v2512_v43 = vadd.f32 %v2511_v61, %v9272_v15  ;;  %v9505_v41 = vld [vmem:[#allocation3 + $0x2c] ss:$0 sps:$4 sm:$0x11]   ;;  %v4637_v46 = vld [vmem:[#allocation3 + $0x28] sm:$0xf] }
 0x239   : > { %v6127_v48 = vsel %vm1397_vm9, %v6125_v3, %v6126_v44  ;;  %v4494_v31 = vrot.slane %v7039_v6, 1  ;;  %v7040_v42 = vcombine.low %v4073_v39, %v4030_v60  ;;  %v3446_v63 = vadd.f32 %v9318_v11, %v3407_v45  ;;  %v4682_v3 = vld [vmem:[#allocation3 + $0x24] sm:$0xe] }
 0x23a   : > { %v3705_v38 = vsel %vm8050_vm7, %v3697_v7, %v3704_v40  ;;  %v3956_v37 = vsel %vm8013_vm2, %v3706_v5, %v3955_v13  ;;  %v4498_v27 = vrot.slane %v9495_v12, 1  ;;  %v9516_v24 = vcombine.low %v4029_v20, %v4030_v60 }
 0x23b   : > { %3954 = vst.msk [vmem:[#allocation3 + $0x58] sm:$0xf] %vm226_vm5, %v3705_v38  ;;  %3957 = vst [vmem:[#allocation3 + $0x5c] sm:$0x1] %v3956_v37  ;;  %6171 = vrot.lane.b32.xlu0 %v6127_v48, %s7970_s24  ;;  %v4496_v15 = vsel %vm1397_vm9, %v4494_v31, %v4495_v19  ;;  %v4497_v62 = vrot.slane %v7040_v42, 1  ;;  %v4863_v7 = vshll.u32 %v9456_v22, 16  ;;  %v3405_v44 = vadd.f32 %v3326_v9, %v2509_v23  ;;  %v3329_v31 = vpop.f32.mrf.mxu0 }
 0x23c   : > { %4539 = vrot.lane.b32.xlu1 %v4496_v15, %s7970_s24  ;;  %v3478_v13 = vmax.f32 %v3446_v63, 0.0  ;;  %v4868_v49 = vshll.u32 %v9447_v33, 16  ;;  %v3408_v61 = vadd.f32 %v7527_v50, %v2520_v17  ;;  %v4861_v54 = vshrl.u32 %v9456_v22, 16  ;;  %v4636_v48 = vld [vmem:[#allocation3 + $0x24] sm:$0xf]  ;;  %v7494_v63 = vpop.f32.mrf.mxu1 }
 0x23d   : > { %v4865_v6 = vrot.slane %v4863_v7, 1  ;;  %v7086_v40 = vcombine.low %v4682_v3, %v4637_v46  ;;  %v5103_v5 = vrot.slane %v9505_v41, 1  ;;  %v4499_v60 = vsel %vm1397_vm9, %v4497_v62, %v4498_v27 }
 0x23e   : > { %v7231_v19 = vpack.c.bf16 %v3478_v13, %v3478_v13  ;;  %v3444_v45 = vadd.f32 %v9318_v11, %v3405_v44  ;;  %v3447_v39 = vadd.f32 %v9318_v11, %v3408_v61  ;;  %v4870_v23 = vrot.slane %v4868_v49, 1  ;;  %v3972_v44 = vld [vmem:[#allocation3 + $0x78] sm:$0xf] }
 0x23f   : > { %4541 = vrot.lane.b32.xlu0 %v4499_v60, %s7970_s24  ;;  %v4866_v33 = vor.u32 %v4865_v6, %v4861_v54  ;;  %v5102_v9 = vrot.slane %v7086_v40, 1  ;;  %v9527_v17 = vcombine.low %v4636_v48, %v4637_v46  ;;  %v5862_v15 = vshll.u32 %v9488_v28, 16 }
 0x240   : > { %v3742_v42 = vshrl.u32 %v7231_v19, 16  ;;  %v3745_v50 = vshll.u32 %v7231_v19, 16  ;;  %v3476_v38 = vmax.f32 %v3444_v45, 0.0  ;;  %v3479_v37 = vmax.f32 %v3447_v39, 0.0 }
 0x241   : > { %v4871_v20 = vsel %vm1124_vm10, %v4866_v33, %v4870_v23  ;;  %v5104_v27 = vsel %vm1397_vm9, %v5102_v9, %v5103_v5  ;;  %v5867_v62 = vshll.u32 %v9463_v52, 16  ;;  %v3406_v49 = vadd.f32 %v3329_v31, %v2512_v43  ;;  %v3965_v23 = vld [vmem:[#allocation3 + $0x6c] sm:$0xf]  ;;  %v2524_v31 = vpop.f32.mrf.mxu1 }
 0x242   : > { %v3744_v7 = vrot.slane %v3742_v42, 7  ;;  %5022 = vrot.lane.b32.xlu1 %v4871_v20, %s7971_s25  ;;  %v7229_v13 = vpack.c.bf16 %v3476_v38, %v3476_v38  ;;  %v7232_v46 = vpack.c.bf16 %v3479_v37, %v3479_v37  ;;  %v5860_v61 = vshrl.u32 %v9488_v28, 16  ;;  %v3976_v20 = vld [vmem:[#allocation3 + $0x80] sm:$0x1] }
 0x243   : > { %5148 = vrot.lane.b32.xlu0 %v5104_v27, %s7970_s24  ;;  %v5864_v3 = vrot.slane %v5862_v15, 1  ;;  %v5869_v54 = vrot.slane %v5867_v62, 1  ;;  %v9537_v6 = vadd.f32 %v7494_v63, %v9276_v56  ;;  %v5872_v52 = vshrl.u32 %v9498_v51, 16 }
 0x244   : > { %v3747_v40 = vor.u32 %v3745_v50, %v3744_v7  ;;  %v3748_v5 = vrot.slane %v3744_v7, 4  ;;  %v3725_v19 = vshrl.u32 %v7229_v13, 16  ;;  %v3728_v60 = vshll.u32 %v7229_v13, 16 }
 0x245   : > { %v3750_v45 = vshrl.u32 %v7232_v46, 16  ;;  %v5865_v39 = vor.u32 %v5864_v3, %v5860_v61  ;;  %v3445_v43 = vadd.f32 %v9318_v11, %v3406_v49  ;;  %v5874_v9 = vshll.u32 %v9498_v51, 16  ;;  %v9553_v49 = vld [vmem:[#allocation3 + $0x50] ss:$0 sps:$4 sm:$0x11]  }
 0x246   : > { %v3973_v48 = vsel %vm8057_vm8, %v3747_v40, %v3972_v44  ;;  %v9543_v33 = vrot.slane %v3725_v19, 7  ;;  %v5879_v56 = vshll.u32 %v9473_v34, 16  ;;  %v3753_v50 = vshll.u32 %v7232_v46, 16  ;;  %v7530_v40 = vpop.f32.mrf.mxu0  ;;  %v7904_v19 = vld [vmem:[%s10745_s3 + $0x14] ss:$0 sps:$4 sm:$0xff]  }
 0x247   : > { %3974 = vst [vmem:[#allocation3 + $0x78] sm:$0xf] %v3973_v48  ;;  %v3752_v42 = vrot.slane %v3750_v45, 7  ;;  %v5870_v38 = vsel %vm1124_vm10, %v5865_v39, %v5869_v54  ;;  %v3477_v37 = vmax.f32 %v3445_v43, 0.0  ;;  %v5876_v27 = vrot.slane %v5874_v9, 1  ;;  %v7495_v54 = vpop.f32.mrf.mxu1  ;;  %7651 = vmatprep.subr.msk.bf16.mxu1 %vm2201_vm11, %v7904_v19 }
 0x248   : > { %v3730_v63 = vor.u32 %v3728_v60, %v9543_v33  ;;  %v3731_v11 = vrot.slane %v9543_v33, 4  ;;  %6041 = vrot.lane.b32.xlu1 %v5870_v38, %s7971_s25  ;;  %v4250_v15 = vshrl.u32 %v9501_v18, 16  ;;  %v4252_v13 = vshll.u32 %v9501_v18, 16  ;;  %v7905_v60 = vld [vmem:[%s10745_s3 + $0x8] ss:$0 sps:$4 sm:$0xff]  }
 0x249   : > { %v3755_v62 = vor.u32 %v3753_v50, %v3752_v42  ;;  %v3757_v7 = vrot.slane %v3752_v42, 4  ;;  %v7230_v34 = vpack.c.bf16 %v3477_v37, %v3477_v37  ;;  %v5877_v44 = vor.u32 %v5876_v27, %v5872_v52  ;;  %v4643_v43 = vld [vmem:[#allocation3 + $0x4c] sm:$0xf]  ;;  %7652 = vmatprep.subr.msk.bf16.mxu0 %vm2201_vm11, %v7905_v60  ;;  %v4685_v42 = vld [vmem:[#allocation3 + $0x48] sm:$0xe] }
 0x24a   : > { %v3966_v46 = vsel %vm8057_vm8, %v3730_v63, %v3965_v23  ;;  %v5881_v61 = vrot.slane %v5879_v56, 1  ;;  %v4257_v3 = vshll.u32 %v9484_v58, 16  ;;  %v2525_v58 = vadd.f32 %v2524_v31, %v9278_v14  ;;  %v3969_v50 = vld [vmem:[#allocation3 + $0x74] sm:$0x1]  ;;  %v4642_v63 = vld [vmem:[#allocation3 + $0x48] sm:$0xf] }
 0x24b   : > { %3967 = vst [vmem:[#allocation3 + $0x6c] sm:$0xf] %v3966_v46  ;;  %v3756_v45 = vsel %vm8050_vm7, %v3748_v5, %v3755_v62  ;;  %v3977_v52 = vsel %vm8013_vm2, %v3757_v7, %v3976_v20  ;;  %v3733_v39 = vshrl.u32 %v7230_v34, 16  ;;  %v3736_v48 = vshll.u32 %v7230_v34, 16  ;;  %v2527_v62 = vpop.f32.mrf.mxu1  ;;  %v3342_v7 = vpop.f32.mrf.mxu0 }
 0x24c   : > { %3975 = vst.msk [vmem:[#allocation3 + $0x7c] sm:$0xf] %vm226_vm5, %v3756_v45  ;;  %3978 = vst [vmem:[#allocation3 + $0x80] sm:$0x1] %v3977_v52  ;;  %v5882_v33 = vsel %vm1124_vm10, %v5877_v44, %v5881_v61  ;;  %v4254_v23 = vrot.slane %v4252_v13, 1  ;;  %v4259_v9 = vrot.slane %v4257_v3, 1  ;;  %v2536_v56 = vadd.f32 %v7495_v54, %v9280_v57 }
 0x24d   : > { %v3735_v5 = vrot.slane %v3733_v39, 7  ;;  %6043 = vrot.lane.b32.xlu0 %v5882_v33, %s7971_s25  ;;  %v4264_v14 = vshll.u32 %v9516_v24, 16  ;;  %v4269_v31 = vshll.u32 %v9495_v12, 16  ;;  %v4262_v37 = vshrl.u32 %v9516_v24, 16  ;;  %v5662_v54 = vld [vmem:[#allocation3 + $0x40] sm:$0xf] }
 0x24e   : > { %v4255_v38 = vor.u32 %v4254_v23, %v4250_v15  ;;  %v7089_v20 = vcombine.low %v4685_v42, %v4643_v43  ;;  %v5112_v27 = vrot.slane %v9553_v49, 1  ;;  %v9579_v44 = vcombine.low %v4642_v63, %v4643_v43  ;;  %v9581_v57 = vld [vmem:[#allocation3 + $0x44] ss:$0 sps:$4 sm:$0x11]   ;;  %v5706_v39 = vld [vmem:[#allocation3 + $0x3c] sm:$0xe]  ;;  %v7531_v23 = vpop.f32.mrf.mxu0 }
 0x24f   : > { %v3738_v34 = vor.u32 %v3736_v48, %v3735_v5  ;;  %v3740_v13 = vrot.slane %v3735_v5, 4  ;;  %v4266_v46 = vrot.slane %v4264_v14, 1  ;;  %v4271_v61 = vrot.slane %v4269_v31, 1  ;;  %v5664_v43 = vld [vmem:[#allocation3 + $0x4c] sm:$0xf] }
 0x250   : > { %v4260_v12 = vsel %vm1124_vm10, %v4255_v38, %v4259_v9  ;;  %v5111_v3 = vrot.slane %v7089_v20, 1  ;;  %v3411_v15 = vadd.f32 %v7530_v40, %v9537_v6  ;;  %v2528_v52 = vadd.f32 %v2527_v62, %v9284_v55  ;;  %v9595_v6 = vld [vmem:[%s10744_s2] ss:$0 sm:$0xff]  ;;  %v9601_v55 = vld [vmem:[#allocation3 + $0x50] ss:$0 sps:$4 sm:$0x11]  }
 0x251   : > { %v3739_v19 = vsel %vm8050_vm7, %v3731_v11, %v3738_v34  ;;  %v3970_v60 = vsel %vm8013_vm2, %v3740_v13, %v3969_v50  ;;  %4411 = vrot.lane.b32.xlu1 %v4260_v12, %s7971_s25  ;;  %v4267_v45 = vor.u32 %v4266_v46, %v4262_v37  ;;  %v4849_v40 = vshrl.u32 %v9527_v17, 16  ;;  %v5661_v14 = vld [vmem:[#allocation3 + $0x3c] sm:$0xf]  ;;  %v5663_v20 = vld [vmem:[#allocation3 + $0x48] sm:$0xf] }
 0x252   : > { %3968 = vst.msk [vmem:[#allocation3 + $0x70] sm:$0xf] %vm226_vm5, %v3739_v19  ;;  %3971 = vst [vmem:[#allocation3 + $0x74] sm:$0x1] %v3970_v60  ;;  %v3450_v11 = vadd.f32 %v9595_v6, %v3411_v15  ;;  %v4851_v48 = vshll.u32 %v9527_v17, 16  ;;  %v4856_v33 = vshll.u32 %v9505_v41, 16  ;;  %v5113_v5 = vsel %vm1397_vm9, %v5111_v3, %v5112_v27 }
 0x253   : > { %v4272_v9 = vsel %vm1124_vm10, %v4267_v45, %v4271_v61  ;;  %v7174_v31 = vcombine.low %v5706_v39, %v5662_v54  ;;  %v6129_v42 = vrot.slane %v9581_v57, 1  ;;  %v9607_v37 = vcombine.low %v5661_v14, %v5662_v54  ;;  %v5707_v41 = vld [vmem:[#allocation3 + $0x48] sm:$0xe]  ;;  %v4032_v62 = vld [vmem:[#allocation3 + $0x40] sm:$0xf]  ;;  %v3345_v39 = vpop.f32.mrf.mxu0 }
 0x254   : > { %4413 = vrot.lane.b32.xlu0 %v4272_v9, %s7971_s25  ;;  %v3482_v50 = vmax.f32 %v3450_v11, 0.0  ;;  %v4853_v38 = vrot.slane %v4851_v48, 1  ;;  %v3409_v63 = vadd.f32 %v3342_v7, %v2525_v58  ;;  %v4858_v34 = vrot.slane %v4856_v33, 1  ;;  %v9610_v12 = vld [vmem:[#allocation3 + $0x44] ss:$0 sps:$4 sm:$0x11]  }
 0x255   : > { %5154 = vrot.lane.b32.xlu1 %v5113_v5, %s7970_s24  ;;  %v6128_v13 = vrot.slane %v7174_v31, 1  ;;  %v3412_v46 = vadd.f32 %v7531_v23, %v2536_v56  ;;  %v7175_v27 = vcombine.low %v5707_v41, %v5664_v43  ;;  %v6132_v19 = vrot.slane %v9601_v55, 1  ;;  %v4074_v54 = vld [vmem:[#allocation3 + $0x3c] sm:$0xe]  ;;  %v4034_v9 = vld [vmem:[#allocation3 + $0x4c] sm:$0xf] }
 0x256   : > { %v7235_v61 = vpack.c.bf16 %v3482_v50, %v3482_v50  ;;  %v4854_v3 = vor.u32 %v4853_v38, %v4849_v40  ;;  %v3448_v15 = vadd.f32 %v9595_v6, %v3409_v63  ;;  %v9615_v60 = vcombine.low %v5663_v20, %v5664_v43  ;;  %v4031_v23 = vld [vmem:[#allocation3 + $0x3c] sm:$0xf]  ;;  %v7498_v40 = vpop.f32.mrf.mxu1  ;;  %v4075_v50 = vld [vmem:[#allocation3 + $0x48] sm:$0xe] }
 0x257   : > { %v3451_v58 = vadd.f32 %v9595_v6, %v3412_v46  ;;  %v6131_v7 = vrot.slane %v7175_v27, 1  ;;  %v7041_v45 = vcombine.low %v4074_v54, %v4032_v62  ;;  %v6130_v48 = vsel %vm1397_vm9, %v6128_v13, %v6129_v42  ;;  %v9623_v42 = vld [vmem:[#allocation3 + $0x50] ss:$0 sps:$4 sm:$0x11]  }
 0x258   : > { %v3776_v11 = vshrl.u32 %v7235_v61, 16  ;;  %v4859_v56 = vsel %vm1124_vm10, %v4854_v3, %v4858_v34  ;;  %v3480_v33 = vmax.f32 %v3448_v15, 0.0  ;;  %v3779_v5 = vshll.u32 %v7235_v61, 16  ;;  %v3986_v34 = vld [vmem:[#allocation3 + $0x90] sm:$0xf] }
 0x259   : > { %5020 = vrot.lane.b32.xlu0 %v4859_v56, %s7971_s25  ;;  %6173 = vrot.lane.b32.xlu1 %v6130_v48, %s7970_s24  ;;  %v3483_v14 = vmax.f32 %v3451_v58, 0.0  ;;  %v4500_v31 = vrot.slane %v7041_v45, 1  ;;  %v4501_v43 = vrot.slane %v9610_v12, 1  ;;  %v6133_v20 = vsel %vm1397_vm9, %v6131_v7, %v6132_v19  ;;  %v2540_v45 = vpop.f32.mrf.mxu1  ;;  %v3979_v56 = vld [vmem:[#allocation3 + $0x84] sm:$0xf] }
 0x25a   : > { %v3778_v38 = vrot.slane %v3776_v11, 7  ;;  %v7233_v63 = vpack.c.bf16 %v3480_v33, %v3480_v33  ;;  %v3410_v41 = vadd.f32 %v3345_v39, %v2528_v52  ;;  %v9626_v27 = vcombine.low %v4031_v23, %v4032_v62  ;;  %v3990_v33 = vld [vmem:[#allocation3 + $0x98] sm:$0x1]  ;;  %v4033_v23 = vld [vmem:[#allocation3 + $0x48] sm:$0xf] }
 0x25b   : > { %v7236_v13 = vpack.c.bf16 %v3483_v14, %v3483_v14  ;;  %v4502_v46 = vsel %vm1397_vm9, %v4500_v31, %v4501_v43  ;;  %v7042_v61 = vcombine.low %v4075_v50, %v4034_v9  ;;  %v2549_v58 = vadd.f32 %v7498_v40, %v9290_v59 }
 0x25c   : > { %v3781_v3 = vor.u32 %v3779_v5, %v3778_v38  ;;  %v3782_v15 = vrot.slane %v3778_v38, 4  ;;  %v3759_v54 = vshrl.u32 %v7233_v63, 16  ;;  %v3762_v11 = vshll.u32 %v7233_v63, 16 }
 0x25d   : > { %v3784_v48 = vshrl.u32 %v7236_v13, 16  ;;  %6175 = vrot.lane.b32.xlu0 %v6133_v20, %s7970_s24  ;;  %4543 = vrot.lane.b32.xlu1 %v4502_v46, %s7970_s24  ;;  %v3449_v52 = vadd.f32 %v9595_v6, %v3410_v41  ;;  %v4503_v19 = vrot.slane %v7042_v61, 1  ;;  %v3787_v39 = vshll.u32 %v7236_v13, 16  ;;  %v7499_v20 = vpop.f32.mrf.mxu1  ;;  %v9641_v41 = vld [vmem:[#allocation3 + $0x44] ss:$0 sps:$4 sm:$0x11]  }
 0x25e   : > { %v3987_v62 = vsel %vm8057_vm8, %v3781_v3, %v3986_v34  ;;  %v3761_v7 = vrot.slane %v3759_v54, 7  ;;  %v4504_v59 = vrot.slane %v9623_v42, 1  ;;  %v9635_v14 = vcombine.low %v4033_v23, %v4034_v9  ;;  %v4641_v9 = vld [vmem:[#allocation3 + $0x40] sm:$0xf]  ;;  %v7534_v3 = vpop.f32.mrf.mxu0  ;;  %v4684_v23 = vld [vmem:[#allocation3 + $0x3c] sm:$0xe] }
 0x25f   : > { %3988 = vst [vmem:[#allocation3 + $0x90] sm:$0xf] %v3987_v62  ;;  %v3786_v40 = vrot.slane %v3784_v48, 7  ;;  %v3481_v5 = vmax.f32 %v3449_v52, 0.0  ;;  %v4887_v31 = vshll.u32 %v9579_v44, 16  ;;  %v4885_v38 = vshrl.u32 %v9579_v44, 16 }
 0x260   : > { %v3764_v43 = vor.u32 %v3762_v11, %v3761_v7  ;;  %v4505_v50 = vsel %vm1397_vm9, %v4503_v19, %v4504_v59  ;;  %v4892_v63 = vshll.u32 %v9553_v49, 16  ;;  %v3765_v54 = vrot.slane %v3761_v7, 4 }
 0x261   : > { %v3789_v34 = vor.u32 %v3787_v39, %v3786_v40  ;;  %v3791_v13 = vrot.slane %v3786_v40, 4  ;;  %v7234_v46 = vpack.c.bf16 %v3481_v5, %v3481_v5  ;;  %4545 = vrot.lane.b32.xlu0 %v4505_v50, %s7970_s24  ;;  %v4889_v61 = vrot.slane %v4887_v31, 1  ;;  %v3358_v31 = vpop.f32.mrf.mxu0 }
 0x262   : > { %v3980_v11 = vsel %vm8057_vm8, %v3764_v43, %v3979_v56  ;;  %v4894_v48 = vrot.slane %v4892_v63, 1  ;;  %v2541_v52 = vadd.f32 %v2540_v45, %v9292_v2  ;;  %v2552_v39 = vadd.f32 %v7499_v20, %v9294_v25  ;;  %v4640_v56 = vld [vmem:[#allocation3 + $0x3c] sm:$0xf]  ;;  %v3983_v43 = vld [vmem:[#allocation3 + $0x8c] sm:$0x1] }
 0x263   : > { %3981 = vst [vmem:[#allocation3 + $0x84] sm:$0xf] %v3980_v11  ;;  %v3790_v49 = vsel %vm8050_vm7, %v3782_v15, %v3789_v34  ;;  %v3991_v19 = vsel %vm8013_vm2, %v3791_v13, %v3990_v33  ;;  %v3767_v62 = vshrl.u32 %v7234_v46, 16  ;;  %v3770_v7 = vshll.u32 %v7234_v46, 16 }
 0x264   : > { %3989 = vst.msk [vmem:[#allocation3 + $0x94] sm:$0xf] %vm226_vm5, %v3790_v49  ;;  %3992 = vst [vmem:[#allocation3 + $0x98] sm:$0x1] %v3991_v19  ;;  %v4890_v59 = vor.u32 %v4889_v61, %v4885_v38  ;;  %v7088_v40 = vcombine.low %v4684_v23, %v4641_v9  ;;  %v5109_v2 = vrot.slane %v9641_v41, 1  ;;  %v9654_v5 = vcombine.low %v4640_v56, %v4641_v9  ;;  %v7535_v19 = vpop.f32.mrf.mxu0 }
 0x265   : > { %v3769_v45 = vrot.slane %v3767_v62, 7  ;;  %v5886_v15 = vshll.u32 %v9607_v37, 16  ;;  %v5891_v33 = vshll.u32 %v9581_v57, 16  ;;  %v5884_v63 = vshrl.u32 %v9607_v37, 16 }
 0x266   : > { %v4895_v25 = vsel %vm1124_vm10, %v4890_v59, %v4894_v48  ;;  %v5108_v50 = vrot.slane %v7088_v40, 1  ;;  %v3415_v20 = vadd.f32 %v7534_v3, %v2549_v58  ;;  %v5896_v57 = vshrl.u32 %v9615_v60, 16 }
 0x267   : > { %v3772_v38 = vor.u32 %v3770_v7, %v3769_v45  ;;  %v3774_v34 = vrot.slane %v3769_v45, 4  ;;  %5026 = vrot.lane.b32.xlu1 %v4895_v25, %s7971_s25  ;;  %v5888_v13 = vrot.slane %v5886_v15, 1  ;;  %v5893_v46 = vrot.slane %v5891_v33, 1 }
 0x268   : > { %v5110_v61 = vsel %vm1397_vm9, %v5108_v50, %v5109_v2  ;;  %v3454_v9 = vadd.f32 %v9595_v6, %v3415_v20  ;;  %v5898_v11 = vshll.u32 %v9615_v60, 16  ;;  %v5903_v49 = vshll.u32 %v9601_v55, 16 }
 0x269   : > { %v3773_v48 = vsel %vm8050_vm7, %v3765_v54, %v3772_v38  ;;  %v3984_v58 = vsel %vm8013_vm2, %v3774_v34, %v3983_v43  ;;  %5152 = vrot.lane.b32.xlu0 %v5110_v61, %s7970_s24  ;;  %v5889_v3 = vor.u32 %v5888_v13, %v5884_v63  ;;  %v4274_v7 = vshrl.u32 %v9626_v27, 16  ;;  %v9677_v43 = vld [vmem:[#allocation3 + $0x68] ss:$0 sps:$4 sm:$0x11]   ;;  %v4647_v38 = vld [vmem:[#allocation3 + $0x64] sm:$0xf]  ;;  %v2543_v34 = vpop.f32.mrf.mxu1 }
 0x26a   : > { %3982 = vst.msk [vmem:[#allocation3 + $0x88] sm:$0xf] %vm226_vm5, %v3773_v48  ;;  %3985 = vst [vmem:[#allocation3 + $0x8c] sm:$0x1] %v3984_v58  ;;  %v3486_v62 = vmax.f32 %v3454_v9, 0.0  ;;  %v5900_v23 = vrot.slane %v5898_v11, 1  ;;  %v3413_v2 = vadd.f32 %v3358_v31, %v2541_v52  ;;  %v3416_v33 = vadd.f32 %v7535_v19, %v2552_v39 }
 0x26b   : > { %v4276_v59 = vshll.u32 %v9626_v27, 16  ;;  %v5894_v54 = vsel %vm1124_vm10, %v5889_v3, %v5893_v46  ;;  %v5905_v56 = vrot.slane %v5903_v49, 1  ;;  %v4281_v40 = vshll.u32 %v9610_v12, 16  ;;  %v7502_v49 = vpop.f32.mrf.mxu1  ;;  %v4000_v19 = vld [vmem:[#allocation3 + $0xa8] sm:$0xf] }
 0x26c   : > { %6045 = vrot.lane.b32.xlu1 %v5894_v54, %s7971_s25  ;;  %v7239_v45 = vpack.c.bf16 %v3486_v62, %v3486_v62  ;;  %v5901_v55 = vor.u32 %v5900_v23, %v5896_v57  ;;  %v3452_v50 = vadd.f32 %v9595_v6, %v3413_v2  ;;  %v4286_v63 = vshrl.u32 %v9635_v14, 16  ;;  %v4687_v57 = vld [vmem:[#allocation3 + $0x60] sm:$0xe]  ;;  %v3361_v54 = vpop.f32.mrf.mxu0 }
 0x26d   : > { %v4278_v15 = vrot.slane %v4276_v59, 1  ;;  %v4283_v25 = vrot.slane %v4281_v40, 1  ;;  %v4288_v20 = vshll.u32 %v9635_v14, 16  ;;  %v3455_v39 = vadd.f32 %v9595_v6, %v3416_v33  ;;  %v4646_v2 = vld [vmem:[#allocation3 + $0x60] sm:$0xf] }
 0x26e   : > { %v3810_v13 = vshrl.u32 %v7239_v45, 16  ;;  %v3813_v12 = vshll.u32 %v7239_v45, 16  ;;  %v5906_v52 = vsel %vm1124_vm10, %v5901_v55, %v5905_v56  ;;  %v3484_v46 = vmax.f32 %v3452_v50, 0.0  ;;  %v5666_v55 = vld [vmem:[#allocation3 + $0x58] sm:$0xf] }
 0x26f   : > { %v4279_v31 = vor.u32 %v4278_v15, %v4274_v7  ;;  %6047 = vrot.lane.b32.xlu0 %v5906_v52, %s7971_s25  ;;  %v4290_v61 = vrot.slane %v4288_v20, 1  ;;  %v4293_v9 = vshll.u32 %v9623_v42, 16  ;;  %v7091_v58 = vcombine.low %v4687_v57, %v4647_v38  ;;  %v9697_v20 = vld [vmem:[#allocation3 + $0x5c] ss:$0 sps:$4 sm:$0x11]  }
 0x270   : > { %v9686_v11 = vrot.slane %v3810_v13, 7  ;;  %v5118_v3 = vrot.slane %v9677_v43, 1  ;;  %v7237_v62 = vpack.c.bf16 %v3484_v46, %v3484_v46  ;;  %v3487_v23 = vmax.f32 %v3455_v39, 0.0  ;;  %v5708_v52 = vld [vmem:[#allocation3 + $0x54] sm:$0xe] }
 0x271   : > { %v4284_v48 = vsel %vm1124_vm10, %v4279_v31, %v4283_v25  ;;  %v4291_v7 = vor.u32 %v4290_v61, %v4286_v63  ;;  %v4295_v59 = vrot.slane %v4293_v9, 1  ;;  %v2544_v56 = vadd.f32 %v2543_v34, %v9298_v47  ;;  %v3993_v47 = vld [vmem:[#allocation3 + $0x9c] sm:$0xf]  ;;  %v2556_v31 = vpop.f32.mrf.mxu1  ;;  %v4004_v9 = vld [vmem:[#allocation3 + $0xb0] sm:$0x1] }
 0x272   : > { %4415 = vrot.lane.b32.xlu1 %v4284_v48, %s7971_s25  ;;  %v3815_v42 = vor.u32 %v3813_v12, %v9686_v11  ;;  %v3816_v40 = vrot.slane %v9686_v11, 4  ;;  %v5117_v45 = vrot.slane %v7091_v58, 1  ;;  %v3793_v15 = vshrl.u32 %v7237_v62, 16 }
 0x273   : > { %v7240_v33 = vpack.c.bf16 %v3487_v23, %v3487_v23  ;;  %v4296_v25 = vsel %vm1124_vm10, %v4291_v7, %v4295_v59  ;;  %v9695_v50 = vcombine.low %v4646_v2, %v4647_v38  ;;  %v3796_v13 = vshll.u32 %v7237_v62, 16  ;;  %v9717_v59 = vld [vmem:[#allocation3 + $0x5c] ss:$0 sps:$4 sm:$0x11]   ;;  %v4645_v2 = vld [vmem:[#allocation3 + $0x58] sm:$0xf] }
 0x274   : > { %v4001_v63 = vsel %vm8057_vm8, %v3815_v42, %v4000_v19  ;;  %4417 = vrot.lane.b32.xlu0 %v4296_v25, %s7971_s25  ;;  %v5119_v34 = vsel %vm1397_vm9, %v5117_v45, %v5118_v3  ;;  %v3414_v12 = vadd.f32 %v3361_v54, %v2544_v56  ;;  %v9703_v46 = vrot.slane %v3793_v15, 7  ;;  %v9712_v3 = vld [vmem:[#allocation3 + $0x5c] ss:$0 sps:$4 sm:$0x11]   ;;  %v7503_v42 = vpop.f32.mrf.mxu1  ;;  %v5665_v25 = vld [vmem:[#allocation3 + $0x54] sm:$0xf] }
 0x275   : > { %4002 = vst [vmem:[#allocation3 + $0xa8] sm:$0xf] %v4001_v63  ;;  %v3818_v39 = vshrl.u32 %v7240_v33, 16  ;;  %v3821_v38 = vshll.u32 %v7240_v33, 16  ;;  %v9707_v61 = vadd.f32 %v7502_v49, %v9300_v26  ;;  %v4875_v11 = vshll.u32 %v9654_v5, 16  ;;  %v7538_v63 = vpop.f32.mrf.mxu0 }
 0x276   : > { %5158 = vrot.lane.b32.xlu1 %v5119_v34, %s7970_s24  ;;  %v3453_v57 = vadd.f32 %v9595_v6, %v3414_v12  ;;  %v4880_v48 = vshll.u32 %v9641_v41, 16  ;;  %v7176_v58 = vcombine.low %v5708_v52, %v5666_v55  ;;  %v3798_v19 = vor.u32 %v3796_v13, %v9703_v46 }
 0x277   : > { %v3820_v62 = vrot.slane %v3818_v39, 7  ;;  %v4873_v23 = vshrl.u32 %v9654_v5, 16  ;;  %v6135_v7 = vrot.slane %v9697_v20, 1  ;;  %v3799_v26 = vrot.slane %v9703_v46, 4  ;;  %v4686_v39 = vld [vmem:[#allocation3 + $0x54] sm:$0xe] }
 0x278   : > { %v3485_v49 = vmax.f32 %v3453_v57, 0.0  ;;  %v4877_v54 = vrot.slane %v4875_v11, 1  ;;  %v6134_v56 = vrot.slane %v7176_v58, 1  ;;  %v3994_v41 = vsel %vm8057_vm8, %v3798_v19, %v3993_v47  ;;  %v4036_v57 = vld [vmem:[#allocation3 + $0x58] sm:$0xf] }
 0x279   : > { %v3823_v45 = vor.u32 %v3821_v38, %v3820_v62  ;;  %v3825_v15 = vrot.slane %v3820_v62, 4  ;;  %v4882_v33 = vrot.slane %v4880_v48, 1  ;;  %3995 = vst [vmem:[#allocation3 + $0x9c] sm:$0xf] %v3994_v41  ;;  %v9723_v52 = vcombine.low %v5665_v25, %v5666_v55  ;;  %v403_v11 = vld [vmem:[#allocation3 + $0xc0] sm:$0x1] }
 0x27a   : > { %v7238_v13 = vpack.c.bf16 %v3485_v49, %v3485_v49  ;;  %v4878_v34 = vor.u32 %v4877_v54, %v4873_v23  ;;  %v6136_v12 = vsel %vm1397_vm9, %v6134_v56, %v6135_v7  ;;  %v2557_v38 = vadd.f32 %v2556_v31, %v9302_v30  ;;  %v4644_v48 = vld [vmem:[#allocation3 + $0x54] sm:$0xf]  ;;  %v9731_v23 = vld [vmem:[#allocation3 + $0x64] sm:$0xf] }
 0x27b   : > { %v3824_v58 = vsel %vm8050_vm7, %v3816_v40, %v3823_v45  ;;  %v4005_v47 = vsel %vm8013_vm2, %v3825_v15, %v4004_v9  ;;  %6177 = vrot.lane.b32.xlu1 %v6136_v12, %s7970_s24  ;;  %v7090_v19 = vcombine.low %v4686_v39, %v4645_v2  ;;  %v4076_v62 = vld [vmem:[#allocation3 + $0x54] sm:$0xe]  ;;  %v2568_v40 = vadd.f32 %v7503_v42, %v9306_v21  ;;  %v2559_v9 = vpop.f32.mrf.mxu1  ;;  %v9737_v54 = vld [vmem:[#allocation3 + $0x68] ss:$0 sps:$4 sm:$0x11]   ;;  %v3374_v15 = vpop.f32.mrf.mxu0 }
 0x27c   : > { %4003 = vst.msk [vmem:[#allocation3 + $0xac] sm:$0xf] %vm226_vm5, %v3824_v58  ;;  %4006 = vst [vmem:[#allocation3 + $0xb0] sm:$0x1] %v4005_v47  ;;  %v3801_v55 = vshrl.u32 %v7238_v13, 16  ;;  %v4883_v7 = vsel %vm1124_vm10, %v4878_v34, %v4882_v33  ;;  %v5115_v49 = vrot.slane %v9712_v3, 1  ;;  %v7043_v41 = vcombine.low %v4076_v62, %v4036_v57 }
 0x27d   : > { %v3804_v56 = vshll.u32 %v7238_v13, 16  ;;  %5024 = vrot.lane.b32.xlu0 %v4883_v7, %s7971_s25  ;;  %v5114_v30 = vrot.slane %v7090_v19, 1  ;;  %v4035_v31 = vld [vmem:[#allocation3 + $0x54] sm:$0xf]  ;;  %v4507_v45 = vrot.slane %v9717_v59, 1  ;;  %v9741_v12 = vcombine.low %v4644_v48, %v4645_v2  ;;  %v9754_v19 = vpop.permute.xlu0 %4405 }
 0x27e   : > { %v3803_v25 = vrot.slane %v3801_v55, 7  ;;  %v9743_v33 = vcombine.low %v4035_v31, %v4036_v57  ;;  %v404_v21 = vsel %vm8013_vm2, 0, %v403_v11  ;;  %v5667_v42 = vld [vmem:[#allocation3 + $0x60] sm:$0xf]  ;;  %v3997_v34 = vld [vmem:[#allocation3 + $0xa4] sm:$0x1]  ;;  %v9748_v13 = vadd.f32 %v2559_v9, %v9312_v1  ;;  %v7539_v9 = vpop.f32.mrf.mxu0 }
 0x27f   : > { %v4506_v39 = vrot.slane %v7043_v41, 1  ;;  %405 = vst [vmem:[#allocation3 + $0xc0] sm:$0x1] %v404_v21  ;;  %v3419_v58 = vadd.f32 %v7538_v63, %v9707_v61  ;;  %v9752_v47 = vcombine.low %v5667_v42, %v9731_v23  ;;  %v5116_v48 = vsel %vm1397_vm9, %v5114_v30, %v5115_v49  ;;  %v400_v62 = vld [vmem:[#allocation3 + $0xb4] sm:$0x1] }
 0x280   : > { %v3806_v2 = vor.u32 %v3804_v56, %v3803_v25  ;;  %v3808_v57 = vrot.slane %v3803_v25, 4  ;;  %v5927_v11 = vshll.u32 %v9737_v54, 16  ;;  %v4909_v63 = vshrl.u32 %v9695_v50, 16  ;;  %v457_v7 = vld [vmem:[#allocation3 + $0xc8] sm:$0x1] }
 0x281   : > { %10799 = vst [vmem:[#allocation7_spill] sm:$0xff] %v9752_v47  ;;  %5156 = vrot.lane.b32.xlu0 %v5116_v48, %s7970_s24  ;;  %v4508_v1 = vsel %vm1397_vm9, %v4506_v39, %v4507_v45  ;;  %v3458_v55 = vadd.f32 %v9595_v6, %v3419_v58  ;;  %v5922_v61 = vshll.u32 %v9752_v47, 16  ;;  %v5920_v30 = vshrl.u32 %v9752_v47, 16  ;;  %v9778_v48 = vpop.permute.xlu0 %4533 }
 0x282   : > { %v3807_v49 = vsel %vm8050_vm7, %v3799_v26, %v3806_v2  ;;  %v3998_v56 = vsel %vm8013_vm2, %v3808_v57, %v3997_v34  ;;  %4547 = vrot.lane.b32.xlu1 %v4508_v1, %s7970_s24  ;;  %v4911_v31 = vshll.u32 %v9695_v50, 16  ;;  %v4916_v25 = vshll.u32 %v9677_v43, 16 }
 0x283   : > { %3996 = vst.msk [vmem:[#allocation3 + $0xa0] sm:$0xf] %vm226_vm5, %v3807_v49  ;;  %3999 = vst [vmem:[#allocation3 + $0xa4] sm:$0x1] %v3998_v56  ;;  %v3490_v41 = vmax.f32 %v3458_v55, 0.0  ;;  %v5924_v45 = vrot.slane %v5922_v61, 1  ;;  %v3417_v21 = vadd.f32 %v3374_v15, %v2557_v38  ;;  %v3420_v34 = vadd.f32 %v7539_v9, %v2568_v40 }
 0x284   : > { %v401_v46 = vsel %vm8013_vm2, 0, %v400_v62  ;;  %v4913_v26 = vrot.slane %v4911_v31, 1  ;;  %v458_v42 = vsel %vm8023_vm4, 0, %v457_v7  ;;  %v5929_v2 = vrot.slane %v5927_v11, 1  ;;  %v454_v49 = vld [vmem:[#allocation3 + $0xbc] sm:$0x1] }
 0x285   : > { %402 = vst [vmem:[#allocation3 + $0xb4] sm:$0x1] %v401_v46  ;;  %v7243_v39 = vpack.c.bf16 %v3490_v41, %v3490_v41  ;;  %v5925_v58 = vor.u32 %v5924_v45, %v5920_v30  ;;  %v4918_v57 = vrot.slane %v4916_v25, 1  ;;  %459 = vst [vmem:[#allocation3 + $0xc8] sm:$0x1] %v458_v42  ;;  %v3456_v43 = vadd.f32 %v9595_v6, %v3417_v21 }
 0x286   : > { %v4914_v1 = vor.u32 %v4913_v26, %v4909_v63  ;;  %v3459_v55 = vadd.f32 %v9595_v6, %v3420_v34  ;;  %v4899_v62 = vshll.u32 %v9741_v12, 16  ;;  %v4897_v15 = vshrl.u32 %v9741_v12, 16  ;;  %v4014_v45 = vld [vmem:[#allocation3 + $0xc0] sm:$0xf] }
 0x287   : > { %v3844_v61 = vshrl.u32 %v7243_v39, 16  ;;  %v5930_v38 = vsel %vm1124_vm10, %v5925_v58, %v5929_v2  ;;  %v4904_v40 = vshll.u32 %v9712_v3, 16  ;;  %v3488_v7 = vmax.f32 %v3456_v43, 0.0  ;;  %v3377_v2 = vpop.f32.mrf.mxu0 }
 0x288   : > { %6051 = vrot.lane.b32.xlu0 %v5930_v38, %s7971_s25  ;;  %v4919_v11 = vsel %vm1124_vm10, %v4914_v1, %v4918_v57  ;;  %v3491_v9 = vmax.f32 %v3459_v55, 0.0  ;;  %v4901_v63 = vrot.slane %v4899_v62, 1  ;;  %v3847_v30 = vshll.u32 %v7243_v39, 16  ;;  %v9794_v39 = vpop.permute.xlu0 %6167  ;;  %v4649_v62 = vld [vmem:[#allocation3 + $0x70] sm:$0xf] }
 0x289   : > { %v3846_v56 = vrot.slane %v3844_v61, 7  ;;  %5030 = vrot.lane.b32.xlu1 %v4919_v11, %s7971_s25  ;;  %v4906_v31 = vrot.slane %v4904_v40, 1  ;;  %v5910_v41 = vshll.u32 %v9723_v52, 16  ;;  %v7241_v25 = vpack.c.bf16 %v3488_v7, %v3488_v7  ;;  %10800 = vst [vmem:[#allocation8_spill] sm:$0xff] %v9794_v39  ;;  %v4688_v40 = vld [vmem:[#allocation3 + $0x6c] sm:$0xe]  ;;  %v9799_v7 = vpop.permute.xlu1 %5146 }
 0x28a   : > { %v7244_v46 = vpack.c.bf16 %v3491_v9, %v3491_v9  ;;  %v4902_v26 = vor.u32 %v4901_v63, %v4897_v15  ;;  %v5915_v3 = vshll.u32 %v9697_v20, 16  ;;  %v5908_v42 = vshrl.u32 %v9723_v52, 16  ;;  %v7878_v11 = vld [vmem:[#allocation3 + $0x74] ss:$0 sps:$4 sm:$0x11]  }
 0x28b   : > { %v3849_v21 = vor.u32 %v3847_v30, %v3846_v56  ;;  %v5912_v34 = vrot.slane %v5910_v41, 1  ;;  %v455_v58 = vsel %vm8023_vm4, 0, %v454_v49  ;;  %v3850_v57 = vrot.slane %v3846_v56, 4  ;;  %v9805_v30 = vld [vmem:[#allocation3 + $0x80] ss:$0 sps:$4 sm:$0x11]  }
 0x28c   : > { %v3827_v1 = vshrl.u32 %v7241_v25, 16  ;;  %v3830_v43 = vshll.u32 %v7241_v25, 16  ;;  %v3852_v55 = vshrl.u32 %v7244_v46, 16  ;;  %456 = vst [vmem:[#allocation3 + $0xbc] sm:$0x1] %v455_v58  ;;  %v4907_v20 = vsel %vm1124_vm10, %v4902_v26, %v4906_v31 }
 0x28d   : > { %v4015_v61 = vsel %vm8057_vm8, %v3849_v21, %v4014_v45  ;;  %v5913_v38 = vor.u32 %v5912_v34, %v5908_v42  ;;  %v5917_v15 = vrot.slane %v5915_v3, 1  ;;  %v3855_v49 = vshll.u32 %v7244_v46, 16  ;;  %5028 = vrot.lane.b32.xlu0 %v4907_v20, %s7971_s25  ;;  %v4007_v41 = vld [vmem:[#allocation3 + $0xb4] sm:$0xf]  ;;  %v4018_v45 = vld [vmem:[#allocation3 + $0xc8] sm:$0x1]  ;;  %v9814_v20 = vpop.permute.xlu0 %4537  ;;  %v9825_v35 = vpop.permute.xlu1 %4535 }
 0x28e   : > { %4016 = vst [vmem:[#allocation3 + $0xc0] sm:$0xf] %v4015_v61  ;;  %v9801_v9 = vrot.slane %v3827_v1, 7  ;;  %v3854_v63 = vrot.slane %v3852_v55, 7  ;;  %v3418_v56 = vadd.f32 %v3377_v2, %v9748_v13  ;;  %v4300_v25 = vshll.u32 %v9743_v33, 16 }
 0x28f   : > { %v5918_v31 = vsel %vm1124_vm10, %v5913_v38, %v5917_v15  ;;  %v4305_v26 = vshll.u32 %v9717_v59, 16  ;;  %v7092_v3 = vcombine.low %v4688_v40, %v4649_v62  ;;  %v4298_v46 = vshrl.u32 %v9743_v33, 16  ;;  %v4651_v13 = vld [vmem:[#allocation3 + $0x7c] sm:$0xf]  ;;  %v4689_v61 = vld [vmem:[#allocation3 + $0x78] sm:$0xe] }
 0x290   : > { %v3832_v21 = vor.u32 %v3830_v43, %v9801_v9  ;;  %v3857_v42 = vor.u32 %v3855_v49, %v3854_v63  ;;  %v3859_v34 = vrot.slane %v3854_v63, 4  ;;  %6049 = vrot.lane.b32.xlu1 %v5918_v31, %s7971_s25  ;;  %v3457_v58 = vadd.f32 %v9595_v6, %v3418_v56  ;;  %v4648_v15 = vld [vmem:[#allocation3 + $0x6c] sm:$0xf]  ;;  %v4650_v56 = vld [vmem:[#allocation3 + $0x78] sm:$0xf] }
 0x291   : > { %v4302_v2 = vrot.slane %v4300_v25, 1  ;;  %v4307_v1 = vrot.slane %v4305_v26, 1  ;;  %v5120_v55 = vrot.slane %v7092_v3, 1  ;;  %v5121_v40 = vrot.slane %v7878_v11, 1 }
 0x292   : > { %v4008_v59 = vsel %vm8057_vm8, %v3832_v21, %v4007_v41  ;;  %v3858_v43 = vsel %vm8050_vm7, %v3850_v57, %v3857_v42  ;;  %v4019_v38 = vsel %vm8013_vm2, %v3859_v34, %v4018_v45  ;;  %v3489_v6 = vmax.f32 %v3457_v58, 0.0  ;;  %v9831_v26 = vld [vmem:[#allocation3 + $0x8c] ss:$0 sps:$4 sm:$0x11]  }
 0x293   : > { %4009 = vst [vmem:[#allocation3 + $0xb4] sm:$0xf] %v4008_v59  ;;  %4017 = vst.msk [vmem:[#allocation3 + $0xc4] sm:$0xf] %vm226_vm5, %v3858_v43  ;;  %v4303_v63 = vor.u32 %v4302_v2, %v4298_v46  ;;  %v9823_v49 = vcombine.low %v4648_v15, %v4649_v62  ;;  %v7093_v31 = vcombine.low %v4689_v61, %v4651_v13  ;;  %v5124_v57 = vrot.slane %v9805_v30, 1 }
 0x294   : > { %4020 = vst [vmem:[#allocation3 + $0xc8] sm:$0x1] %v4019_v38  ;;  %v5122_v41 = vsel %vm1397_vm9, %v5120_v55, %v5121_v40  ;;  %v9829_v25 = vcombine.low %v4650_v56, %v4651_v13  ;;  %v4928_v45 = vshll.u32 %v7878_v11, 16  ;;  %v9833_v3 = vld [vmem:[#allocation3 + $0x74] ss:$0 sps:$4 sm:$0x11]   ;;  %v7242_v21 = vpack.c.bf16 %v3489_v6, %v3489_v6  ;;  %v9846_v40 = vpop.permute.xlu0 %5144 }
 0x295   : > { %10801 = vst [vmem:[#allocation9_spill] sm:$0xff] %v9823_v49  ;;  %v4308_v42 = vsel %vm1124_vm10, %v4303_v63, %v4307_v1  ;;  %5160 = vrot.lane.b32.xlu0 %v5122_v41, %s7970_s24  ;;  %v5123_v62 = vrot.slane %v7093_v31, 1  ;;  %v4921_v34 = vshrl.u32 %v9823_v49, 16  ;;  %v4653_v46 = vld [vmem:[#allocation3 + $0x88] sm:$0xf]  ;;  %v4923_v58 = vshll.u32 %v9823_v49, 16 }
 0x296   : > { %10802 = vst [vmem:[#allocation10_spill] sm:$0xff] %v9829_v25  ;;  %4419 = vrot.lane.b32.xlu1 %v4308_v42, %s7971_s25  ;;  %v4930_v13 = vrot.slane %v4928_v45, 1  ;;  %v4933_v11 = vshrl.u32 %v9829_v25, 16  ;;  %v4935_v2 = vshll.u32 %v9829_v25, 16  ;;  %v5669_v55 = vld [vmem:[#allocation3 + $0x6c] sm:$0xf] }
 0x297   : > { %v9842_v61 = vld [vmem:[#allocation3 + $0x70] sm:$0xf]  ;;  %v3835_v59 = vshrl.u32 %v7242_v21, 16  ;;  %v3838_v1 = vshll.u32 %v7242_v21, 16  ;;  %v5125_v43 = vsel %vm1397_vm9, %v5123_v62, %v5124_v57  ;;  %v4940_v38 = vshll.u32 %v9805_v30, 16  ;;  %v9854_v21 = vpop.permute.xlu1 %5018 }
 0x298   : > { %v4690_v15 = vld [vmem:[#allocation3 + $0x84] sm:$0xe]  ;;  %v4925_v6 = vrot.slane %v4923_v58, 1  ;;  %v4937_v63 = vrot.slane %v4935_v2, 1  ;;  %v5127_v41 = vrot.slane %v9831_v26, 1  ;;  %v9852_v39 = vcombine.low %v5669_v55, %v9842_v61 }
 0x299   : > { %v4652_v56 = vld [vmem:[#allocation3 + $0x84] sm:$0xf]  ;;  %v7094_v31 = vcombine.low %v4690_v15, %v4653_v46  ;;  %v3837_v45 = vrot.slane %v3835_v59, 7  ;;  %v4942_v42 = vrot.slane %v4940_v38, 1  ;;  %v4011_v57 = vld [vmem:[#allocation3 + $0xbc] sm:$0x1] }
 0x29a   : > { %v9849_v47 = vcombine.low %v4652_v56, %v4653_v46  ;;  %10804 = vst [vmem:[#allocation12_spill] sm:$0xff] %v9852_v39  ;;  %5162 = vrot.lane.b32.xlu1 %v5125_v43, %s7970_s24  ;;  %v4926_v30 = vor.u32 %v4925_v6, %v4921_v34  ;;  %v4938_v62 = vor.u32 %v4937_v63, %v4933_v11  ;;  %v5939_v2 = vshll.u32 %v9833_v3, 16  ;;  %v4655_v15 = vld [vmem:[#allocation3 + $0x94] sm:$0xf]  ;;  %v4654_v34 = vld [vmem:[#allocation3 + $0x90] sm:$0xf] }
 0x29b   : > { %v5126_v58 = vrot.slane %v7094_v31, 1  ;;  %v3833_v53 = vrot.slane %v9801_v9, 4  ;;  %v3840_v59 = vor.u32 %v3838_v1, %v3837_v45  ;;  %v3842_v38 = vrot.slane %v3837_v45, 4  ;;  %v9860_v56 = vld [vmem:[#allocation3 + $0x98] ss:$0 sps:$4 sm:$0x11]   ;;  %v9871_v45 = vpop.permute.xlu0 %6039 }
 0x29c   : > { %10803 = vst [vmem:[#allocation11_spill] sm:$0xff] %v9849_v47  ;;  %v5934_v46 = vshll.u32 %v9852_v39, 16  ;;  %v4931_v55 = vsel %vm1124_vm10, %v4926_v30, %v4930_v13  ;;  %v4943_v25 = vsel %vm1124_vm10, %v4938_v62, %v4942_v42  ;;  %v5932_v43 = vshrl.u32 %v9852_v39, 16  ;;  %v4691_v63 = vld [vmem:[#allocation3 + $0x90] sm:$0xe]  ;;  %10805 = vst [vmem:[#allocation5_spill] sm:$0xff] %v9871_v45 }
 0x29d   : > { %v3841_v11 = vsel %vm8050_vm7, %v3833_v53, %v3840_v59  ;;  %v4012_v6 = vsel %vm8013_vm2, %v3842_v38, %v4011_v57  ;;  %5032 = vrot.lane.b32.xlu0 %v4931_v55, %s7971_s25  ;;  %v5128_v9 = vsel %vm1397_vm9, %v5126_v58, %v5127_v41  ;;  %v4657_v31 = vld [vmem:[#allocation3 + $0xa0] sm:$0xf]  ;;  %v5941_v13 = vrot.slane %v5939_v2, 1  ;;  %v7892_v57 = vld [vmem:[#allocation3 + $0xa4] ss:$0 sps:$4 sm:$0x11]  }
 0x29e   : > { %v5936_v1 = vrot.slane %v5934_v46, 1  ;;  %4010 = vst.msk [vmem:[#allocation3 + $0xb8] sm:$0xf] %vm226_vm5, %v3841_v11  ;;  %4013 = vst [vmem:[#allocation3 + $0xbc] sm:$0x1] %v4012_v6  ;;  %5034 = vrot.lane.b32.xlu1 %v4943_v25, %s7971_s25  ;;  %v4947_v29 = vshll.u32 %v9849_v47, 16  ;;  %v7095_v42 = vcombine.low %v4691_v63, %v4655_v15  ;;  %v9879_v58 = vcombine.low %v4654_v34, %v4655_v15  ;;  %v9881_v46 = vpop.permute.xlu1 %4407 }
 0x29f   : > { %v4952_v53 = vshll.u32 %v9831_v26, 16  ;;  %v4945_v41 = vshrl.u32 %v9849_v47, 16  ;;  %v5130_v62 = vrot.slane %v9860_v56, 1  ;;  %v4656_v59 = vld [vmem:[#allocation3 + $0x9c] sm:$0xf]  ;;  %v5133_v34 = vrot.slane %v7892_v57, 1 }
 0x2a0   : > { %v5937_v30 = vor.u32 %v5936_v1, %v5932_v43  ;;  %10806 = vst [vmem:[#allocation4_spill] sm:$0xff] %v9879_v58  ;;  %v4692_v38 = vld [vmem:[#allocation3 + $0x9c] sm:$0xe]  ;;  %v4949_v55 = vrot.slane %v4947_v29, 1  ;;  %v5129_v25 = vrot.slane %v7095_v42, 1  ;;  %v9883_v11 = vcombine.low %v4656_v59, %v4657_v31 }
 0x2a1   : > { %v7096_v2 = vcombine.low %v4692_v38, %v4657_v31  ;;  %5164 = vrot.lane.b32.xlu0 %v5128_v9, %s7970_s24  ;;  %v4959_v43 = vshll.u32 %v9879_v58, 16  ;;  %v4954_v15 = vrot.slane %v4952_v53, 1  ;;  %v4659_v1 = vld [vmem:[#allocation3 + $0xac] sm:$0xf]  ;;  %v4957_v63 = vshrl.u32 %v9879_v58, 16  ;;  %v9892_v9 = vpop.permute.xlu0 %4409 }
 0x2a2   : > { %v5942_v26 = vsel %vm1124_vm10, %v5937_v30, %v5941_v13  ;;  %v4950_v6 = vor.u32 %v4949_v55, %v4945_v41  ;;  %v4964_v29 = vshll.u32 %v9860_v56, 16  ;;  %v4971_v31 = vshll.u32 %v9883_v11, 16  ;;  %v4658_v42 = vld [vmem:[#allocation3 + $0xa8] sm:$0xf]  ;;  %v4660_v55 = vld [vmem:[#allocation3 + $0xb4] sm:$0xf]  ;;  %v9901_v49 = vpop.permute.xlu1 %5150 }
 0x2a3   : > { %6053 = vrot.lane.b32.xlu1 %v5942_v26, %s7971_s25  ;;  %v4961_v39 = vrot.slane %v4959_v43, 1  ;;  %v4693_v59 = vld [vmem:[#allocation3 + $0xa8] sm:$0xe]  ;;  %v5131_v30 = vsel %vm1397_vm9, %v5129_v25, %v5130_v62  ;;  %v5132_v38 = vrot.slane %v7096_v2, 1  ;;  %v4566_v53 = vsel %vm1478_vm12, %v9175_v10, %v9754_v19  ;;  %v4694_v47 = vld [vmem:[#allocation3 + $0xb4] sm:$0xe] }
 0x2a4   : > { %v4955_v13 = vsel %vm1124_vm10, %v4950_v6, %v4954_v15  ;;  %v7895_v41 = vld [vmem:[#allocation3 + $0xb0] ss:$0 sps:$4 sm:$0x11]   ;;  %v4969_v26 = vshrl.u32 %v9883_v11, 16  ;;  %v4973_v43 = vrot.slane %v4971_v31, 1  ;;  %v7097_v45 = vcombine.low %v4693_v59, %v4659_v1 }
 0x2a5   : > { %5036 = vrot.lane.b32.xlu0 %v4955_v13, %s7971_s25  ;;  %v4962_v56 = vor.u32 %v4961_v39, %v4957_v63  ;;  %v4661_v58 = vld [vmem:[#allocation3 + $0xb8] sm:$0xf]  ;;  %v4976_v62 = vshll.u32 %v7892_v57, 16  ;;  %v9904_v25 = vcombine.low %v4658_v42, %v4659_v1  ;;  %v4598_v10 = vsel %vm1511_vm13, %v4566_v53, %v9778_v48  ;;  %v7898_v19 = vld [vmem:[#allocation3 + $0xbc] ss:$0 sps:$4 sm:$0x11]  }
 0x2a6   : > { %v7098_v2 = vcombine.low %v4694_v47, %v4661_v58  ;;  %v4966_v6 = vrot.slane %v4964_v29, 1  ;;  %v9908_v39 = vcombine.low %v4660_v55, %v4661_v58  ;;  %7580 = vmatprep.mubr.msk.bf16.mxu0 %vm2168_vm14, %v4598_v10  ;;  %v5134_v15 = vsel %vm1397_vm9, %v5132_v38, %v5133_v34  ;;  %v4663_v31 = vld [vmem:[#allocation3 + $0xc4] sm:$0xf]  ;;  %v4662_v48 = vld [vmem:[#allocation3 + $0xc0] sm:$0xf] }
 0x2a7   : > { %5166 = vrot.lane.b32.xlu1 %v5131_v30, %s7970_s24  ;;  %10807 = vst [vmem:[#allocation13_spill] sm:$0xff] %v9904_v25  ;;  %v4974_v63 = vor.u32 %v4973_v43, %v4969_v26  ;;  %v5135_v1 = vrot.slane %v7097_v45, 1  ;;  %v5136_v42 = vrot.slane %v7895_v41, 1  ;;  %v4983_v59 = vshll.u32 %v9904_v25, 16  ;;  %v9919_v30 = vld [vmem:[#allocation3 + $0x64] sm:$0xf] }
 0x2a8   : > { %v4967_v57 = vsel %vm1124_vm10, %v4962_v56, %v4966_v6  ;;  %v4978_v47 = vrot.slane %v4976_v62, 1  ;;  %v5138_v58 = vrot.slane %v7098_v2, 1  ;;  %v5139_v29 = vrot.slane %v7898_v19, 1  ;;  %v4695_v45 = vld [vmem:[#allocation3 + $0xc0] sm:$0xe]  ;;  %v7916_v26 = vld [vmem:[%s10745_s3 + $0xc] sm:$0xff]   ;;  %v9927_v43 = vpop.permute.xlu1 %6169 }
 0x2a9   : > { %5168 = vrot.lane.b32.xlu0 %v5134_v15, %s7970_s24  ;;  %v9915_v13 = vpop.permute.xlu0 %5016  ;;  %v4995_v34 = vshll.u32 %v9908_v39, 16  ;;  %v4981_v38 = vshrl.u32 %v9904_v25, 16  ;;  %v4985_v53 = vrot.slane %v4983_v59, 1  ;;  %v4988_v55 = vshll.u32 %v7895_v41, 16 }
 0x2aa   : > { %v9922_v56 = vcombine.low %v4662_v48, %v4663_v31  ;;  %v4979_v62 = vsel %vm1124_vm10, %v4974_v63, %v4978_v47  ;;  %v4993_v10 = vshrl.u32 %v9908_v39, 16  ;;  %v5000_v6 = vshll.u32 %v7898_v19, 16  ;;  %v9931_v15 = vld [vmem:[#allocation3 + $0xc8] ss:$0 sps:$4 sm:$0x11]  }
 0x2ab   : > { %5038 = vrot.lane.b32.xlu1 %v4967_v57, %s7971_s25  ;;  %v4997_v2 = vrot.slane %v4995_v34, 1  ;;  %v5137_v41 = vsel %vm1397_vm9, %v5135_v1, %v5136_v42  ;;  %v4986_v57 = vor.u32 %v4985_v53, %v4981_v38  ;;  %v7099_v59 = vcombine.low %v4695_v45, %v4663_v31  ;;  %v7960_v48 = vld [vmem:[%s10745_s3 + $0x14] ss:$0 sps:$4 sm:$0xff]   ;;  %v7909_v63 = vld [vmem:[%s10745_s3] sm:$0xff]   ;;  %v5709_v34 = vld [vmem:[#allocation3 + $0x60] sm:$0xe] }
 0x2ac   : > { %v5286_v25 = vsel %vm2201_vm11, %v7960_v48, 0  ;;  %v5140_v19 = vsel %vm1397_vm9, %v5138_v58, %v5139_v29  ;;  %v5007_v1 = vshll.u32 %v9922_v56, 16  ;;  %v4037_v31 = vld [vmem:[#allocation3 + $0x60] sm:$0xf]  ;;  %v4990_v38 = vrot.slane %v4988_v55, 1 }
 0x2ad   : > { %5040 = vrot.lane.b32.xlu0 %v4979_v62, %s7971_s25  ;;  %v4998_v47 = vor.u32 %v4997_v2, %v4993_v10  ;;  %7541 = vmatpush3.bf16.msra.mxu1 %v5286_v25  ;;  %v9945_v42 = vpop.permute.xlu0 %6171  ;;  %v7177_v53 = vcombine.low %v5709_v34, %v9731_v23  ;;  %v7961_v45 = vld [vmem:[%s10745_s3 + $0x8] ss:$0 sps:$4 sm:$0xff]   ;;  %v9958_v25 = vld [vmem:[%s10745_s3 + $0x20] ss:$0 sps:$4 sm:$0xff]   ;;  %v5002_v58 = vrot.slane %v5000_v6, 1  ;;  %v5142_v29 = vrot.slane %v9931_v15, 1 }
 0x2ae   : > { %v5491_v62 = vsel %vm2201_vm11, %v7961_v45, 0  ;;  %7542 = vmatprep.subr.bf16.mxu1 %v7916_v26  ;;  %v4991_v23 = vsel %vm1124_vm10, %v4986_v57, %v4990_v38  ;;  %v5141_v55 = vrot.slane %v7099_v59, 1  ;;  %v5009_v10 = vrot.slane %v5007_v1, 1  ;;  %v9964_v48 = vld [vmem:[#allocation3 + $0x70] sm:$0xf]  ;;  %v9966_v34 = vpop.permute.xlu1 %4539 }
 0x2af   : > { %5170 = vrot.lane.b32.xlu1 %v5137_v41, %s7970_s24  ;;  %v9953_v41 = vcombine.low %v4037_v31, %v9919_v30  ;;  %7577 = vmatpush3.bf16.msra.mxu0 %v5491_v62  ;;  %v5003_v6 = vsel %vm1124_vm10, %v4998_v47, %v5002_v58  ;;  %v9970_v31 = vld [vmem:[#allocation3 + $0x68] ss:$0 sps:$4 sm:$0x11]   ;;  %v5710_v45 = vld [vmem:[#allocation3 + $0x6c] sm:$0xe]  ;;  %v6138_v57 = vrot.slane %v9737_v54, 1  ;;  %v4568_v47 = vsel %vm1478_vm12, %v9404_v36, %v9881_v46 }
 0x2b0   : > { %7578 = vmatprep.subr.bf16.mxu0 %v7909_v63  ;;  %v5005_v59 = vshrl.u32 %v9922_v56, 16  ;;  %v5012_v1 = vshll.u32 %v9931_v15, 16  ;;  %v4039_v38 = vld [vmem:[#allocation3 + $0x6c] sm:$0xf]  ;;  %v9984_v54 = vld [vmem:[#allocation3 + $0x7c] sm:$0xf]  ;;  %v5143_v15 = vsel %vm1397_vm9, %v5141_v55, %v5142_v29 }
 0x2b1   : > { %5172 = vrot.lane.b32.xlu0 %v5140_v19, %s7970_s24  ;;  %v4312_v2 = vshll.u32 %v9953_v41, 16  ;;  %7543 = vmatpush3.bf16.msra.mxu1 %v7916_v26  ;;  %v6137_v19 = vrot.slane %v7177_v53, 1  ;;  %v9982_v26 = vcombine.low %v4039_v38, %v9964_v48  ;;  %v9986_v53 = vpop.permute.xlu0 %4541  ;;  %v4317_v36 = vshll.u32 %v9970_v31, 16  ;;  %v4077_v55 = vld [vmem:[#allocation3 + $0x60] sm:$0xe] }
 0x2b2   : > { %7653 = vmatprep.subr.msk.bf16.mxu1 %vm2201_vm11, %v9958_v25  ;;  %v5010_v58 = vor.u32 %v5009_v10, %v5005_v59  ;;  %v5014_v29 = vrot.slane %v5012_v1, 1  ;;  %v10003_v10 = vld [vmem:[#allocation3 + $0x74] ss:$0 sps:$4 sm:$0x11]  }
 0x2b3   : > { %5042 = vrot.lane.b32.xlu1 %v4991_v23, %s7971_s25  ;;  %v4314_v62 = vrot.slane %v4312_v2, 1  ;;  %v7178_v23 = vcombine.low %v5710_v45, %v9842_v61  ;;  %7579 = vmatpush3.bf16.msra.mxu0 %v7909_v63  ;;  %v4600_v61 = vsel %vm1511_vm13, %v4568_v47, %v9825_v35  ;;  %v4310_v63 = vshrl.u32 %v9953_v41, 16  ;;  %v5671_v45 = vld [vmem:[#allocation3 + $0x78] sm:$0xf] }
 0x2b4   : > { %v4324_v46 = vshll.u32 %v9982_v26, 16  ;;  %v4570_v2 = vsel %vm1478_vm12, %v9397_v16, %v9892_v9  ;;  %v5179_v35 = vsel %vm1478_vm12, %v9392_v32, %v9854_v21  ;;  %v10007_v59 = vcombine.low %v5671_v45, %v9984_v54  ;;  %v10009_v38 = vpop.permute.xlu1 %5022 }
 0x2b5   : > { %5044 = vrot.lane.b32.xlu0 %v5003_v6, %s7971_s25  ;;  %v6139_v6 = vsel %vm1397_vm9, %v6137_v19, %v6138_v57  ;;  %v4315_v47 = vor.u32 %v4314_v62, %v4310_v63  ;;  %v6140_v16 = vrot.slane %v7178_v23, 1  ;;  %v6141_v9 = vrot.slane %v9833_v3, 1  ;;  %v10013_v57 = vld [vmem:[#allocation3 + $0x88] sm:$0xf] }
 0x2b6   : > { %7581 = vmatmul.mubr.msk.bf16.vlgmr.msra.gmra.mxu0 %vm2168_vm14, %v4600_v61  ;;  %v7044_v19 = vcombine.low %v4077_v55, %v9919_v30  ;;  %v5015_v32 = vsel %vm1124_vm10, %v5010_v58, %v5014_v29  ;;  %v4326_v21 = vrot.slane %v4324_v46, 1  ;;  %v5946_v1 = vshll.u32 %v10007_v59, 16  ;;  %v10023_v23 = vld [vmem:[#allocation3 + $0x80] ss:$0 sps:$4 sm:$0x11]   ;;  %v10029_v61 = vpop.permute.xlu0 %5148 }
 0x2b7   : > { %5174 = vrot.lane.b32.xlu1 %v5143_v15, %s7970_s24  ;;  %v4602_v15 = vsel %vm1511_vm13, %v4570_v2, %v9814_v20  ;;  %v4319_v62 = vrot.slane %v4317_v36, 1  ;;  %v5211_v3 = vsel %vm1511_vm13, %v5179_v35, %v9799_v7  ;;  %v5177_v30 = vsel %vm1478_vm12, %v9417_v8, %v9915_v13  ;;  %v5673_v58 = vld [vmem:[#allocation3 + $0x84] sm:$0xf]  ;;  %v10037_v7 = vld [vmem:[#allocation3 + $0x7c] sm:$0xf] }
 0x2b8   : > { %7584 = vmatprep.mubr.msk.bf16.mxu0 %vm2168_vm14, %v4602_v15  ;;  %v4510_v63 = vrot.slane %v9970_v31, 1  ;;  %v4322_v20 = vshrl.u32 %v9982_v26, 16  ;;  %v4329_v36 = vshll.u32 %v10003_v10, 16  ;;  %v10035_v46 = vcombine.low %v5673_v58, %v10013_v57  ;;  %v4078_v29 = vld [vmem:[#allocation3 + $0x6c] sm:$0xe] }
 0x2b9   : > { %6179 = vrot.lane.b32.xlu0 %v6139_v6, %s7970_s24  ;;  %v4320_v2 = vsel %vm1124_vm10, %v4315_v47, %v4319_v62  ;;  %v4509_v45 = vrot.slane %v7044_v19, 1  ;;  %v5948_v6 = vrot.slane %v5946_v1, 1  ;;  %v5209_v8 = vsel %vm1511_vm13, %v5177_v30, %v9846_v40  ;;  %v5711_v40 = vld [vmem:[#allocation3 + $0x78] sm:$0xe] }
 0x2ba   : > { %10808 = vst [vmem:[#allocation14_spill] sm:$0xff] %v10035_v46  ;;  %v6142_v13 = vsel %vm1397_vm9, %v6140_v16, %v6141_v9  ;;  %v4327_v31 = vor.u32 %v4326_v21, %v4322_v20  ;;  %v7045_v35 = vcombine.low %v4078_v29, %v9964_v48  ;;  %v5958_v55 = vshll.u32 %v10035_v46, 16  ;;  %7544 = vmatprep.mubr.msk.bf16.mxu1 %vm2168_vm14, %v5209_v8  ;;  %v6042_v15 = vpop.permute.xlu1 %6041  ;;  %v10054_v48 = vld [vmem:[#allocation3 + $0x8c] ss:$0 sps:$4 sm:$0x11]  }
 0x2bb   : > { %5046 = vrot.lane.b32.xlu1 %v5015_v32, %s7971_s25  ;;  %v4041_v32 = vld [vmem:[#allocation3 + $0x78] sm:$0xf]  ;;  %v5944_v47 = vshrl.u32 %v10007_v59, 16  ;;  %v5951_v19 = vshll.u32 %v10023_v23, 16  ;;  %7545 = vmatmul.mubr.msk.bf16.vlgmr.msra.gmra.mxu1 %vm2168_vm14, %v5211_v3  ;;  %v4331_v16 = vrot.slane %v4329_v36, 1  ;;  %v4511_v21 = vsel %vm1397_vm9, %v4509_v45, %v4510_v63 }
 0x2bc   : > { %v10051_v1 = vcombine.low %v4041_v32, %v10037_v7  ;;  %v10056_v9 = vld [vmem:[#allocation3 + $0x88] sm:$0xf]  ;;  %v7179_v30 = vcombine.low %v5711_v40, %v9984_v54  ;;  %v4043_v20 = vld [vmem:[#allocation3 + $0x84] sm:$0xf]  ;;  %v4512_v3 = vrot.slane %v7045_v35, 1  ;;  %v4513_v36 = vrot.slane %v10003_v10, 1 }
 0x2bd   : > { %4421 = vrot.lane.b32.xlu0 %v4320_v2, %s7971_s25  ;;  %v5949_v62 = vor.u32 %v5948_v6, %v5944_v47  ;;  %v4332_v29 = vsel %vm1124_vm10, %v4327_v31, %v4331_v16  ;;  %v5960_v8 = vrot.slane %v5958_v55, 1  ;;  %v5953_v63 = vrot.slane %v5951_v19, 1  ;;  %v10069_v45 = vld [vmem:[#allocation3 + $0x80] ss:$0 sps:$4 sm:$0x11]  }
 0x2be   : > { %v4336_v58 = vshll.u32 %v10051_v1, 16  ;;  %v5712_v54 = vld [vmem:[#allocation3 + $0x84] sm:$0xe]  ;;  %v10072_v6 = vcombine.low %v4043_v20, %v10056_v9  ;;  %v6144_v32 = vrot.slane %v10023_v23, 1  ;;  %v5956_v47 = vshrl.u32 %v10035_v46, 16 }
 0x2bf   : > { %6181 = vrot.lane.b32.xlu1 %v6142_v13, %s7970_s24  ;;  %v10061_v2 = vpop.permute.xlu0 %6043  ;;  %v10066_v13 = vld [vmem:[#allocation3 + $0x94] sm:$0xf]  ;;  %v5963_v31 = vshll.u32 %v10054_v48, 16  ;;  %v7180_v10 = vcombine.low %v5712_v54, %v10013_v57  ;;  %v5675_v35 = vld [vmem:[#allocation3 + $0x90] sm:$0xf]  ;;  %v5954_v40 = vsel %vm1124_vm10, %v5949_v62, %v5953_v63  ;;  %v6143_v16 = vrot.slane %v7179_v30, 1 }
 0x2c0   : > { %v4338_v19 = vrot.slane %v4336_v58, 1  ;;  %v4514_v20 = vsel %vm1397_vm9, %v4512_v3, %v4513_v36  ;;  %v5961_v23 = vor.u32 %v5960_v8, %v5956_v47  ;;  %v4348_v46 = vshll.u32 %v10072_v6, 16  ;;  %v10095_v3 = vld [vmem:[#allocation3 + $0xa0] sm:$0xf] }
 0x2c1   : > { %4549 = vrot.lane.b32.xlu0 %v4511_v21, %s7970_s24  ;;  %v10080_v21 = vcombine.low %v5675_v35, %v10066_v13  ;;  %v6202_v57 = vsel %vm1478_vm12, %v9488_v28, %v6042_v15  ;;  %v4334_v62 = vshrl.u32 %v10051_v1, 16  ;;  %v4341_v30 = vshll.u32 %v10069_v45, 16  ;;  %v10098_v28 = vld [vmem:[#allocation3 + $0x8c] ss:$0 sps:$4 sm:$0x11]  }
 0x2c2   : > { %v10093_v63 = vsel %vm1511_vm13, %v6202_v57, %v9927_v43  ;;  %v5965_v8 = vrot.slane %v5963_v31, 1  ;;  %v6146_v54 = vrot.slane %v7180_v10, 1  ;;  %v6147_v47 = vrot.slane %v10054_v48, 1  ;;  %v10111_v57 = vld [vmem:[#allocation3 + $0x94] sm:$0xf] }
 0x2c3   : > { %4423 = vrot.lane.b32.xlu1 %v4332_v29, %s7971_s25  ;;  %v4412_v55 = vpop.permute.xlu1 %4411  ;;  %10809 = vst [vmem:[#allocation15_spill] sm:$0xff] %v10080_v21  ;;  %v4079_v29 = vld [vmem:[#allocation3 + $0x78] sm:$0xe]  ;;  %v6145_v35 = vsel %vm1397_vm9, %v6143_v16, %v6144_v32  ;;  %v4350_v10 = vrot.slane %v4348_v46, 1  ;;  %v4343_v32 = vrot.slane %v4341_v30, 1  ;;  %v6204_v4 = vsel %vm1478_vm12, %v9498_v51, %v10061_v2 }
 0x2c4   : > { %v7046_v58 = vcombine.low %v4079_v29, %v10037_v7  ;;  %v5970_v7 = vshll.u32 %v10080_v21, 16  ;;  %v4572_v43 = vsel %vm1478_vm12, %v9501_v18, %v4412_v55  ;;  %v5966_v31 = vsel %vm1124_vm10, %v5961_v23, %v5965_v8  ;;  %v4045_v29 = vld [vmem:[#allocation3 + $0x90] sm:$0xf]  ;;  %v4084_v2 = vld [vmem:[#allocation3 + $0xb4] sm:$0xe] }
 0x2c5   : > { %6055 = vrot.lane.b32.xlu0 %v5954_v40, %s7971_s25  ;;  %v4339_v40 = vor.u32 %v4338_v19, %v4334_v62  ;;  %v10114_v19 = vld [vmem:[#allocation3 + $0x98] ss:$0 sps:$4 sm:$0x11]   ;;  %v4604_v18 = vsel %vm1511_vm13, %v4572_v43, %v9966_v34  ;;  %v6148_v46 = vsel %vm1397_vm9, %v6146_v54, %v6147_v47  ;;  %v4516_v23 = vrot.slane %v10069_v45, 1 }
 0x2c6   : > { %v4414_v36 = vpop.permute.xlu0 %4413  ;;  %v4515_v16 = vrot.slane %v7046_v58, 1  ;;  %v4346_v62 = vshrl.u32 %v10072_v6, 16  ;;  %v4353_v8 = vshll.u32 %v10098_v28, 16  ;;  %7585 = vmatmul.mubr.msk.bf16.gmra.mxu0 %vm2168_vm14, %v4604_v18  ;;  %v10128_v43 = vcombine.low %v4045_v29, %v10111_v57 }
 0x2c7   : > { %4551 = vrot.lane.b32.xlu1 %v4514_v20, %s7970_s24  ;;  %v10100_v15 = vpop.permute.xlu1 %5154  ;;  %v5677_v20 = vld [vmem:[#allocation3 + $0x9c] sm:$0xf]  ;;  %v4574_v55 = vsel %vm1478_vm12, %v9516_v24, %v4414_v36  ;;  %v4344_v58 = vsel %vm1124_vm10, %v4339_v40, %v4343_v32  ;;  %v5975_v40 = vshll.u32 %v10114_v19, 16  ;;  %v4519_v29 = vrot.slane %v10098_v28, 1 }
 0x2c8   : > { %v10109_v48 = vcombine.low %v5677_v20, %v10095_v3  ;;  %v5972_v20 = vrot.slane %v5970_v7, 1  ;;  %v4351_v24 = vor.u32 %v4350_v10, %v4346_v62  ;;  %v4606_v36 = vsel %vm1511_vm13, %v4574_v55, %v9986_v53  ;;  %v5713_v7 = vld [vmem:[#allocation3 + $0x90] sm:$0xe]  ;;  %v10149_v32 = vld [vmem:[#allocation3 + $0xa4] ss:$0 sps:$4 sm:$0x11]  }
 0x2c9   : > { %6183 = vrot.lane.b32.xlu0 %v6145_v35, %s7970_s24  ;;  %v4080_v35 = vld [vmem:[#allocation3 + $0x84] sm:$0xe]  ;;  %7588 = vmatprep.mubr.msk.bf16.mxu0 %vm2168_vm14, %v4606_v36  ;;  %v4517_v10 = vsel %vm1397_vm9, %v4515_v16, %v4516_v23  ;;  %v5183_v53 = vsel %vm1478_vm12, %v9456_v22, %v10009_v38  ;;  %v4360_v62 = vshll.u32 %v10128_v43, 16  ;;  %v10157_v23 = vld [vmem:[#allocation3 + $0xac] sm:$0xf] }
 0x2ca   : > { %10810 = vst [vmem:[#allocation16_spill] sm:$0xff] %v10109_v48  ;;  %v7047_v34 = vcombine.low %v4080_v35, %v10056_v9  ;;  %v5982_v45 = vshll.u32 %v10109_v48, 16  ;;  %v5968_v9 = vshrl.u32 %v10080_v21, 16  ;;  %v4047_v35 = vld [vmem:[#allocation3 + $0x9c] sm:$0xf] }
 0x2cb   : > { %6057 = vrot.lane.b32.xlu1 %v5966_v31, %s7971_s25  ;;  %v5021_v30 = vpop.permute.xlu0 %5020  ;;  %v10136_v47 = vpop.permute.xlu1 %6173  ;;  %v10142_v31 = vld [vmem:[#allocation3 + $0xa0] sm:$0xf] }
 0x2cc   : > { %v5181_v54 = vsel %vm1478_vm12, %v9527_v17, %v5021_v30  ;;  %v4355_v17 = vrot.slane %v4353_v8, 1  ;;  %v5973_v55 = vor.u32 %v5972_v20, %v5968_v9  ;;  %v4518_v38 = vrot.slane %v7047_v34, 1  ;;  %v10166_v30 = vld [vmem:[#allocation3 + $0x98] ss:$0 sps:$4 sm:$0x11]  }
 0x2cd   : > { %4425 = vrot.lane.b32.xlu0 %v4344_v58, %s7971_s25  ;;  %v5213_v16 = vsel %vm1511_vm13, %v5181_v54, %v10029_v61  ;;  %v5984_v28 = vrot.slane %v5982_v45, 1  ;;  %v10162_v8 = vcombine.low %v4047_v35, %v10142_v31  ;;  %v5679_v58 = vld [vmem:[#allocation3 + $0xa8] sm:$0xf]  ;;  %v5980_v61 = vshrl.u32 %v10109_v48, 16 }
 0x2ce   : > { %v4356_v22 = vsel %vm1124_vm10, %v4351_v24, %v4355_v17  ;;  %7548 = vmatprep.mubr.msk.bf16.mxu1 %vm2168_vm14, %v5213_v16  ;;  %v5987_v20 = vshll.u32 %v10149_v32, 16  ;;  %v10171_v36 = vcombine.low %v5679_v58, %v10157_v23  ;;  %v5215_v34 = vsel %vm1511_vm13, %v5183_v53, %v9901_v49  ;;  %v10189_v16 = vld [vmem:[#allocation3 + $0xa4] ss:$0 sps:$4 sm:$0x11]  }
 0x2cf   : > { %6185 = vrot.lane.b32.xlu1 %v6148_v46, %s7970_s24  ;;  %v10151_v18 = vpop.permute.xlu0 %6175  ;;  %v7181_v46 = vcombine.low %v5713_v7, %v10066_v13  ;;  %10811 = vst [vmem:[#allocation17_spill] sm:$0xff] %v10162_v8  ;;  %v5977_v13 = vrot.slane %v5975_v40, 1  ;;  %v10175_v24 = vpop.permute.xlu1 %4543  ;;  %v6150_v9 = vrot.slane %v10114_v19, 1  ;;  %v4362_v40 = vrot.slane %v4360_v62, 1  ;;  %v5714_v7 = vld [vmem:[#allocation3 + $0x9c] sm:$0xe]  ;;  %7549 = vmatmul.mubr.msk.bf16.gmra.mxu1 %vm2168_vm14, %v5215_v34 }
 0x2d0   : > { %v5985_v17 = vor.u32 %v5984_v28, %v5980_v61  ;;  %v7182_v35 = vcombine.low %v5714_v7, %v10095_v3  ;;  %v4372_v49 = vshll.u32 %v10162_v8, 16  ;;  %v4365_v19 = vshll.u32 %v10166_v30, 16  ;;  %v10194_v28 = vld [vmem:[#allocation3 + $0xb0] ss:$0 sps:$4 sm:$0x11]  }
 0x2d1   : > { %4553 = vrot.lane.b32.xlu0 %v4517_v10, %s7970_s24  ;;  %v5978_v45 = vsel %vm1124_vm10, %v5973_v55, %v5977_v13  ;;  %v6149_v54 = vrot.slane %v7181_v46, 1  ;;  %v4520_v10 = vsel %vm1397_vm9, %v4518_v38, %v4519_v29  ;;  %v4358_v55 = vshrl.u32 %v10128_v43, 16  ;;  %v4081_v46 = vld [vmem:[#allocation3 + $0x90] sm:$0xe]  ;;  %v10196_v13 = vld [vmem:[#allocation3 + $0xac] sm:$0xf] }
 0x2d2   : > { %v5989_v62 = vrot.slane %v5987_v20, 1  ;;  %v7048_v3 = vcombine.low %v4081_v46, %v10111_v57  ;;  %v6152_v61 = vrot.slane %v7182_v35, 1  ;;  %v6153_v20 = vrot.slane %v10149_v32, 1 }
 0x2d3   : > { %4427 = vrot.lane.b32.xlu1 %v4356_v22, %s7971_s25  ;;  %v10184_v53 = vpop.permute.xlu0 %4545  ;;  %v5994_v22 = vshll.u32 %v10171_v36, 16  ;;  %v6151_v29 = vsel %vm1397_vm9, %v6149_v54, %v6150_v9  ;;  %v4363_v38 = vor.u32 %v4362_v40, %v4358_v55  ;;  %v4374_v34 = vrot.slane %v4372_v49, 1  ;;  %v4049_v9 = vld [vmem:[#allocation3 + $0xa8] sm:$0xf]  ;;  %v406_v40 = vld [vmem:[#allocation3 + $0xcc] sm:$0x1] }
 0x2d4   : > { %v5990_v58 = vsel %vm1124_vm10, %v5985_v17, %v5989_v62  ;;  %v4367_v54 = vrot.slane %v4365_v19, 1  ;;  %v4377_v55 = vshll.u32 %v10189_v16, 16  ;;  %v5682_v17 = vld [vmem:[#allocation3 + $0xb8] sm:$0xf]  ;;  %v10210_v32 = vcombine.low %v4049_v9, %v10196_v13  ;;  %v460_v9 = vld [vmem:[#allocation3 + $0xd4] sm:$0x1] }
 0x2d5   : > { %6059 = vrot.lane.b32.xlu0 %v5978_v45, %s7971_s25  ;;  %v4082_v45 = vld [vmem:[#allocation3 + $0x9c] sm:$0xe]  ;;  %v5996_v46 = vrot.slane %v5994_v22, 1  ;;  %v4521_v62 = vrot.slane %v7048_v3, 1  ;;  %v4522_v19 = vrot.slane %v10166_v30, 1  ;;  %v5992_v22 = vshrl.u32 %v10171_v36, 16 }
 0x2d6   : > { %v7049_v57 = vcombine.low %v4082_v45, %v10142_v31  ;;  %v4368_v49 = vsel %vm1124_vm10, %v4363_v38, %v4367_v54  ;;  %v5999_v31 = vshll.u32 %v10194_v28, 16  ;;  %v4525_v3 = vrot.slane %v10189_v16, 1  ;;  %v10221_v30 = vld [vmem:[#allocation3 + $0xbc] ss:$0 sps:$4 sm:$0x11]  }
 0x2d7   : > { %4555 = vrot.lane.b32.xlu1 %v4520_v10, %s7970_s24  ;;  %v4370_v10 = vshrl.u32 %v10162_v8, 16  ;;  %v5716_v8 = vld [vmem:[#allocation3 + $0xb4] sm:$0xe]  ;;  %v461_v16 = vsel %vm8023_vm4, 0, %v460_v9 }
 0x2d8   : > { %v4524_v38 = vrot.slane %v7049_v57, 1  ;;  %v7184_v54 = vcombine.low %v5716_v8, %v5682_v17  ;;  %v5681_v57 = vld [vmem:[#allocation3 + $0xb4] sm:$0xf]  ;;  %v7958_v8 = vld [vmem:[%s10745_s3 + $0x18] sm:$0xff]   ;;  %462 = vst [vmem:[#allocation3 + $0xd4] sm:$0x1] %v461_v16 }
 0x2d9   : > { %6187 = vrot.lane.b32.xlu0 %v6151_v29, %s7970_s24  ;;  %v10201_v7 = vpop.permute.xlu1 %5026  ;;  %v5715_v29 = vld [vmem:[#allocation3 + $0xa8] sm:$0xe]  ;;  %v4375_v45 = vor.u32 %v4374_v34, %v4370_v10  ;;  %v10225_v34 = vld [vmem:[#allocation3 + $0xb0] ss:$0 sps:$4 sm:$0x11]   ;;  %v4523_v10 = vsel %vm1397_vm9, %v4521_v62, %v4522_v19 }
 0x2da   : > { %v7183_v48 = vcombine.low %v5715_v29, %v10157_v23  ;;  %v4384_v23 = vshll.u32 %v10210_v32, 16  ;;  %v6001_v29 = vrot.slane %v5999_v31, 1  ;;  %v10239_v19 = vld [vmem:[#allocation3 + $0xc4] sm:$0xf]  ;;  %v4526_v31 = vsel %vm1397_vm9, %v4524_v38, %v4525_v3 }
 0x2db   : > { %6061 = vrot.lane.b32.xlu1 %v5990_v58, %s7971_s25  ;;  %v10207_v35 = vpop.permute.xlu0 %5152  ;;  %v6154_v58 = vsel %vm1397_vm9, %v6152_v61, %v6153_v20  ;;  %v4379_v61 = vrot.slane %v4377_v55, 1  ;;  %v5997_v20 = vor.u32 %v5996_v46, %v5992_v22  ;;  %v6156_v55 = vrot.slane %v10194_v28, 1 }
 0x2dc   : > { %v10237_v46 = vcombine.low %v5681_v57, %v5682_v17  ;;  %v6158_v22 = vrot.slane %v7184_v54, 1  ;;  %v4386_v17 = vrot.slane %v4384_v23, 1  ;;  %v4389_v9 = vshll.u32 %v10225_v34, 16  ;;  %v4051_v23 = vld [vmem:[#allocation3 + $0xb4] sm:$0xf] }
 0x2dd   : > { %4429 = vrot.lane.b32.xlu0 %v4368_v49, %s7971_s25  ;;  %v407_v49 = vsel %vm8013_vm2, 0, %v406_v40  ;;  %v4380_v0 = vsel %vm1124_vm10, %v4375_v45, %v4379_v61  ;;  %v6155_v40 = vrot.slane %v7183_v48, 1  ;;  %v6159_v48 = vrot.slane %v10221_v30, 1  ;;  %v10247_v45 = vld [vmem:[#allocation3 + $0xbc] ss:$0 sps:$4 sm:$0x11]  }
 0x2de   : > { %v6046_v21 = vpop.permute.xlu1 %6045  ;;  %408 = vst [vmem:[#allocation3 + $0xcc] sm:$0x1] %v407_v49  ;;  %v6002_v28 = vsel %vm1124_vm10, %v5997_v20, %v6001_v29  ;;  %v5683_v61 = vld [vmem:[#allocation3 + $0xc0] sm:$0xf]  ;;  %v10262_v20 = vld [vmem:[#allocation3 + $0xd0] sm:$0xf] }
 0x2df   : > { %6189 = vrot.lane.b32.xlu1 %v6154_v58, %s7970_s24  ;;  %v4052_v58 = vld [vmem:[#allocation3 + $0xb8] sm:$0xf]  ;;  %v6206_v51 = vsel %vm1478_vm12, %v9607_v37, %v6046_v21  ;;  %v10260_v54 = vcombine.low %v5683_v61, %v10239_v19  ;;  %v6006_v37 = vshll.u32 %v10237_v46, 16  ;;  %v4531_v21 = vrot.slane %v10247_v45, 1 }
 0x2e0   : > { %v7051_v29 = vcombine.low %v4084_v2, %v4052_v58  ;;  %v10272_v57 = vcombine.low %v4051_v23, %v4052_v58 }
 0x2e1   : > { %4557 = vrot.lane.b32.xlu0 %v4523_v10, %s7970_s24  ;;  %v6048_v62 = vpop.permute.xlu0 %6047  ;;  %v6309_v10 = vsel %vm2201_vm11, %v9958_v25, 0  ;;  %v6157_v25 = vsel %vm1397_vm9, %v6155_v40, %v6156_v55  ;;  %v10277_v40 = vsel %vm1511_vm13, %v6204_v4, %v9945_v42  ;;  %v4083_v55 = vld [vmem:[#allocation3 + $0xa8] sm:$0xe]  ;;  %v6018_v42 = vshll.u32 %v10260_v54, 16 }
 0x2e2   : > { %v6208_v38 = vsel %vm1478_vm12, %v9615_v60, %v6048_v62  ;;  %7613 = vmatpush3.bf16.msra.mxu1 %v6309_v10  ;;  %v10294_v4 = vld [vmem:[#allocation3 + $0xd4] ss:$0 sps:$4 sm:$0x11]   ;;  %v4530_v61 = vrot.slane %v7051_v29, 1  ;;  %v6008_v10 = vrot.slane %v6006_v37, 1  ;;  %v4396_v37 = vshll.u32 %v10272_v57, 16 }
 0x2e3   : > { %4431 = vrot.lane.b32.xlu1 %v4380_v0, %s7971_s25  ;;  %7614 = vmatprep.subr.bf16.mxu1 %v7958_v8  ;;  %v10290_v58 = vsel %vm1511_vm13, %v6208_v38, %v10151_v18  ;;  %v6020_v23 = vrot.slane %v6018_v42, 1 }
 0x2e4   : > { %v4416_v49 = vpop.permute.xlu1 %4415 }
 0x2e5   : > { %v4576_v3 = vsel %vm1478_vm12, %v9626_v27, %v4416_v49  ;;  %6063 = vrot.lane.b32.xlu0 %v6002_v28, %s7971_s25  ;;  %v4382_v27 = vshrl.u32 %v10210_v32, 16  ;;  %v5685_v0 = vld [vmem:[#allocation3 + $0xcc] sm:$0xf]  ;;  %v7050_v49 = vcombine.low %v4083_v55, %v10196_v13  ;;  %v4391_v13 = vrot.slane %v4389_v9, 1 }
 0x2e6   : > { %v4608_v60 = vsel %vm1511_vm13, %v4576_v3, %v10175_v24  ;;  %v4418_v16 = vpop.permute.xlu0 %4417  ;;  %v10282_v62 = vcombine.low %v5685_v0, %v10262_v20  ;;  %7615 = vmatpush3.bf16.msra.mxu1 %v7958_v8  ;;  %v4532_v9 = vsel %vm1397_vm9, %v4530_v61, %v4531_v21 }
 0x2e7   : > { %4559 = vrot.lane.b32.xlu1 %v4526_v31, %s7970_s24  ;;  %7589 = vmatmul.mubr.msk.bf16.gmra.mxu0 %vm2168_vm14, %v4608_v60  ;;  %v4578_v24 = vsel %vm1478_vm12, %v9635_v14, %v4418_v16  ;;  %v10286_v31 = vsel %vm1511_vm13, %v6206_v51, %v10136_v47  ;;  %v4387_v28 = vor.u32 %v4386_v17, %v4382_v27  ;;  %v6004_v17 = vshrl.u32 %v10237_v46, 16  ;;  %v7952_v51 = vld [vmem:[#allocation3 + $0xc8] ss:$0 sps:$4 sm:$0x11]  }
 0x2e8   : > { %v4610_v14 = vsel %vm1511_vm13, %v4578_v24, %v10184_v53  ;;  %v6160_v47 = vsel %vm1397_vm9, %v6158_v22, %v6159_v48  ;;  %v6030_v18 = vshll.u32 %v10282_v62, 16  ;;  %v10304_v2 = vpop.permute.xlu1 %5158  ;;  %v6011_v53 = vshll.u32 %v10221_v30, 16  ;;  %v5717_v24 = vld [vmem:[#allocation3 + $0xc0] sm:$0xe] }
 0x2e9   : > { %6191 = vrot.lane.b32.xlu0 %v6157_v25, %s7970_s24  ;;  %7592 = vmatprep.mubr.msk.bf16.mxu0 %vm2168_vm14, %v4610_v14  ;;  %v6028_v8 = vshrl.u32 %v10282_v62, 16  ;;  %v6035_v22 = vshll.u32 %v10294_v4, 16  ;;  %v4392_v48 = vsel %vm1124_vm10, %v4387_v28, %v4391_v13  ;;  %v4527_v3 = vrot.slane %v7050_v49, 1 }
 0x2ea   : > { %v6032_v38 = vrot.slane %v6030_v18, 1  ;;  %v4528_v25 = vrot.slane %v10225_v34, 1  ;;  %v6009_v29 = vor.u32 %v6008_v10, %v6004_v17  ;;  %v6016_v30 = vshrl.u32 %v10260_v54, 16 }
 0x2eb   : > { %6193 = vrot.lane.b32.xlu1 %v6160_v47, %s7970_s24  ;;  %v6023_v60 = vshll.u32 %v7952_v51, 16  ;;  %v5187_v27 = vsel %vm1478_vm12, %v9579_v44, %v10201_v7  ;;  %v6013_v16 = vrot.slane %v6011_v53, 1  ;;  %v6037_v34 = vrot.slane %v6035_v22, 1  ;;  %v5718_v47 = vld [vmem:[#allocation3 + $0xcc] sm:$0xe] }
 0x2ec   : > { %v6033_v0 = vor.u32 %v6032_v38, %v6028_v8  ;;  %v4529_v28 = vsel %vm1397_vm9, %v4527_v3, %v4528_v25  ;;  %v6021_v21 = vor.u32 %v6020_v23, %v6016_v30  ;;  %v7185_v42 = vcombine.low %v5717_v24, %v10239_v19 }
 0x2ed   : > { %4433 = vrot.lane.b32.xlu0 %v4392_v48, %s7971_s25  ;;  %v6178_v14 = vpop.permute.xlu1 %6177  ;;  %v6014_v61 = vsel %vm1124_vm10, %v6009_v29, %v6013_v16  ;;  %v4398_v44 = vrot.slane %v4396_v37, 1  ;;  %v6025_v10 = vrot.slane %v6023_v60, 1  ;;  %v4394_v18 = vshrl.u32 %v10272_v57, 16 }
 0x2ee   : > { %v6038_v19 = vsel %vm1124_vm10, %v6033_v0, %v6037_v34  ;;  %v4401_v13 = vshll.u32 %v10247_v45, 16  ;;  %v7186_v17 = vcombine.low %v5718_v47, %v10262_v20  ;;  %v6161_v53 = vrot.slane %v7185_v42, 1  ;;  %v10813_v42 = vld [vmem:[#allocation10_spill] sm:$0xff] }
 0x2ef   : > { %4563 = vrot.lane.b32.xlu1 %v4532_v9, %s7970_s24  ;;  %v5025_v55 = vpop.permute.xlu0 %5024  ;;  %v6162_v8 = vrot.slane %v7952_v51, 1  ;;  %v4399_v22 = vor.u32 %v4398_v44, %v4394_v18  ;;  %v6165_v25 = vrot.slane %v10294_v4, 1 }
 0x2f0   : > { %v5185_v49 = vsel %vm1478_vm12, %v9654_v5, %v5025_v55  ;;  %v5219_v5 = vsel %vm1511_vm13, %v5187_v27, %v10100_v15  ;;  %v4403_v48 = vrot.slane %v4401_v13, 1  ;;  %v6164_v3 = vrot.slane %v7186_v17, 1  ;;  %v10815_v17 = vld [vmem:[#allocation4_spill] sm:$0xff] }
 0x2f1   : > { %4561 = vrot.lane.b32.xlu0 %v4529_v28, %s7970_s24  ;;  %v5217_v7 = vsel %vm1511_vm13, %v5185_v49, %v10207_v35  ;;  %v6026_v35 = vsel %vm1124_vm10, %v6021_v21, %v6025_v10  ;;  %v6163_v45 = vsel %vm1397_vm9, %v6161_v53, %v6162_v8  ;;  %v10812_v28 = vld [vmem:[#allocation9_spill] sm:$0xff] }
 0x2f2   : > { %7552 = vmatprep.mubr.msk.bf16.mxu1 %vm2168_vm14, %v5217_v7  ;;  %v4404_v20 = vsel %vm1124_vm10, %v4399_v22, %v4403_v48  ;;  %v6166_v23 = vsel %vm1397_vm9, %v6164_v3, %v6165_v25  ;;  %v10814_v7 = vld [vmem:[#allocation11_spill] sm:$0xff]  ;;  %v10816_v25 = vld [vmem:[#allocation13_spill] sm:$0xff] }
 0x2f3   : > { %6065 = vrot.lane.b32.xlu1 %v6014_v61, %s7971_s25  ;;  %7553 = vmatmul.mubr.msk.bf16.gmra.mxu1 %vm2168_vm14, %v5219_v5  ;;  %v5157_v38 = vpop.permute.xlu0 %5156 }
 0x2f4   : > { %v4548_v15 = vpop.permute.xlu1 %4547 }
 0x2f5   : > { %6067 = vrot.lane.b32.xlu0 %v6026_v35, %s7971_s25 }
 0x2f7   : > { %6069 = vrot.lane.b32.xlu1 %v6038_v19, %s7971_s25 }
 0x2f9   : > { %6195 = vrot.lane.b32.xlu0 %v6163_v45, %s7970_s24 }
 0x2fa   : > { %v10344_v51 = vpop.permute.xlu0 %6051 }
 0x2fb   : > { %4435 = vrot.lane.b32.xlu1 %v4404_v20, %s7971_s25  ;;  %v5031_v9 = vpop.permute.xlu1 %5030 }
 0x2fc   : > { %v5191_v29 = vsel %vm1478_vm12, %v9695_v50, %v5031_v9 }
 0x2fd   : > { %v5223_v16 = vsel %vm1511_vm13, %v5191_v29, %v10304_v2 }
 0x2ff   : > { %6197 = vrot.lane.b32.xlu1 %v6166_v23, %s7970_s24  ;;  %v5029_v37 = vpop.permute.xlu0 %5028 }
 0x300   : > { %v5189_v4 = vsel %vm1478_vm12, %v9741_v12, %v5029_v37 }
 0x301   : > { %v5221_v60 = vsel %vm1511_vm13, %v5189_v4, %v5157_v38  ;;  %v10817_v4 = vld [vmem:[#allocation5_spill] sm:$0xff] }
 0x302   : > { %v6050_v30 = vpop.permute.xlu1 %6049  ;;  %7556 = vmatprep.mubr.msk.bf16.mxu1 %vm2168_vm14, %v5221_v60 }
 0x303   : > { %v6210_v27 = vsel %vm1478_vm12, %v9723_v52, %v6050_v30  ;;  %7557 = vmatmul.mubr.msk.bf16.gmra.mxu1 %vm2168_vm14, %v5223_v16  ;;  %v10818_v30 = vld [vmem:[#allocation6_spill] sm:$0xff] }
 0x304   : > { %v10360_v0 = vsel %vm1511_vm13, %v6210_v27, %v6178_v14  ;;  %v6200_v60 = vsel %vm1478_vm12, %v10818_v30, %v10817_v4  ;;  %v10825_v30 = vld [vmem:[#allocation16_spill] sm:$0xff] }
 0x307   : > { %v5161_v34 = vpop.permute.xlu0 %5160 }
 0x308   : > { %v4420_v50 = vpop.permute.xlu1 %4419 }
 0x309   : > { %v4580_v12 = vsel %vm1478_vm12, %v9743_v33, %v4420_v50 }
 0x30a   : > { %v4612_v55 = vsel %vm1511_vm13, %v4580_v12, %v4548_v15 }
 0x30b   : > { %7593 = vmatmul.mubr.msk.bf16.gmra.mxu0 %vm2168_vm14, %v4612_v55 }
 0x30c   : > { %v5163_v52 = vpop.permute.xlu1 %5162 }
 0x30f   : > { %v5033_v24 = vpop.permute.xlu0 %5032 }
 0x310   : > { %v5193_v21 = vsel %vm1478_vm12, %v10812_v28, %v5033_v24  ;;  %v5035_v2 = vpop.permute.xlu1 %5034 }
 0x311   : > { %v5225_v49 = vsel %vm1511_vm13, %v5193_v21, %v5161_v34  ;;  %v5195_v14 = vsel %vm1478_vm12, %v10813_v42, %v5035_v2 }
 0x312   : > { %7560 = vmatprep.mubr.msk.bf16.mxu1 %vm2168_vm14, %v5225_v49  ;;  %v5227_v47 = vsel %vm1511_vm13, %v5195_v14, %v5163_v52 }
 0x313   : > { %v5165_v33 = vpop.permute.xlu0 %5164  ;;  %7561 = vmatmul.mubr.msk.bf16.gmra.mxu1 %vm2168_vm14, %v5227_v47 }
 0x315   : > { %v10374_v61 = vpop.permute.xlu1 %6053 }
 0x317   : > { %v5037_v44 = vpop.permute.xlu0 %5036 }
 0x318   : > { %v5197_v10 = vsel %vm1478_vm12, %v10814_v7, %v5037_v44  ;;  %v10820_v7 = vld [vmem:[#allocation7_spill] sm:$0xff] }
 0x319   : > { %v5167_v5 = vpop.permute.xlu1 %5166  ;;  %v5229_v19 = vsel %vm1511_vm13, %v5197_v10, %v5165_v33  ;;  %v6212_v10 = vsel %vm1478_vm12, %v10820_v7, %v10344_v51  ;;  %v10821_v51 = vld [vmem:[#allocation12_spill] sm:$0xff] }
 0x31a   : > { %7564 = vmatprep.mubr.msk.bf16.mxu1 %vm2168_vm14, %v5229_v19 }
 0x31b   : > { %v5169_v18 = vpop.permute.xlu0 %5168 }
 0x31d   : > { %v5039_v13 = vpop.permute.xlu1 %5038 }
 0x31e   : > { %v5199_v35 = vsel %vm1478_vm12, %v10815_v17, %v5039_v13  ;;  %v6214_v17 = vsel %vm1478_vm12, %v10821_v51, %v10374_v61 }
 0x31f   : > { %v5231_v53 = vsel %vm1511_vm13, %v5199_v35, %v5167_v5  ;;  %v5041_v8 = vpop.permute.xlu0 %5040 }
 0x320   : > { %7565 = vmatmul.mubr.msk.bf16.gmra.mxu1 %vm2168_vm14, %v5231_v53  ;;  %v5201_v38 = vsel %vm1478_vm12, %v9883_v11, %v5041_v8 }
 0x321   : > { %v5171_v22 = vpop.permute.xlu1 %5170  ;;  %v5233_v15 = vsel %vm1511_vm13, %v5201_v38, %v5169_v18 }
 0x322   : > { %7568 = vmatprep.mubr.msk.bf16.mxu1 %vm2168_vm14, %v5233_v15 }
 0x323   : > { %v5173_v48 = vpop.permute.xlu0 %5172 }
 0x325   : > { %v5043_v3 = vpop.permute.xlu1 %5042 }
 0x326   : > { %v5203_v45 = vsel %vm1478_vm12, %v10816_v25, %v5043_v3  ;;  %v10823_v25 = vld [vmem:[#allocation15_spill] sm:$0xff] }
 0x327   : > { %v5235_v20 = vsel %vm1511_vm13, %v5203_v45, %v5171_v22  ;;  %v5045_v23 = vpop.permute.xlu0 %5044 }
 0x328   : > { %7569 = vmatmul.mubr.msk.bf16.gmra.mxu1 %vm2168_vm14, %v5235_v20  ;;  %v5205_v9 = vsel %vm1478_vm12, %v9908_v39, %v5045_v23  ;;  %v10819_v39 = vld [vmem:[#allocation8_spill] sm:$0xff] }
 0x329   : > { %v5175_v29 = vpop.permute.xlu1 %5174  ;;  %v5237_v11 = vsel %vm1511_vm13, %v5205_v9, %v5173_v48  ;;  %v6232_v12 = vsel %vm1511_vm13, %v6200_v60, %v10819_v39  ;;  %v10822_v48 = vld [vmem:[#allocation14_spill] sm:$0xff] }
 0x32a   : > { %7572 = vmatprep.mubr.msk.bf16.mxu1 %vm2168_vm14, %v5237_v11 }
 0x32b   : > { %v6180_v37 = vpop.permute.xlu0 %6179 }
 0x32c   : > { %v6244_v5 = vsel %vm1511_vm13, %v6212_v10, %v6180_v37 }
 0x32d   : > { %v5047_v27 = vpop.permute.xlu1 %5046 }
 0x32e   : > { %v5207_v16 = vsel %vm1478_vm12, %v9922_v56, %v5047_v27 }
 0x32f   : > { %v5239_v50 = vsel %vm1511_vm13, %v5207_v16, %v5175_v29  ;;  %v4422_v34 = vpop.permute.xlu0 %4421 }
 0x330   : > { %7573 = vmatmul.mubr.msk.bf16.gmra.mxu1 %vm2168_vm14, %v5239_v50  ;;  %v4582_v52 = vsel %vm1478_vm12, %v9953_v41, %v4422_v34 }
 0x331   : > { %7616 = vmatprep.mubr.msk.bf16.mxu1 %vm2168_vm14, %v6232_v12  ;;  %v6182_v55 = vpop.permute.xlu1 %6181 }
 0x332   : > { %v6246_v35 = vsel %vm1511_vm13, %v6214_v17, %v6182_v55 }
 0x333   : > { %v4550_v24 = vpop.permute.xlu0 %4549 }
 0x334   : > { %v4614_v28 = vsel %vm1511_vm13, %v4582_v52, %v4550_v24 }
 0x335   : > { %v4424_v21 = vpop.permute.xlu1 %4423  ;;  %7596 = vmatprep.mubr.msk.bf16.mxu0 %vm2168_vm14, %v4614_v28 }
 0x336   : > { %v4584_v2 = vsel %vm1478_vm12, %v9982_v26, %v4424_v21 }
 0x337   : > { %v6056_v56 = vpop.permute.xlu0 %6055 }
 0x338   : > { %7617 = vmatmul.mubr.msk.bf16.vlgmr.msra.gmra.mxu1 %vm2168_vm14, %v10093_v63 }
 0x339   : > { %7620 = vmatprep.mubr.msk.bf16.mxu1 %vm2168_vm14, %v10277_v40  ;;  %v4552_v49 = vpop.permute.xlu1 %4551 }
 0x33a   : > { %v4616_v42 = vsel %vm1511_vm13, %v4584_v2, %v4552_v49 }
 0x33b   : > { %7597 = vmatmul.mubr.msk.bf16.gmra.mxu0 %vm2168_vm14, %v4616_v42  ;;  %v6184_v41 = vpop.permute.xlu0 %6183 }
 0x33d   : > { %v6058_v14 = vpop.permute.xlu1 %6057 }
 0x33e   : > { %v6218_v3 = vsel %vm1478_vm12, %v10822_v48, %v6058_v14 }
 0x33f   : > { %v4426_v47 = vpop.permute.xlu0 %4425 }
 0x340   : > { %7621 = vmatmul.mubr.msk.bf16.gmra.mxu1 %vm2168_vm14, %v10286_v31  ;;  %v4586_v26 = vsel %vm1478_vm12, %v10051_v1, %v4426_v47 }
 0x341   : > { %7624 = vmatprep.mubr.msk.bf16.mxu1 %vm2168_vm14, %v10290_v58  ;;  %v6186_v63 = vpop.permute.xlu1 %6185 }
 0x343   : > { %v4554_v33 = vpop.permute.xlu0 %4553 }
 0x344   : > { %v4618_v40 = vsel %vm1511_vm13, %v4586_v26, %v4554_v33 }
 0x345   : > { %v4428_v44 = vpop.permute.xlu1 %4427  ;;  %7600 = vmatprep.mubr.msk.bf16.mxu0 %vm2168_vm14, %v4618_v40 }
 0x346   : > { %v4588_v58 = vsel %vm1478_vm12, %v10072_v6, %v4428_v44 }
 0x347   : > { %v6060_v31 = vpop.permute.xlu0 %6059 }
 0x348   : > { %7625 = vmatmul.mubr.msk.bf16.gmra.mxu1 %vm2168_vm14, %v10360_v0  ;;  %v6216_v0 = vsel %vm1478_vm12, %v10007_v59, %v6056_v56  ;;  %v6250_v59 = vsel %vm1511_vm13, %v6218_v3, %v6186_v63  ;;  %v6220_v45 = vsel %vm1478_vm12, %v10823_v25, %v6060_v31 }
 0x349   : > { %7628 = vmatprep.mubr.msk.bf16.mxu1 %vm2168_vm14, %v6244_v5  ;;  %v4556_v1 = vpop.permute.xlu1 %4555  ;;  %v6248_v6 = vsel %vm1511_vm13, %v6216_v0, %v6184_v41 }
 0x34a   : > { %v4620_v19 = vsel %vm1511_vm13, %v4588_v58, %v4556_v1 }
 0x34b   : > { %7601 = vmatmul.mubr.msk.bf16.gmra.mxu0 %vm2168_vm14, %v4620_v19  ;;  %v6188_v18 = vpop.permute.xlu0 %6187 }
 0x34c   : > { %v6252_v20 = vsel %vm1511_vm13, %v6220_v45, %v6188_v18 }
 0x34d   : > { %v6062_v13 = vpop.permute.xlu1 %6061 }
 0x34e   : > { %v6222_v60 = vsel %vm1478_vm12, %v10825_v30, %v6062_v13 }
 0x34f   : > { %v4430_v53 = vpop.permute.xlu0 %4429 }
 0x350   : > { %7629 = vmatmul.mubr.msk.bf16.gmra.mxu1 %vm2168_vm14, %v6246_v35  ;;  %v4590_v38 = vsel %vm1478_vm12, %v10128_v43, %v4430_v53  ;;  %v10824_v43 = vld [vmem:[#allocation17_spill] sm:$0xff] }
 0x351   : > { %7632 = vmatprep.mubr.msk.bf16.mxu1 %vm2168_vm14, %v6248_v6  ;;  %v6190_v8 = vpop.permute.xlu1 %6189 }
 0x352   : > { %v6254_v27 = vsel %vm1511_vm13, %v6222_v60, %v6190_v8 }
 0x353   : > { %v4558_v22 = vpop.permute.xlu0 %4557 }
 0x354   : > { %v4622_v15 = vsel %vm1511_vm13, %v4590_v38, %v4558_v22 }
 0x355   : > { %v4432_v61 = vpop.permute.xlu1 %4431  ;;  %7604 = vmatprep.mubr.msk.bf16.mxu0 %vm2168_vm14, %v4622_v15 }
 0x356   : > { %v4592_v9 = vsel %vm1478_vm12, %v10824_v43, %v4432_v61 }
 0x357   : > { %v6064_v23 = vpop.permute.xlu0 %6063 }
 0x358   : > { %7633 = vmatmul.mubr.msk.bf16.gmra.mxu1 %vm2168_vm14, %v6250_v59  ;;  %v6224_v16 = vsel %vm1478_vm12, %v10171_v36, %v6064_v23 }
 0x359   : > { %7636 = vmatprep.mubr.msk.bf16.mxu1 %vm2168_vm14, %v6252_v20  ;;  %v4560_v29 = vpop.permute.xlu1 %4559 }
 0x35a   : > { %v4624_v11 = vsel %vm1511_vm13, %v4592_v9, %v4560_v29 }
 0x35b   : > { %7605 = vmatmul.mubr.msk.bf16.gmra.mxu0 %vm2168_vm14, %v4624_v11  ;;  %v6192_v37 = vpop.permute.xlu0 %6191 }
 0x35c   : > { %v6256_v50 = vsel %vm1511_vm13, %v6224_v16, %v6192_v37 }
 0x35d   : > { %v6194_v4 = vpop.permute.xlu1 %6193 }
 0x35f   : > { %v4434_v34 = vpop.permute.xlu0 %4433 }
 0x360   : > { %7637 = vmatmul.mubr.msk.bf16.gmra.mxu1 %vm2168_vm14, %v6254_v27  ;;  %v4594_v12 = vsel %vm1478_vm12, %v10210_v32, %v4434_v34  ;;  %v7309_v34 = vld [vmem:[%s8037_s23 + $0x8] sm:$0xff]  }
 0x361   : > { %7640 = vmatprep.mubr.msk.bf16.mxu1 %vm2168_vm14, %v6256_v50  ;;  %v4564_v39 = vpop.permute.xlu1 %4563 }
 0x363   : > { %v4562_v55 = vpop.permute.xlu0 %4561 }
 0x364   : > { %v4626_v52 = vsel %vm1511_vm13, %v4594_v12, %v4562_v55 }
 0x365   : > { %v6066_v24 = vpop.permute.xlu1 %6065  ;;  %7608 = vmatprep.mubr.msk.bf16.mxu0 %vm2168_vm14, %v4626_v52  ;;  %v10564_v52 = vld [vmem:[%s10746_s4] ss:$0 sm:$0xff] }
 0x366   : > { %v6226_v36 = vsel %vm1478_vm12, %v10237_v46, %v6066_v24  ;;  %v7246_v24 = vld [vmem:[%s8037_s23] sm:$0xff]  }
 0x367   : > { %v6258_v28 = vsel %vm1511_vm13, %v6226_v36, %v6194_v4  ;;  %v6068_v21 = vpop.permute.xlu0 %6067 }
 0x368   : > { %7641 = vmatmul.mubr.msk.bf16.gmra.mxu1 %vm2168_vm14, %v6258_v28  ;;  %v6228_v2 = vsel %vm1478_vm12, %v10260_v54, %v6068_v21  ;;  %v7251_v21 = vunpack.c.l.bf16 %v7309_v34 }
 0x369   : > { %v6070_v56 = vpop.permute.xlu1 %6069 }
 0x36a   : > { %v6230_v14 = vsel %vm1478_vm12, %v10282_v62, %v6070_v56 }
 0x36b   : > { %v6196_v49 = vpop.permute.xlu0 %6195 }
 0x36c   : > { %v6260_v32 = vsel %vm1511_vm13, %v6228_v2, %v6196_v49 }
 0x36d   : > { %v4436_v42 = vpop.permute.xlu1 %4435  ;;  %7644 = vmatprep.mubr.msk.bf16.mxu1 %vm2168_vm14, %v6260_v32 }
 0x36e   : > { %v4596_v41 = vsel %vm1478_vm12, %v10272_v57, %v4436_v42 }
 0x36f   : > { %v4628_v46 = vsel %vm1511_vm13, %v4596_v41, %v4564_v39  ;;  %v7247_v41 = vunpack.c.l.bf16 %v7246_v24 }
 0x370   : > { %7609 = vmatmul.mubr.msk.bf16.gmra.mxu0 %vm2168_vm14, %v4628_v46 }
 0x371   : > { %v6198_v47 = vpop.permute.xlu1 %6197 }
 0x372   : > { %v6262_v63 = vsel %vm1511_vm13, %v6230_v14, %v6198_v47  ;;  %v7252_v14 = vunpack.c.h.bf16 %v7309_v34 }
 0x373   : > { %7645 = vmatmul.mubr.msk.bf16.gmra.mxu1 %vm2168_vm14, %v6262_v63 }
 0x376   : > { %v7582_v19 = vpop.f32.mrf.mxu0 }
 0x378   : > { %v5527_v13 = vpop.f32.mrf.mxu0 }
 0x37a   : > { %v7583_v17 = vpop.f32.mrf.mxu0 }
 0x37b   : > { %v7546_v54 = vpop.f32.mrf.mxu1 }
 0x37c   : > { %v5530_v6 = vpop.f32.mrf.mxu0  ;;  %v5536_v39 = vadd.f32 %v7582_v19, %v7546_v54  ;;  %v7311_v19 = vld [vmem:[%s8037_s23 + $0x18] sm:$0xff]  }
 0x37d   : > { %v5322_v26 = vpop.f32.mrf.mxu1 }
 0x37e   : > { %v5528_v36 = vadd.f32 %v5527_v13, %v5322_v26 }
 0x37f   : > { %v7547_v33 = vpop.f32.mrf.mxu1 }
 0x380   : > { %v5539_v2 = vadd.f32 %v7583_v17, %v7547_v33  ;;  %v7248_v17 = vunpack.c.h.bf16 %v7246_v24 }
 0x381   : > { %v5325_v40 = vpop.f32.mrf.mxu1 }
 0x382   : > { %v5531_v47 = vadd.f32 %v5530_v6, %v5325_v40 }
 0x386   : > { %v7586_v8 = vpop.f32.mrf.mxu0 }
 0x388   : > { %v5543_v22 = vpop.f32.mrf.mxu0 }
 0x38a   : > { %v7587_v61 = vpop.f32.mrf.mxu0 }
 0x38c   : > { %v10526_v59 = vpop.f32.mrf.mxu0 }
 0x38f   : > { %v10490_v44 = vpop.f32.mrf.mxu1 }
 0x390   : > { %v5552_v13 = vadd.f32 %v7586_v8, %v10490_v44  ;;  %v7259_v8 = vunpack.c.l.bf16 %v7311_v19 }
 0x391   : > { %v10492_v7 = vpop.f32.mrf.mxu1 }
 0x393   : > { %v10494_v57 = vpop.f32.mrf.mxu1 }
 0x395   : > { %v10496_v10 = vpop.f32.mrf.mxu1 }
 0x3a7   : > { %v10530_v45 = vpop.f32.mrf.mxu0 }
 0x3a9   : > { %v10536_v43 = vpop.f32.mrf.mxu0 }
 0x3ab   : > { %v10542_v11 = vpop.f32.mrf.mxu0 }
 0x3ad   : > { %v10548_v30 = vpop.f32.mrf.mxu0 }
 0x3b3   : > { %v10498_v5 = vpop.f32.mrf.mxu1 }
 0x3b5   : > { %v10500_v62 = vpop.f32.mrf.mxu1 }
 0x3b7   : > { %v10502_v31 = vpop.f32.mrf.mxu1 }
 0x3b9   : > { %v10504_v58 = vpop.f32.mrf.mxu1 }
 0x3c3   : > { %v10506_v1 = vpop.f32.mrf.mxu1 }
 0x3c5   : > { %v10508_v18 = vpop.f32.mrf.mxu1 }
 0x3c7   : > { %v10510_v51 = vpop.f32.mrf.mxu1 }
 0x3c9   : > { %v10512_v35 = vpop.f32.mrf.mxu1 }
 0x3cb   : > { %v10552_v27 = vpop.f32.mrf.mxu0 }
 0x3cd   : > { %v10559_v12 = vpop.f32.mrf.mxu0 }
 0x3cf   : > { %v10567_v49 = vpop.f32.mrf.mxu0 }
 0x3d3   : > { %v10514_v0 = vpop.f32.mrf.mxu1 }
 0x3d5   : > { %v10516_v53 = vpop.f32.mrf.mxu1 }
 0x3d7   : > { %v10518_v38 = vpop.f32.mrf.mxu1 }
 0x3d9   : > { %v10520_v15 = vpop.f32.mrf.mxu1 }
 0x3e0   : > { %v10522_v48 = vpop.f32.mrf.mxu1 }
 0x3e2   : > { %v10524_v3 = vpop.f32.mrf.mxu1 }
 0x3e4   : > { %v10528_v25 = vpop.f32.mrf.mxu1 }
 0x3e6   : > { %v10532_v20 = vpop.f32.mrf.mxu1 }
 0x3e8   : > { %v10534_v23 = vpop.f32.mrf.mxu1 }
 0x3ea   : > { %v10538_v9 = vpop.f32.mrf.mxu1 }
 0x3ec   : > { %v10540_v29 = vpop.f32.mrf.mxu1 }
 0x3ee   : > { %v10544_v37 = vpop.f32.mrf.mxu1 }
 0x3f0   : > { %v10546_v4 = vpop.f32.mrf.mxu1 }
 0x3f2   : > { %v10550_v60 = vpop.f32.mrf.mxu1 }
 0x3f4   : > { %v10554_v16 = vpop.f32.mrf.mxu1 }
 0x3f6   : > { %v10556_v50 = vpop.f32.mrf.mxu1 }
 0x3f8   : > { %v7618_v55 = vpop.f32.mrf.mxu1 }
 0x3f9   : > { %v6474_v28 = vadd.f32 %v7618_v55, %v5536_v39  ;;  %v10579_v39 = vpop.f32.mrf.mxu0 }
 0x3fa   : > { %v6345_v56 = vpop.f32.mrf.mxu1 }
 0x3fb   : > { %v6513_v32 = vadd.f32 %v10564_v52, %v6474_v28  ;;  %v6472_v42 = vadd.f32 %v6345_v56, %v5528_v36  ;;  %v7310_v36 = vld [vmem:[%s8037_s23 + $0x10] sm:$0xff]   ;;  %v5544_v28 = vadd.f32 %v5543_v22, %v10492_v7  ;;  %v10586_v56 = vpop.f32.mrf.mxu0 }
 0x3fc   : > { %v7619_v46 = vpop.f32.mrf.mxu1 }
 0x3fd   : > { %v6609_v63 = vadd.f32 %v7251_v21, %v6513_v32  ;;  %v6511_v54 = vadd.f32 %v10564_v52, %v6472_v42  ;;  %v6475_v26 = vadd.f32 %v7619_v46, %v5539_v2  ;;  %v5555_v42 = vadd.f32 %v7587_v61, %v10494_v57  ;;  %v10597_v57 = vpop.f32.mrf.mxu0 }
 0x3fe   : > { %v6348_v33 = vpop.f32.mrf.mxu1  ;;  %v7255_v46 = vunpack.c.l.bf16 %v7310_v36 }
 0x3ff   : > { %v6641_v55 = vmax.f32 %v6609_v63, 0.0  ;;  %v6607_v34 = vadd.f32 %v7247_v41, %v6511_v54  ;;  %v6514_v40 = vadd.f32 %v10564_v52, %v6475_v26  ;;  %v6473_v6 = vadd.f32 %v6348_v33, %v5531_v47 }
 0x400   : > { %v7622_v44 = vpop.f32.mrf.mxu1  ;;  %v5547_v54 = vadd.f32 %v10526_v59, %v10496_v10  ;;  %v7260_v26 = vunpack.c.h.bf16 %v7311_v19 }
 0x401   : > { %6673 = vst.msk [vmem:[%s10577_s16 + $0x10] sm:$0xff] %vm1478_vm12, %v6641_v55  ;;  %v6639_v21 = vmax.f32 %v6607_v34, 0.0  ;;  %v6610_v24 = vadd.f32 %v7252_v14, %v6514_v40  ;;  %v6512_v2 = vadd.f32 %v10564_v52, %v6473_v6  ;;  %v6478_v32 = vadd.f32 %v7622_v44, %v5552_v13  ;;  %v7313_v55 = vld [vmem:[%s8037_s23 + $0x28] sm:$0xff]   ;;  %v7312_v44 = vld [vmem:[%s8037_s23 + $0x20] sm:$0xff]  }
 0x402   : > { %v6361_v41 = vpop.f32.mrf.mxu1  ;;  %v5568_v34 = vadd.f32 %v10530_v45, %v10498_v5  ;;  %v7256_v6 = vunpack.c.h.bf16 %v7310_v36 }
 0x403   : > { %6671 = vst.msk [vmem:[%s10577_s16] sm:$0xff] %vm1478_vm12, %v6639_v21  ;;  %v6642_v7 = vmax.f32 %v6610_v24, 0.0  ;;  %v6608_v22 = vadd.f32 %v7248_v17, %v6512_v2  ;;  %v6517_v47 = vadd.f32 %v10564_v52, %v6478_v32  ;;  %v6476_v63 = vadd.f32 %v6361_v41, %v5544_v28  ;;  %v10609_v2 = vpop.f32.mrf.mxu0 }
 0x404   : > { %v7623_v14 = vpop.f32.mrf.mxu1  ;;  %v7267_v24 = vunpack.c.l.bf16 %v7313_v55 }
 0x405   : > { %6674 = vst.msk [vmem:[%s10577_s16 + $0x18] sm:$0xff] %vm1478_vm12, %v6642_v7  ;;  %v6640_v61 = vmax.f32 %v6608_v22, 0.0  ;;  %v6613_v13 = vadd.f32 %v7259_v8, %v6517_v47  ;;  %v6515_v33 = vadd.f32 %v10564_v52, %v6476_v63  ;;  %v6479_v17 = vadd.f32 %v7623_v14, %v5555_v42  ;;  %v10621_v14 = vpop.f32.mrf.mxu0 }
 0x406   : > { %v6364_v40 = vpop.f32.mrf.mxu1  ;;  %v5560_v8 = vadd.f32 %v10536_v43, %v10500_v62  ;;  %v5571_v42 = vadd.f32 %v10542_v11, %v10502_v31  ;;  %v5563_v47 = vadd.f32 %v10548_v30, %v10504_v58 }
 0x407   : > { %6672 = vst.msk [vmem:[%s10577_s16 + $0x8] sm:$0xff] %vm1478_vm12, %v6640_v61  ;;  %v6645_v10 = vmax.f32 %v6613_v13, 0.0  ;;  %v6611_v59 = vadd.f32 %v7255_v46, %v6515_v33  ;;  %v6518_v19 = vadd.f32 %v10564_v52, %v6479_v17  ;;  %v6477_v28 = vadd.f32 %v6364_v40, %v5547_v54  ;;  %v7315_v13 = vld [vmem:[%s8037_s23 + $0x38] sm:$0xff]  }
 0x408   : > { %v7626_v21 = vpop.f32.mrf.mxu1  ;;  %v7263_v46 = vunpack.c.l.bf16 %v7312_v44  ;;  %v7268_v54 = vunpack.c.h.bf16 %v7313_v55  ;;  %v5584_v33 = vadd.f32 %v10552_v27, %v10506_v1 }
 0x409   : > { %6677 = vst.msk [vmem:[%s10577_s16 + $0x30] sm:$0xff] %vm1478_vm12, %v6645_v10  ;;  %v6643_v5 = vmax.f32 %v6611_v59, 0.0  ;;  %v6614_v45 = vadd.f32 %v7260_v26, %v6518_v19  ;;  %v6516_v36 = vadd.f32 %v10564_v52, %v6477_v28  ;;  %v6482_v32 = vadd.f32 %v7626_v21, %v5568_v34  ;;  %v7314_v10 = vld [vmem:[%s8037_s23 + $0x30] sm:$0xff]  }
 0x40a   : > { %v6377_v41 = vpop.f32.mrf.mxu1  ;;  %v7264_v34 = vunpack.c.h.bf16 %v7312_v44  ;;  %v5576_v59 = vadd.f32 %v10559_v12, %v10508_v18  ;;  %v7275_v28 = vunpack.c.l.bf16 %v7315_v13  ;;  %v5587_v21 = vadd.f32 %v10567_v49, %v10510_v51 }
 0x40b   : > { %6675 = vst.msk [vmem:[%s10577_s16 + $0x20] sm:$0xff] %vm1478_vm12, %v6643_v5  ;;  %v6646_v62 = vmax.f32 %v6614_v45, 0.0  ;;  %v6612_v43 = vadd.f32 %v7256_v6, %v6516_v36  ;;  %v6521_v7 = vadd.f32 %v10564_v52, %v6482_v32  ;;  %v6480_v22 = vadd.f32 %v6377_v41, %v5560_v8  ;;  %v10631_v55 = vpop.f32.mrf.mxu0 }
 0x40c   : > { %v7627_v63 = vpop.f32.mrf.mxu1  ;;  %v7271_v5 = vunpack.c.l.bf16 %v7314_v10 }
 0x40d   : > { %6678 = vst.msk [vmem:[%s10577_s16 + $0x38] sm:$0xff] %vm1478_vm12, %v6646_v62  ;;  %v6644_v31 = vmax.f32 %v6612_v43, 0.0  ;;  %v6617_v11 = vadd.f32 %v7267_v24, %v6521_v7  ;;  %v6519_v26 = vadd.f32 %v10564_v52, %v6480_v22  ;;  %v6483_v61 = vadd.f32 %v7627_v63, %v5571_v42  ;;  %v5607_v18 = vpop.f32.mrf.mxu0  ;;  %v7317_v7 = vld [vmem:[%s8037_s23 + $0x48] sm:$0xff]  }
 0x40e   : > { %v6380_v17 = vpop.f32.mrf.mxu1  ;;  %v5579_v42 = vadd.f32 %v10579_v39, %v10512_v35  ;;  %v5600_v22 = vadd.f32 %v10586_v56, %v10514_v0  ;;  %v7272_v63 = vunpack.c.h.bf16 %v7314_v10 }
 0x40f   : > { %6676 = vst.msk [vmem:[%s10577_s16 + $0x28] sm:$0xff] %vm1478_vm12, %v6644_v31  ;;  %v6649_v58 = vmax.f32 %v6617_v11, 0.0  ;;  %v6615_v30 = vadd.f32 %v7263_v46, %v6519_v26  ;;  %v6522_v40 = vadd.f32 %v10564_v52, %v6483_v61  ;;  %v6481_v6 = vadd.f32 %v6380_v17, %v5563_v47  ;;  %v7603_v35 = vpop.f32.mrf.mxu0  ;;  %v7316_v26 = vld [vmem:[%s8037_s23 + $0x40] sm:$0xff]  }
 0x410   : > { %v7630_v19 = vpop.f32.mrf.mxu1  ;;  %v7276_v46 = vunpack.c.h.bf16 %v7315_v13  ;;  %v5592_v61 = vadd.f32 %v10597_v57, %v10516_v53 }
 0x411   : > { %6681 = vst.msk [vmem:[%s10577_s16 + $0x50] sm:$0xff] %vm1478_vm12, %v6649_v58  ;;  %v6647_v1 = vmax.f32 %v6615_v30, 0.0  ;;  %v6618_v27 = vadd.f32 %v7268_v54, %v6522_v40  ;;  %v6520_v44 = vadd.f32 %v10564_v52, %v6481_v6  ;;  %v6486_v8 = vadd.f32 %v7630_v19, %v5584_v33  ;;  %v5610_v6 = vpop.f32.mrf.mxu0 }
 0x412   : > { %v6393_v24 = vpop.f32.mrf.mxu1  ;;  %v7283_v33 = vunpack.c.l.bf16 %v7317_v7  ;;  %v5603_v58 = vadd.f32 %v10609_v2, %v10518_v38  ;;  %v7279_v40 = vunpack.c.l.bf16 %v7316_v26  ;;  %v5595_v19 = vadd.f32 %v10621_v14, %v10520_v15 }
 0x413   : > { %6679 = vst.msk [vmem:[%s10577_s16 + $0x40] sm:$0xff] %vm1478_vm12, %v6647_v1  ;;  %v6650_v45 = vmax.f32 %v6618_v27, 0.0  ;;  %v6616_v12 = vadd.f32 %v7264_v34, %v6520_v44  ;;  %v6525_v36 = vadd.f32 %v10564_v52, %v6486_v8  ;;  %v6484_v32 = vadd.f32 %v6393_v24, %v5576_v59 }
 0x414   : > { %v7631_v41 = vpop.f32.mrf.mxu1  ;;  %v7284_v1 = vunpack.c.h.bf16 %v7317_v7  ;;  %v5616_v24 = vadd.f32 %v10631_v55, %v10522_v48 }
 0x415   : > { %6682 = vst.msk [vmem:[%s10577_s16 + $0x58] sm:$0xff] %vm1478_vm12, %v6650_v45  ;;  %v6648_v51 = vmax.f32 %v6616_v12, 0.0  ;;  %v6621_v49 = vadd.f32 %v7275_v28, %v6525_v36  ;;  %v6523_v62 = vadd.f32 %v10564_v52, %v6484_v32  ;;  %v6487_v43 = vadd.f32 %v7631_v41, %v5587_v21  ;;  %v7319_v21 = vld [vmem:[%s8037_s23 + $0x58] sm:$0xff]   ;;  %v7318_v32 = vld [vmem:[%s8037_s23 + $0x50] sm:$0xff]  }
 0x416   : > { %v6396_v47 = vpop.f32.mrf.mxu1  ;;  %v7280_v45 = vunpack.c.h.bf16 %v7316_v26 }
 0x417   : > { %6680 = vst.msk [vmem:[%s10577_s16 + $0x48] sm:$0xff] %vm1478_vm12, %v6648_v51  ;;  %v6653_v39 = vmax.f32 %v6621_v49, 0.0  ;;  %v6619_v54 = vadd.f32 %v7271_v5, %v6523_v62  ;;  %v6526_v31 = vadd.f32 %v10564_v52, %v6487_v43  ;;  %v6485_v11 = vadd.f32 %v6396_v47, %v5579_v42 }
 0x418   : > { %v7634_v13 = vpop.f32.mrf.mxu1  ;;  %v5608_v42 = vadd.f32 %v5607_v18, %v10524_v3  ;;  %v5619_v43 = vadd.f32 %v7603_v35, %v10528_v25 }
 0x419   : > { %6685 = vst.msk [vmem:[%s10577_s16 + $0x70] sm:$0xff] %vm1478_vm12, %v6653_v39  ;;  %v6651_v0 = vmax.f32 %v6619_v54, 0.0  ;;  %v6622_v56 = vadd.f32 %v7276_v46, %v6526_v31  ;;  %v6524_v17 = vadd.f32 %v10564_v52, %v6485_v11  ;;  %v6490_v34 = vadd.f32 %v7634_v13, %v5600_v22  ;;  %v7321_v13 = vld [vmem:[%s8037_s23 + $0x68] sm:$0xff]  }
 0x41a   : > { %v6409_v30 = vpop.f32.mrf.mxu1  ;;  %v7291_v46 = vunpack.c.l.bf16 %v7319_v21  ;;  %v7287_v22 = vunpack.c.l.bf16 %v7318_v32  ;;  %v5611_v39 = vadd.f32 %v5610_v6, %v10532_v20  ;;  %v7292_v31 = vunpack.c.h.bf16 %v7319_v21 }
 0x41b   : > { %6683 = vst.msk [vmem:[%s10577_s16 + $0x60] sm:$0xff] %vm1478_vm12, %v6651_v0  ;;  %v6654_v53 = vmax.f32 %v6622_v56, 0.0  ;;  %v6620_v57 = vadd.f32 %v7272_v63, %v6524_v17  ;;  %v6529_v10 = vadd.f32 %v10564_v52, %v6490_v34  ;;  %v6488_v59 = vadd.f32 %v6409_v30, %v5592_v61  ;;  %v7606_v44 = vpop.f32.mrf.mxu0  ;;  %v7320_v30 = vld [vmem:[%s8037_s23 + $0x60] sm:$0xff]  }
 0x41c   : > { %v7635_v28 = vpop.f32.mrf.mxu1  ;;  %v7288_v56 = vunpack.c.h.bf16 %v7318_v32 }
 0x41d   : > { %6686 = vst.msk [vmem:[%s10577_s16 + $0x78] sm:$0xff] %vm1478_vm12, %v6654_v53  ;;  %v6652_v38 = vmax.f32 %v6620_v57, 0.0  ;;  %v6625_v2 = vadd.f32 %v7283_v33, %v6529_v10  ;;  %v6527_v27 = vadd.f32 %v10564_v52, %v6488_v59  ;;  %v6491_v8 = vadd.f32 %v7635_v28, %v5603_v58  ;;  %v5623_v55 = vpop.f32.mrf.mxu0 }
 0x41e   : > { %v6412_v5 = vpop.f32.mrf.mxu1  ;;  %v5632_v33 = vadd.f32 %v7606_v44, %v10534_v23  ;;  %v7299_v53 = vunpack.c.l.bf16 %v7321_v13 }
 0x41f   : > { %6684 = vst.msk [vmem:[%s10577_s16 + $0x68] sm:$0xff] %vm1478_vm12, %v6652_v38  ;;  %v6657_v15 = vmax.f32 %v6625_v2, 0.0  ;;  %v6623_v14 = vadd.f32 %v7279_v40, %v6527_v27  ;;  %v6530_v12 = vadd.f32 %v10564_v52, %v6491_v8  ;;  %v6489_v36 = vadd.f32 %v6412_v5, %v5595_v19  ;;  %v7607_v25 = vpop.f32.mrf.mxu0 }
 0x420   : > { %v7638_v41 = vpop.f32.mrf.mxu1  ;;  %v5624_v40 = vadd.f32 %v5623_v55, %v10538_v9  ;;  %v5635_v28 = vadd.f32 %v7607_v25, %v10540_v29  ;;  %v7295_v38 = vunpack.c.l.bf16 %v7320_v30 }
 0x421   : > { %6689 = vst.msk [vmem:[%s10577_s16 + $0x90] sm:$0xff] %vm1478_vm12, %v6657_v15  ;;  %v6655_v51 = vmax.f32 %v6623_v14, 0.0  ;;  %v6626_v48 = vadd.f32 %v7284_v1, %v6530_v12  ;;  %v6528_v49 = vadd.f32 %v10564_v52, %v6489_v36  ;;  %v6494_v62 = vadd.f32 %v7638_v41, %v5616_v24  ;;  %v5626_v57 = vpop.f32.mrf.mxu0 }
 0x422   : > { %v6425_v7 = vpop.f32.mrf.mxu1  ;;  %v5627_v8 = vadd.f32 %v5626_v57, %v10544_v37  ;;  %v7300_v24 = vunpack.c.h.bf16 %v7321_v13  ;;  %v7296_v12 = vunpack.c.h.bf16 %v7320_v30 }
 0x423   : > { %6687 = vst.msk [vmem:[%s10577_s16 + $0x80] sm:$0xff] %vm1478_vm12, %v6655_v51  ;;  %v6658_v47 = vmax.f32 %v6626_v48, 0.0  ;;  %v6624_v3 = vadd.f32 %v7280_v45, %v6528_v49  ;;  %v6533_v18 = vadd.f32 %v10564_v52, %v6494_v62  ;;  %v6492_v63 = vadd.f32 %v6425_v7, %v5608_v42  ;;  %v7323_v49 = vld [vmem:[%s8037_s23 + $0x78] sm:$0xff]  }
 0x424   : > { %v7639_v54 = vpop.f32.mrf.mxu1 }
 0x425   : > { %6690 = vst.msk [vmem:[%s10577_s16 + $0x98] sm:$0xff] %vm1478_vm12, %v6658_v47  ;;  %v6656_v11 = vmax.f32 %v6624_v3, 0.0  ;;  %v6629_v35 = vadd.f32 %v7291_v46, %v6533_v18  ;;  %v6531_v26 = vadd.f32 %v10564_v52, %v6492_v63  ;;  %v6495_v61 = vadd.f32 %v7639_v54, %v5619_v43  ;;  %v7322_v3 = vld [vmem:[%s8037_s23 + $0x70] sm:$0xff]  }
 0x426   : > { %v6428_v0 = vpop.f32.mrf.mxu1  ;;  %v7307_v63 = vunpack.c.l.bf16 %v7323_v49 }
 0x427   : > { %6688 = vst.msk [vmem:[%s10577_s16 + $0x88] sm:$0xff] %vm1478_vm12, %v6656_v11  ;;  %v6661_v20 = vmax.f32 %v6629_v35, 0.0  ;;  %v6627_v17 = vadd.f32 %v7287_v22, %v6531_v26  ;;  %v6534_v34 = vadd.f32 %v10564_v52, %v6495_v61  ;;  %v6493_v58 = vadd.f32 %v6428_v0, %v5611_v39 }
 0x428   : > { %v7642_v6 = vpop.f32.mrf.mxu1  ;;  %v7303_v35 = vunpack.c.l.bf16 %v7322_v3 }
 0x429   : > { %6693 = vst.msk [vmem:[%s10577_s16 + $0xb0] sm:$0xff] %vm1478_vm12, %v6661_v20  ;;  %v6659_v23 = vmax.f32 %v6627_v17, 0.0  ;;  %v6630_v10 = vadd.f32 %v7292_v31, %v6534_v34  ;;  %v6532_v59 = vadd.f32 %v10564_v52, %v6493_v58  ;;  %v6498_v19 = vadd.f32 %v7642_v6, %v5632_v33 }
 0x42a   : > { %v6441_v1 = vpop.f32.mrf.mxu1  ;;  %v7304_v20 = vunpack.c.h.bf16 %v7322_v3 }
 0x42b   : > { %6691 = vst.msk [vmem:[%s10577_s16 + $0xa0] sm:$0xff] %vm1478_vm12, %v6659_v23  ;;  %v6662_v2 = vmax.f32 %v6630_v10, 0.0  ;;  %v6628_v9 = vadd.f32 %v7288_v56, %v6532_v59  ;;  %v6537_v27 = vadd.f32 %v10564_v52, %v6498_v19  ;;  %v6496_v44 = vadd.f32 %v6441_v1, %v5624_v40 }
 0x42c   : > { %v7643_v21 = vpop.f32.mrf.mxu1  ;;  %v7308_v56 = vunpack.c.h.bf16 %v7323_v49 }
 0x42d   : > { %6694 = vst.msk [vmem:[%s10577_s16 + $0xb8] sm:$0xff] %vm1478_vm12, %v6662_v2  ;;  %v6660_v5 = vmax.f32 %v6628_v9, 0.0  ;;  %v6633_v45 = vadd.f32 %v7299_v53, %v6537_v27  ;;  %v6535_v29 = vadd.f32 %v10564_v52, %v6496_v44  ;;  %v6499_v15 = vadd.f32 %v7643_v21, %v5635_v28 }
 0x42e   : > { %v6444_v14 = vpop.f32.mrf.mxu1 }
 0x42f   : > { %6692 = vst.msk [vmem:[%s10577_s16 + $0xa8] sm:$0xff] %vm1478_vm12, %v6660_v5  ;;  %v6665_v36 = vmax.f32 %v6633_v45, 0.0  ;;  %v6631_v32 = vadd.f32 %v7295_v38, %v6535_v29  ;;  %v6538_v37 = vadd.f32 %v10564_v52, %v6499_v15  ;;  %v6497_v42 = vadd.f32 %v6444_v14, %v5627_v8 }
 0x430   : > { %v7610_v41 = vpop.f32.mrf.mxu0 }
 0x431   : > { %6697 = vst.msk [vmem:[%s10577_s16 + $0xd0] sm:$0xff] %vm1478_vm12, %v6665_v36  ;;  %v6663_v46 = vmax.f32 %v6631_v32, 0.0  ;;  %v6634_v51 = vadd.f32 %v7300_v24, %v6538_v37  ;;  %v6536_v48 = vadd.f32 %v10564_v52, %v6497_v42  ;;  %v5648_v55 = vadd.f32 %v7610_v41, %v10546_v4 }
 0x432   : > { %v5639_v62 = vpop.f32.mrf.mxu0 }
 0x433   : > { %6695 = vst.msk [vmem:[%s10577_s16 + $0xc0] sm:$0xff] %vm1478_vm12, %v6663_v46  ;;  %v6666_v43 = vmax.f32 %v6634_v51, 0.0  ;;  %v6632_v7 = vadd.f32 %v7296_v12, %v6536_v48  ;;  %v5640_v22 = vadd.f32 %v5639_v62, %v10550_v60  ;;  %v7646_v47 = vpop.f32.mrf.mxu1 }
 0x434   : > { %v6502_v18 = vadd.f32 %v7646_v47, %v5648_v55  ;;  %v7611_v39 = vpop.f32.mrf.mxu0 }
 0x435   : > { %6698 = vst.msk [vmem:[%s10577_s16 + $0xd8] sm:$0xff] %vm1478_vm12, %v6666_v43  ;;  %v6664_v54 = vmax.f32 %v6632_v7, 0.0  ;;  %v5651_v31 = vadd.f32 %v7611_v39, %v10554_v16  ;;  %v6457_v4 = vpop.f32.mrf.mxu1 }
 0x436   : > { %v6541_v11 = vadd.f32 %v10564_v52, %v6502_v18  ;;  %v6500_v25 = vadd.f32 %v6457_v4, %v5640_v22  ;;  %v5642_v26 = vpop.f32.mrf.mxu0 }
 0x437   : > { %6696 = vst.msk [vmem:[%s10577_s16 + $0xc8] sm:$0xff] %vm1478_vm12, %v6664_v54  ;;  %v5643_v60 = vadd.f32 %v5642_v26, %v10556_v50  ;;  %v7647_v61 = vpop.f32.mrf.mxu1 }
 0x438   : > { %v6637_v13 = vadd.f32 %v7307_v63, %v6541_v11  ;;  %v6539_v33 = vadd.f32 %v10564_v52, %v6500_v25  ;;  %v6503_v0 = vadd.f32 %v7647_v61, %v5651_v31 }
 0x439   : > { %v6460_v16 = vpop.f32.mrf.mxu1 }
 0x43a   : > { %v6669_v17 = vmax.f32 %v6637_v13, 0.0  ;;  %v6635_v34 = vadd.f32 %v7303_v35, %v6539_v33  ;;  %v6542_v58 = vadd.f32 %v10564_v52, %v6503_v0  ;;  %v6501_v30 = vadd.f32 %v6460_v16, %v5643_v60 }
 0x43c   : > { %6701 = vst.msk [vmem:[%s10577_s16 + $0xf0] sm:$0xff] %vm1478_vm12, %v6669_v17  ;;  %v6667_v40 = vmax.f32 %v6635_v34, 0.0  ;;  %v6638_v50 = vadd.f32 %v7308_v56, %v6542_v58  ;;  %v6540_v6 = vadd.f32 %v10564_v52, %v6501_v30 }
 0x43e   : > { %6699 = vst.msk [vmem:[%s10577_s16 + $0xe0] sm:$0xff] %vm1478_vm12, %v6667_v40  ;;  %v6670_v53 = vmax.f32 %v6638_v50, 0.0  ;;  %v6636_v57 = vadd.f32 %v7304_v20, %v6540_v6 }
 0x440   : > { %6702 = vst.msk [vmem:[%s10577_s16 + $0xf8] sm:$0xff] %vm1478_vm12, %v6670_v53  ;;  %v6668_v23 = vmax.f32 %v6636_v57, 0.0 }
 0x442   : > { %6700 = vst.msk [vmem:[%s10577_s16 + $0xe8] sm:$0xff] %vm1478_vm12, %v6668_v23 }
 0x443 PF: > { %s15_s18 = sadd.s32 1, %s7968_s18  }
 0x444   : > { %p12_p4 = scmp.ge.s32.totalorder %s15_s18, 4  }
 0x446   :  { %14 = sbr.rel (!%p12_p4) target bundleno = 1 (0x1), region = 80 }

</bundles_post_ra>
